<compile_context>
chip_gen: v7x
topology: tpu7x:2x2x1
jax: 0.10.0
libtpu: 0.0.40
codegen_flags: <defaults>
</compile_context>

<pallas_src>
import functools

import jax
import jax.numpy as jnp
import numpy as np
from jax.experimental import pallas as pl
from jax.experimental.pallas import tpu as pltpu

# 3x3 taps in row-major (dh, dw) order -- matches PyTorch cross-correlation.
TAPS = tuple((dh, dw) for dh in range(3) for dw in range(3))


def denoiser_kernel(xp_ref, w1_ref, b1_ref, w2_ref, b2_ref, o_ref, hpad_ref,
                    *, H, W, F, NB):
    # xp_ref  : (NB, H+2, W+2) VMEM  zero-padded input planes for this batch block
    # w1_ref  : (F*9,)         SMEM  conv1 weights, [f, dh, dw] flattened
    # b1_ref  : (F,)           SMEM  conv1 bias
    # w2_ref  : (F*9,)         SMEM  conv2 weights, [f, dh, dw] flattened
    # b2_ref  : (1,)           SMEM  conv2 bias (scalar)
    # o_ref   : (NB, H, W)     VMEM  output planes
    # hpad_ref: (NB, H+2, W+2) VMEM  scratch: one padded ReLU activation plane (reused per channel)
    f32 = jnp.float32

    # Zero only the 1-pixel border of the scratch (interior is overwritten every channel).
    hpad_ref[:, 0:1, :] = jnp.zeros((NB, 1, W + 2), f32)
    hpad_ref[:, H + 1:H + 2, :] = jnp.zeros((NB, 1, W + 2), f32)
    hpad_ref[:, :, 0:1] = jnp.zeros((NB, H + 2, 1), f32)
    hpad_ref[:, :, W + 1:W + 2] = jnp.zeros((NB, H + 2, 1), f32)

    # The 9 shifted input windows are shared by every conv1 output channel -> hoist.
    patches = [xp_ref[:, dh:dh + H, dw:dw + W] for (dh, dw) in TAPS]  # 9 x [NB,H,W]

    # conv2 accumulator (f32), initialized with its bias.
    acc2 = jnp.full((NB, H, W), b2_ref[0], dtype=f32)

    for f in range(F):
        # ---- Conv1 channel f (1 -> F, 3x3, pad=1): scalar-weight plane FMAs ----
        acc1 = jnp.full((NB, H, W), b1_ref[f], dtype=f32)
        for t in range(9):
            acc1 = acc1 + patches[t] * w1_ref[f * 9 + t]

        # ReLU, placed in the interior of the zero-bordered scratch plane (pad=1 for conv2).
        hpad_ref[:, 1:H + 1, 1:W + 1] = jnp.maximum(acc1, 0.0)

        # ---- Conv2 contribution of channel f (F -> 1, 3x3, pad=1) ----
        for t, (dh, dw) in enumerate(TAPS):
            acc2 = acc2 + hpad_ref[:, dh:dh + H, dw:dw + W] * w2_ref[f * 9 + t]

    o_ref[...] = acc2.astype(o_ref.dtype)


def _batch_block(n, max_nb=2):
    # Largest divisor of n that is <= max_nb: amortizes per-step overhead while keeping
    # register pressure bounded; >1 grid steps keep both v7x cores busy for N >= 4.
    for nb in range(min(n, max_nb), 0, -1):
        if n % nb == 0:
            return nb
    return 1


def denoiser_pallas(x, w1, b1, w2, b2):
    """x: [N, 1, H, W] (NCHW).  w1: [F,1,3,3], b1: [F], w2: [1,F,3,3], b2: [1]."""
    N, C, H, W = x.shape
    assert C == 1, "Denoiser expects a single input channel"
    F = w1.shape[0]
    NB = _batch_block(N)

    # Glue: zero-pad spatially outside the kernel; flatten weights to [f, dh, dw] order.
    xp = jnp.pad(x[:, 0].astype(jnp.float32), ((0, 0), (1, 1), (1, 1)))  # [N, H+2, W+2]
    w1k = w1.reshape(F * 9).astype(jnp.float32)                          # w1[f,0,dh,dw] flat
    b1k = b1.reshape(F).astype(jnp.float32)
    w2k = w2.reshape(F * 9).astype(jnp.float32)                          # w2[0,f,dh,dw] flat
    b2k = b2.reshape(1).astype(jnp.float32)

    kern = functools.partial(denoiser_kernel, H=H, W=W, F=F, NB=NB)
    smem_spec = pl.BlockSpec(memory_space=pltpu.MemorySpace.SMEM)

    out = pl.pallas_call(
        kern,
        out_shape=jax.ShapeDtypeStruct((N, H, W), x.dtype),
        grid_spec=pltpu.PrefetchScalarGridSpec(
            num_scalar_prefetch=0,
            grid=(N // NB,),
            in_specs=[
                pl.BlockSpec((NB, H + 2, W + 2), lambda n: (n, 0, 0)),
                smem_spec,   # w1
                smem_spec,   # b1
                smem_spec,   # w2
                smem_spec,   # b2
            ],
            out_specs=pl.BlockSpec((NB, H, W), lambda n: (n, 0, 0)),
            scratch_shapes=[pltpu.VMEM((NB, H + 2, W + 2), jnp.float32)],
        ),
        compiler_params=pltpu.CompilerParams(dimension_semantics=("parallel",)),
    )(xp, w1k, b1k, w2k, b2k)
    return out.reshape(N, 1, H, W)


def denoiser_reference(x, w1, b1, w2, b2):
    dn = ("NCHW", "OIHW", "NCHW")
    y = jax.lax.conv_general_dilated(x, w1, (1, 1), "SAME", dimension_numbers=dn)
    y = y + b1.reshape(1, -1, 1, 1)
    y = jnp.maximum(y, 0.0)
    y = jax.lax.conv_general_dilated(y, w2, (1, 1), "SAME", dimension_numbers=dn)
    y = y + b2.reshape(1, -1, 1, 1)
    return y


if __name__ == "__main__":
    N, H, W, FILTERS = 2, 16, 16, 8

    key = jax.random.PRNGKey(0)
    kx, kw1, kb1, kw2, kb2 = jax.random.split(key, 5)

    x = jax.random.normal(kx, (N, 1, H, W), dtype=jnp.float32)
    # Deterministic synthetic parameters (shapes match nn.Conv2d in the module).
    w1 = jax.random.normal(kw1, (FILTERS, 1, 3, 3), dtype=jnp.float32) * 0.2
    b1 = jax.random.normal(kb1, (FILTERS,), dtype=jnp.float32) * 0.1
    w2 = jax.random.normal(kw2, (1, FILTERS, 3, 3), dtype=jnp.float32) * 0.2
    b2 = jax.random.normal(kb2, (1,), dtype=jnp.float32) * 0.1

    out = jax.block_until_ready(denoiser_pallas(x, w1, b1, w2, b2))
    ref = jax.block_until_ready(denoiser_reference(x, w1, b1, w2, b2))

    np.testing.assert_allclose(np.asarray(out), np.asarray(ref), rtol=1e-4, atol=1e-4)
    assert out.shape == (N, 1, H, W)

    print("KERNEL_OK")
</pallas_src>

<mosaic_0001>
module attributes {stable_mosaic.version = 11 : i64} {
  func.func @denoiser_kernel(%arg0: i32, %arg1: memref<2x18x18xf32, #tpu.memory_space<vmem>>, %arg2: memref<72xf32, #tpu.memory_space<smem>>, %arg3: memref<8xf32, #tpu.memory_space<smem>>, %arg4: memref<72xf32, #tpu.memory_space<smem>>, %arg5: memref<1xf32, #tpu.memory_space<smem>>, %arg6: memref<2x16x16xf32, #tpu.memory_space<vmem>>, %arg7: memref<2x18x18xf32, #tpu.memory_space<vmem>>) attributes {dimension_semantics = [#tpu.dimension_semantics<parallel>], iteration_bounds = array<i64: 1>, scalar_prefetch = 0 : i64, scratch_operands = 1 : i64, tpu.core_type = #tpu.core_type<tc>, window_params = [{transform_indices = @transform_0, window_bounds = array<i64: 2, 18, 18>}, {transform_indices = @transform_1, window_bounds = array<i64: 72>}, {transform_indices = @transform_2, window_bounds = array<i64: 8>}, {transform_indices = @transform_3, window_bounds = array<i64: 72>}, {transform_indices = @transform_4, window_bounds = array<i64: 1>}, {transform_indices = @transform_5, window_bounds = array<i64: 2, 16, 16>}]} {
    %cst = arith.constant 0.000000e+00 : f32
    %0 = vector.broadcast %cst : f32 to vector<2x1x18xf32>
    %c0 = arith.constant 0 : index
    %c0_0 = arith.constant 0 : index
    %c0_1 = arith.constant 0 : index
    %1 = vector.load %arg7[%c0, %c0_0, %c0_1] : memref<2x18x18xf32, #tpu.memory_space<vmem>>, vector<2x1x18xf32>
    tpu.vector_store %arg7[%c0, %c0_0, %c0_1], %0 {strides = array<i32>} : memref<2x18x18xf32, #tpu.memory_space<vmem>>, vector<2x1x18xf32>,
    %cst_2 = arith.constant 0.000000e+00 : f32
    %2 = vector.broadcast %cst_2 : f32 to vector<2x1x18xf32>
    %c0_3 = arith.constant 0 : index
    %c17 = arith.constant 17 : index
    %c0_4 = arith.constant 0 : index
    %3 = vector.load %arg7[%c0_3, %c17, %c0_4] : memref<2x18x18xf32, #tpu.memory_space<vmem>>, vector<2x1x18xf32>
    tpu.vector_store %arg7[%c0_3, %c17, %c0_4], %2 {strides = array<i32>} : memref<2x18x18xf32, #tpu.memory_space<vmem>>, vector<2x1x18xf32>,
    %cst_5 = arith.constant 0.000000e+00 : f32
    %4 = vector.broadcast %cst_5 : f32 to vector<2x18x1xf32>
    %c0_6 = arith.constant 0 : index
    %c0_7 = arith.constant 0 : index
    %c0_8 = arith.constant 0 : index
    %5 = vector.load %arg7[%c0_6, %c0_7, %c0_8] : memref<2x18x18xf32, #tpu.memory_space<vmem>>, vector<2x18x1xf32>
    tpu.vector_store %arg7[%c0_6, %c0_7, %c0_8], %4 {strides = array<i32>} : memref<2x18x18xf32, #tpu.memory_space<vmem>>, vector<2x18x1xf32>,
    %cst_9 = arith.constant 0.000000e+00 : f32
    %6 = vector.broadcast %cst_9 : f32 to vector<2x18x1xf32>
    %c0_10 = arith.constant 0 : index
    %c0_11 = arith.constant 0 : index
    %c17_12 = arith.constant 17 : index
    %7 = vector.load %arg7[%c0_10, %c0_11, %c17_12] : memref<2x18x18xf32, #tpu.memory_space<vmem>>, vector<2x18x1xf32>
    tpu.vector_store %arg7[%c0_10, %c0_11, %c17_12], %6 {strides = array<i32>} : memref<2x18x18xf32, #tpu.memory_space<vmem>>, vector<2x18x1xf32>,
    %c0_13 = arith.constant 0 : index
    %c0_14 = arith.constant 0 : index
    %c0_15 = arith.constant 0 : index
    %8 = vector.load %arg1[%c0_13, %c0_14, %c0_15] : memref<2x18x18xf32, #tpu.memory_space<vmem>>, vector<2x16x16xf32>
    %c0_16 = arith.constant 0 : index
    %c0_17 = arith.constant 0 : index
    %c1 = arith.constant 1 : index
    %9 = vector.load %arg1[%c0_16, %c0_17, %c1] : memref<2x18x18xf32, #tpu.memory_space<vmem>>, vector<2x16x16xf32>
    %c0_18 = arith.constant 0 : index
    %c0_19 = arith.constant 0 : index
    %c2 = arith.constant 2 : index
    %10 = vector.load %arg1[%c0_18, %c0_19, %c2] : memref<2x18x18xf32, #tpu.memory_space<vmem>>, vector<2x16x16xf32>
    %c0_20 = arith.constant 0 : index
    %c1_21 = arith.constant 1 : index
    %c0_22 = arith.constant 0 : index
    %11 = vector.load %arg1[%c0_20, %c1_21, %c0_22] : memref<2x18x18xf32, #tpu.memory_space<vmem>>, vector<2x16x16xf32>
    %c0_23 = arith.constant 0 : index
    %c1_24 = arith.constant 1 : index
    %c1_25 = arith.constant 1 : index
    %12 = vector.load %arg1[%c0_23, %c1_24, %c1_25] : memref<2x18x18xf32, #tpu.memory_space<vmem>>, vector<2x16x16xf32>
    %c0_26 = arith.constant 0 : index
    %c1_27 = arith.constant 1 : index
    %c2_28 = arith.constant 2 : index
    %13 = vector.load %arg1[%c0_26, %c1_27, %c2_28] : memref<2x18x18xf32, #tpu.memory_space<vmem>>, vector<2x16x16xf32>
    %c0_29 = arith.constant 0 : index
    %c2_30 = arith.constant 2 : index
    %c0_31 = arith.constant 0 : index
    %14 = vector.load %arg1[%c0_29, %c2_30, %c0_31] : memref<2x18x18xf32, #tpu.memory_space<vmem>>, vector<2x16x16xf32>
    %c0_32 = arith.constant 0 : index
    %c2_33 = arith.constant 2 : index
    %c1_34 = arith.constant 1 : index
    %15 = vector.load %arg1[%c0_32, %c2_33, %c1_34] : memref<2x18x18xf32, #tpu.memory_space<vmem>>, vector<2x16x16xf32>
    %c0_35 = arith.constant 0 : index
    %c2_36 = arith.constant 2 : index
    %c2_37 = arith.constant 2 : index
    %16 = vector.load %arg1[%c0_35, %c2_36, %c2_37] : memref<2x18x18xf32, #tpu.memory_space<vmem>>, vector<2x16x16xf32>
    %c0_38 = arith.constant 0 : index
    %17 = memref.load %arg5[%c0_38] : memref<1xf32, #tpu.memory_space<smem>>
    %18 = vector.broadcast %17 : f32 to vector<2x16x16xf32>
    %c0_39 = arith.constant 0 : index
    %19 = memref.load %arg3[%c0_39] : memref<8xf32, #tpu.memory_space<smem>>
    %20 = vector.broadcast %19 : f32 to vector<2x16x16xf32>
    %c0_40 = arith.constant 0 : index
    %21 = memref.load %arg2[%c0_40] : memref<72xf32, #tpu.memory_space<smem>>
    %22 = vector.broadcast %21 : f32 to vector<2x16x16xf32>
    %23 = arith.mulf %8, %22 : vector<2x16x16xf32>
    %24 = arith.addf %20, %23 : vector<2x16x16xf32>
    %c1_41 = arith.constant 1 : index
    %25 = memref.load %arg2[%c1_41] : memref<72xf32, #tpu.memory_space<smem>>
    %26 = vector.broadcast %25 : f32 to vector<2x16x16xf32>
    %27 = arith.mulf %9, %26 : vector<2x16x16xf32>
    %28 = arith.addf %24, %27 : vector<2x16x16xf32>
    %c2_42 = arith.constant 2 : index
    %29 = memref.load %arg2[%c2_42] : memref<72xf32, #tpu.memory_space<smem>>
    %30 = vector.broadcast %29 : f32 to vector<2x16x16xf32>
    %31 = arith.mulf %10, %30 : vector<2x16x16xf32>
    %32 = arith.addf %28, %31 : vector<2x16x16xf32>
    %c3 = arith.constant 3 : index
    %33 = memref.load %arg2[%c3] : memref<72xf32, #tpu.memory_space<smem>>
    %34 = vector.broadcast %33 : f32 to vector<2x16x16xf32>
    %35 = arith.mulf %11, %34 : vector<2x16x16xf32>
    %36 = arith.addf %32, %35 : vector<2x16x16xf32>
    %c4 = arith.constant 4 : index
    %37 = memref.load %arg2[%c4] : memref<72xf32, #tpu.memory_space<smem>>
    %38 = vector.broadcast %37 : f32 to vector<2x16x16xf32>
    %39 = arith.mulf %12, %38 : vector<2x16x16xf32>
    %40 = arith.addf %36, %39 : vector<2x16x16xf32>
    %c5 = arith.constant 5 : index
    %41 = memref.load %arg2[%c5] : memref<72xf32, #tpu.memory_space<smem>>
    %42 = vector.broadcast %41 : f32 to vector<2x16x16xf32>
    %43 = arith.mulf %13, %42 : vector<2x16x16xf32>
    %44 = arith.addf %40, %43 : vector<2x16x16xf32>
    %c6 = arith.constant 6 : index
    %45 = memref.load %arg2[%c6] : memref<72xf32, #tpu.memory_space<smem>>
    %46 = vector.broadcast %45 : f32 to vector<2x16x16xf32>
    %47 = arith.mulf %14, %46 : vector<2x16x16xf32>
    %48 = arith.addf %44, %47 : vector<2x16x16xf32>
    %c7 = arith.constant 7 : index
    %49 = memref.load %arg2[%c7] : memref<72xf32, #tpu.memory_space<smem>>
    %50 = vector.broadcast %49 : f32 to vector<2x16x16xf32>
    %51 = arith.mulf %15, %50 : vector<2x16x16xf32>
    %52 = arith.addf %48, %51 : vector<2x16x16xf32>
    %c8 = arith.constant 8 : index
    %53 = memref.load %arg2[%c8] : memref<72xf32, #tpu.memory_space<smem>>
    %54 = vector.broadcast %53 : f32 to vector<2x16x16xf32>
    %55 = arith.mulf %16, %54 : vector<2x16x16xf32>
    %56 = arith.addf %52, %55 : vector<2x16x16xf32>
    %cst_43 = arith.constant 0.000000e+00 : f32
    %57 = vector.broadcast %cst_43 : f32 to vector<2x16x16xf32>
    %58 = arith.maximumf %56, %57 : vector<2x16x16xf32>
    %c0_44 = arith.constant 0 : index
    %c1_45 = arith.constant 1 : index
    %c1_46 = arith.constant 1 : index
    %59 = vector.load %arg7[%c0_44, %c1_45, %c1_46] : memref<2x18x18xf32, #tpu.memory_space<vmem>>, vector<2x16x16xf32>
    tpu.vector_store %arg7[%c0_44, %c1_45, %c1_46], %58 {strides = array<i32>} : memref<2x18x18xf32, #tpu.memory_space<vmem>>, vector<2x16x16xf32>,
    %c0_47 = arith.constant 0 : index
    %c0_48 = arith.constant 0 : index
    %c0_49 = arith.constant 0 : index
    %60 = vector.load %arg7[%c0_47, %c0_48, %c0_49] : memref<2x18x18xf32, #tpu.memory_space<vmem>>, vector<2x16x16xf32>
    %c0_50 = arith.constant 0 : index
    %61 = memref.load %arg4[%c0_50] : memref<72xf32, #tpu.memory_space<smem>>
    %62 = vector.broadcast %61 : f32 to vector<2x16x16xf32>
    %63 = arith.mulf %60, %62 : vector<2x16x16xf32>
    %64 = arith.addf %18, %63 : vector<2x16x16xf32>
    %c0_51 = arith.constant 0 : index
    %c0_52 = arith.constant 0 : index
    %c1_53 = arith.constant 1 : index
    %65 = vector.load %arg7[%c0_51, %c0_52, %c1_53] : memref<2x18x18xf32, #tpu.memory_space<vmem>>, vector<2x16x16xf32>
    %c1_54 = arith.constant 1 : index
    %66 = memref.load %arg4[%c1_54] : memref<72xf32, #tpu.memory_space<smem>>
    %67 = vector.broadcast %66 : f32 to vector<2x16x16xf32>
    %68 = arith.mulf %65, %67 : vector<2x16x16xf32>
    %69 = arith.addf %64, %68 : vector<2x16x16xf32>
    %c0_55 = arith.constant 0 : index
    %c0_56 = arith.constant 0 : index
    %c2_57 = arith.constant 2 : index
    %70 = vector.load %arg7[%c0_55, %c0_56, %c2_57] : memref<2x18x18xf32, #tpu.memory_space<vmem>>, vector<2x16x16xf32>
    %c2_58 = arith.constant 2 : index
    %71 = memref.load %arg4[%c2_58] : memref<72xf32, #tpu.memory_space<smem>>
    %72 = vector.broadcast %71 : f32 to vector<2x16x16xf32>
    %73 = arith.mulf %70, %72 : vector<2x16x16xf32>
    %74 = arith.addf %69, %73 : vector<2x16x16xf32>
    %c0_59 = arith.constant 0 : index
    %c1_60 = arith.constant 1 : index
    %c0_61 = arith.constant 0 : index
    %75 = vector.load %arg7[%c0_59, %c1_60, %c0_61] : memref<2x18x18xf32, #tpu.memory_space<vmem>>, vector<2x16x16xf32>
    %c3_62 = arith.constant 3 : index
    %76 = memref.load %arg4[%c3_62] : memref<72xf32, #tpu.memory_space<smem>>
    %77 = vector.broadcast %76 : f32 to vector<2x16x16xf32>
    %78 = arith.mulf %75, %77 : vector<2x16x16xf32>
    %79 = arith.addf %74, %78 : vector<2x16x16xf32>
    %c0_63 = arith.constant 0 : index
    %c1_64 = arith.constant 1 : index
    %c1_65 = arith.constant 1 : index
    %80 = vector.load %arg7[%c0_63, %c1_64, %c1_65] : memref<2x18x18xf32, #tpu.memory_space<vmem>>, vector<2x16x16xf32>
    %c4_66 = arith.constant 4 : index
    %81 = memref.load %arg4[%c4_66] : memref<72xf32, #tpu.memory_space<smem>>
    %82 = vector.broadcast %81 : f32 to vector<2x16x16xf32>
    %83 = arith.mulf %80, %82 : vector<2x16x16xf32>
    %84 = arith.addf %79, %83 : vector<2x16x16xf32>
    %c0_67 = arith.constant 0 : index
    %c1_68 = arith.constant 1 : index
    %c2_69 = arith.constant 2 : index
    %85 = vector.load %arg7[%c0_67, %c1_68, %c2_69] : memref<2x18x18xf32, #tpu.memory_space<vmem>>, vector<2x16x16xf32>
    %c5_70 = arith.constant 5 : index
    %86 = memref.load %arg4[%c5_70] : memref<72xf32, #tpu.memory_space<smem>>
    %87 = vector.broadcast %86 : f32 to vector<2x16x16xf32>
    %88 = arith.mulf %85, %87 : vector<2x16x16xf32>
    %89 = arith.addf %84, %88 : vector<2x16x16xf32>
    %c0_71 = arith.constant 0 : index
    %c2_72 = arith.constant 2 : index
    %c0_73 = arith.constant 0 : index
    %90 = vector.load %arg7[%c0_71, %c2_72, %c0_73] : memref<2x18x18xf32, #tpu.memory_space<vmem>>, vector<2x16x16xf32>
    %c6_74 = arith.constant 6 : index
    %91 = memref.load %arg4[%c6_74] : memref<72xf32, #tpu.memory_space<smem>>
    %92 = vector.broadcast %91 : f32 to vector<2x16x16xf32>
    %93 = arith.mulf %90, %92 : vector<2x16x16xf32>
    %94 = arith.addf %89, %93 : vector<2x16x16xf32>
    %c0_75 = arith.constant 0 : index
    %c2_76 = arith.constant 2 : index
    %c1_77 = arith.constant 1 : index
    %95 = vector.load %arg7[%c0_75, %c2_76, %c1_77] : memref<2x18x18xf32, #tpu.memory_space<vmem>>, vector<2x16x16xf32>
    %c7_78 = arith.constant 7 : index
    %96 = memref.load %arg4[%c7_78] : memref<72xf32, #tpu.memory_space<smem>>
    %97 = vector.broadcast %96 : f32 to vector<2x16x16xf32>
    %98 = arith.mulf %95, %97 : vector<2x16x16xf32>
    %99 = arith.addf %94, %98 : vector<2x16x16xf32>
    %c0_79 = arith.constant 0 : index
    %c2_80 = arith.constant 2 : index
    %c2_81 = arith.constant 2 : index
    %100 = vector.load %arg7[%c0_79, %c2_80, %c2_81] : memref<2x18x18xf32, #tpu.memory_space<vmem>>, vector<2x16x16xf32>
    %c8_82 = arith.constant 8 : index
    %101 = memref.load %arg4[%c8_82] : memref<72xf32, #tpu.memory_space<smem>>
    %102 = vector.broadcast %101 : f32 to vector<2x16x16xf32>
    %103 = arith.mulf %100, %102 : vector<2x16x16xf32>
    %104 = arith.addf %99, %103 : vector<2x16x16xf32>
    %c1_83 = arith.constant 1 : index
    %105 = memref.load %arg3[%c1_83] : memref<8xf32, #tpu.memory_space<smem>>
    %106 = vector.broadcast %105 : f32 to vector<2x16x16xf32>
    %c9 = arith.constant 9 : index
    %107 = memref.load %arg2[%c9] : memref<72xf32, #tpu.memory_space<smem>>
    %108 = vector.broadcast %107 : f32 to vector<2x16x16xf32>
    %109 = arith.mulf %8, %108 : vector<2x16x16xf32>
    %110 = arith.addf %106, %109 : vector<2x16x16xf32>
    %c10 = arith.constant 10 : index
    %111 = memref.load %arg2[%c10] : memref<72xf32, #tpu.memory_space<smem>>
    %112 = vector.broadcast %111 : f32 to vector<2x16x16xf32>
    %113 = arith.mulf %9, %112 : vector<2x16x16xf32>
    %114 = arith.addf %110, %113 : vector<2x16x16xf32>
    %c11 = arith.constant 11 : index
    %115 = memref.load %arg2[%c11] : memref<72xf32, #tpu.memory_space<smem>>
    %116 = vector.broadcast %115 : f32 to vector<2x16x16xf32>
    %117 = arith.mulf %10, %116 : vector<2x16x16xf32>
    %118 = arith.addf %114, %117 : vector<2x16x16xf32>
    %c12 = arith.constant 12 : index
    %119 = memref.load %arg2[%c12] : memref<72xf32, #tpu.memory_space<smem>>
    %120 = vector.broadcast %119 : f32 to vector<2x16x16xf32>
    %121 = arith.mulf %11, %120 : vector<2x16x16xf32>
    %122 = arith.addf %118, %121 : vector<2x16x16xf32>
    %c13 = arith.constant 13 : index
    %123 = memref.load %arg2[%c13] : memref<72xf32, #tpu.memory_space<smem>>
    %124 = vector.broadcast %123 : f32 to vector<2x16x16xf32>
    %125 = arith.mulf %12, %124 : vector<2x16x16xf32>
    %126 = arith.addf %122, %125 : vector<2x16x16xf32>
    %c14 = arith.constant 14 : index
    %127 = memref.load %arg2[%c14] : memref<72xf32, #tpu.memory_space<smem>>
    %128 = vector.broadcast %127 : f32 to vector<2x16x16xf32>
    %129 = arith.mulf %13, %128 : vector<2x16x16xf32>
    %130 = arith.addf %126, %129 : vector<2x16x16xf32>
    %c15 = arith.constant 15 : index
    %131 = memref.load %arg2[%c15] : memref<72xf32, #tpu.memory_space<smem>>
    %132 = vector.broadcast %131 : f32 to vector<2x16x16xf32>
    %133 = arith.mulf %14, %132 : vector<2x16x16xf32>
    %134 = arith.addf %130, %133 : vector<2x16x16xf32>
    %c16 = arith.constant 16 : index
    %135 = memref.load %arg2[%c16] : memref<72xf32, #tpu.memory_space<smem>>
    %136 = vector.broadcast %135 : f32 to vector<2x16x16xf32>
    %137 = arith.mulf %15, %136 : vector<2x16x16xf32>
    %138 = arith.addf %134, %137 : vector<2x16x16xf32>
    %c17_84 = arith.constant 17 : index
    %139 = memref.load %arg2[%c17_84] : memref<72xf32, #tpu.memory_space<smem>>
    %140 = vector.broadcast %139 : f32 to vector<2x16x16xf32>
    %141 = arith.mulf %16, %140 : vector<2x16x16xf32>
    %142 = arith.addf %138, %141 : vector<2x16x16xf32>
    %cst_85 = arith.constant 0.000000e+00 : f32
    %143 = vector.broadcast %cst_85 : f32 to vector<2x16x16xf32>
    %144 = arith.maximumf %142, %143 : vector<2x16x16xf32>
    %c0_86 = arith.constant 0 : index
    %c1_87 = arith.constant 1 : index
    %c1_88 = arith.constant 1 : index
    %145 = vector.load %arg7[%c0_86, %c1_87, %c1_88] : memref<2x18x18xf32, #tpu.memory_space<vmem>>, vector<2x16x16xf32>
    tpu.vector_store %arg7[%c0_86, %c1_87, %c1_88], %144 {strides = array<i32>} : memref<2x18x18xf32, #tpu.memory_space<vmem>>, vector<2x16x16xf32>,
    %c0_89 = arith.constant 0 : index
    %c0_90 = arith.constant 0 : index
    %c0_91 = arith.constant 0 : index
    %146 = vector.load %arg7[%c0_89, %c0_90, %c0_91] : memref<2x18x18xf32, #tpu.memory_space<vmem>>, vector<2x16x16xf32>
    %c9_92 = arith.constant 9 : index
    %147 = memref.load %arg4[%c9_92] : memref<72xf32, #tpu.memory_space<smem>>
    %148 = vector.broadcast %147 : f32 to vector<2x16x16xf32>
    %149 = arith.mulf %146, %148 : vector<2x16x16xf32>
    %150 = arith.addf %104, %149 : vector<2x16x16xf32>
    %c0_93 = arith.constant 0 : index
    %c0_94 = arith.constant 0 : index
    %c1_95 = arith.constant 1 : index
    %151 = vector.load %arg7[%c0_93, %c0_94, %c1_95] : memref<2x18x18xf32, #tpu.memory_space<vmem>>, vector<2x16x16xf32>
    %c10_96 = arith.constant 10 : index
    %152 = memref.load %arg4[%c10_96] : memref<72xf32, #tpu.memory_space<smem>>
    %153 = vector.broadcast %152 : f32 to vector<2x16x16xf32>
    %154 = arith.mulf %151, %153 : vector<2x16x16xf32>
    %155 = arith.addf %150, %154 : vector<2x16x16xf32>
    %c0_97 = arith.constant 0 : index
    %c0_98 = arith.constant 0 : index
    %c2_99 = arith.constant 2 : index
    %156 = vector.load %arg7[%c0_97, %c0_98, %c2_99] : memref<2x18x18xf32, #tpu.memory_space<vmem>>, vector<2x16x16xf32>
    %c11_100 = arith.constant 11 : index
    %157 = memref.load %arg4[%c11_100] : memref<72xf32, #tpu.memory_space<smem>>
    %158 = vector.broadcast %157 : f32 to vector<2x16x16xf32>
    %159 = arith.mulf %156, %158 : vector<2x16x16xf32>
    %160 = arith.addf %155, %159 : vector<2x16x16xf32>
    %c0_101 = arith.constant 0 : index
    %c1_102 = arith.constant 1 : index
    %c0_103 = arith.constant 0 : index
    %161 = vector.load %arg7[%c0_101, %c1_102, %c0_103] : memref<2x18x18xf32, #tpu.memory_space<vmem>>, vector<2x16x16xf32>
    %c12_104 = arith.constant 12 : index
    %162 = memref.load %arg4[%c12_104] : memref<72xf32, #tpu.memory_space<smem>>
    %163 = vector.broadcast %162 : f32 to vector<2x16x16xf32>
    %164 = arith.mulf %161, %163 : vector<2x16x16xf32>
    %165 = arith.addf %160, %164 : vector<2x16x16xf32>
    %c0_105 = arith.constant 0 : index
    %c1_106 = arith.constant 1 : index
    %c1_107 = arith.constant 1 : index
    %166 = vector.load %arg7[%c0_105, %c1_106, %c1_107] : memref<2x18x18xf32, #tpu.memory_space<vmem>>, vector<2x16x16xf32>
    %c13_108 = arith.constant 13 : index
    %167 = memref.load %arg4[%c13_108] : memref<72xf32, #tpu.memory_space<smem>>
    %168 = vector.broadcast %167 : f32 to vector<2x16x16xf32>
    %169 = arith.mulf %166, %168 : vector<2x16x16xf32>
    %170 = arith.addf %165, %169 : vector<2x16x16xf32>
    %c0_109 = arith.constant 0 : index
    %c1_110 = arith.constant 1 : index
    %c2_111 = arith.constant 2 : index
    %171 = vector.load %arg7[%c0_109, %c1_110, %c2_111] : memref<2x18x18xf32, #tpu.memory_space<vmem>>, vector<2x16x16xf32>
    %c14_112 = arith.constant 14 : index
    %172 = memref.load %arg4[%c14_112] : memref<72xf32, #tpu.memory_space<smem>>
    %173 = vector.broadcast %172 : f32 to vector<2x16x16xf32>
    %174 = arith.mulf %171, %173 : vector<2x16x16xf32>
    %175 = arith.addf %170, %174 : vector<2x16x16xf32>
    %c0_113 = arith.constant 0 : index
    %c2_114 = arith.constant 2 : index
    %c0_115 = arith.constant 0 : index
    %176 = vector.load %arg7[%c0_113, %c2_114, %c0_115] : memref<2x18x18xf32, #tpu.memory_space<vmem>>, vector<2x16x16xf32>
    %c15_116 = arith.constant 15 : index
    %177 = memref.load %arg4[%c15_116] : memref<72xf32, #tpu.memory_space<smem>>
    %178 = vector.broadcast %177 : f32 to vector<2x16x16xf32>
    %179 = arith.mulf %176, %178 : vector<2x16x16xf32>
    %180 = arith.addf %175, %179 : vector<2x16x16xf32>
    %c0_117 = arith.constant 0 : index
    %c2_118 = arith.constant 2 : index
    %c1_119 = arith.constant 1 : index
    %181 = vector.load %arg7[%c0_117, %c2_118, %c1_119] : memref<2x18x18xf32, #tpu.memory_space<vmem>>, vector<2x16x16xf32>
    %c16_120 = arith.constant 16 : index
    %182 = memref.load %arg4[%c16_120] : memref<72xf32, #tpu.memory_space<smem>>
    %183 = vector.broadcast %182 : f32 to vector<2x16x16xf32>
    %184 = arith.mulf %181, %183 : vector<2x16x16xf32>
    %185 = arith.addf %180, %184 : vector<2x16x16xf32>
    %c0_121 = arith.constant 0 : index
    %c2_122 = arith.constant 2 : index
    %c2_123 = arith.constant 2 : index
    %186 = vector.load %arg7[%c0_121, %c2_122, %c2_123] : memref<2x18x18xf32, #tpu.memory_space<vmem>>, vector<2x16x16xf32>
    %c17_124 = arith.constant 17 : index
    %187 = memref.load %arg4[%c17_124] : memref<72xf32, #tpu.memory_space<smem>>
    %188 = vector.broadcast %187 : f32 to vector<2x16x16xf32>
    %189 = arith.mulf %186, %188 : vector<2x16x16xf32>
    %190 = arith.addf %185, %189 : vector<2x16x16xf32>
    %c2_125 = arith.constant 2 : index
    %191 = memref.load %arg3[%c2_125] : memref<8xf32, #tpu.memory_space<smem>>
    %192 = vector.broadcast %191 : f32 to vector<2x16x16xf32>
    %c18 = arith.constant 18 : index
    %193 = memref.load %arg2[%c18] : memref<72xf32, #tpu.memory_space<smem>>
    %194 = vector.broadcast %193 : f32 to vector<2x16x16xf32>
    %195 = arith.mulf %8, %194 : vector<2x16x16xf32>
    %196 = arith.addf %192, %195 : vector<2x16x16xf32>
    %c19 = arith.constant 19 : index
    %197 = memref.load %arg2[%c19] : memref<72xf32, #tpu.memory_space<smem>>
    %198 = vector.broadcast %197 : f32 to vector<2x16x16xf32>
    %199 = arith.mulf %9, %198 : vector<2x16x16xf32>
    %200 = arith.addf %196, %199 : vector<2x16x16xf32>
    %c20 = arith.constant 20 : index
    %201 = memref.load %arg2[%c20] : memref<72xf32, #tpu.memory_space<smem>>
    %202 = vector.broadcast %201 : f32 to vector<2x16x16xf32>
    %203 = arith.mulf %10, %202 : vector<2x16x16xf32>
    %204 = arith.addf %200, %203 : vector<2x16x16xf32>
    %c21 = arith.constant 21 : index
    %205 = memref.load %arg2[%c21] : memref<72xf32, #tpu.memory_space<smem>>
    %206 = vector.broadcast %205 : f32 to vector<2x16x16xf32>
    %207 = arith.mulf %11, %206 : vector<2x16x16xf32>
    %208 = arith.addf %204, %207 : vector<2x16x16xf32>
    %c22 = arith.constant 22 : index
    %209 = memref.load %arg2[%c22] : memref<72xf32, #tpu.memory_space<smem>>
    %210 = vector.broadcast %209 : f32 to vector<2x16x16xf32>
    %211 = arith.mulf %12, %210 : vector<2x16x16xf32>
    %212 = arith.addf %208, %211 : vector<2x16x16xf32>
    %c23 = arith.constant 23 : index
    %213 = memref.load %arg2[%c23] : memref<72xf32, #tpu.memory_space<smem>>
    %214 = vector.broadcast %213 : f32 to vector<2x16x16xf32>
    %215 = arith.mulf %13, %214 : vector<2x16x16xf32>
    %216 = arith.addf %212, %215 : vector<2x16x16xf32>
    %c24 = arith.constant 24 : index
    %217 = memref.load %arg2[%c24] : memref<72xf32, #tpu.memory_space<smem>>
    %218 = vector.broadcast %217 : f32 to vector<2x16x16xf32>
    %219 = arith.mulf %14, %218 : vector<2x16x16xf32>
    %220 = arith.addf %216, %219 : vector<2x16x16xf32>
    %c25 = arith.constant 25 : index
    %221 = memref.load %arg2[%c25] : memref<72xf32, #tpu.memory_space<smem>>
    %222 = vector.broadcast %221 : f32 to vector<2x16x16xf32>
    %223 = arith.mulf %15, %222 : vector<2x16x16xf32>
    %224 = arith.addf %220, %223 : vector<2x16x16xf32>
    %c26 = arith.constant 26 : index
    %225 = memref.load %arg2[%c26] : memref<72xf32, #tpu.memory_space<smem>>
    %226 = vector.broadcast %225 : f32 to vector<2x16x16xf32>
    %227 = arith.mulf %16, %226 : vector<2x16x16xf32>
    %228 = arith.addf %224, %227 : vector<2x16x16xf32>
    %cst_126 = arith.constant 0.000000e+00 : f32
    %229 = vector.broadcast %cst_126 : f32 to vector<2x16x16xf32>
    %230 = arith.maximumf %228, %229 : vector<2x16x16xf32>
    %c0_127 = arith.constant 0 : index
    %c1_128 = arith.constant 1 : index
    %c1_129 = arith.constant 1 : index
    %231 = vector.load %arg7[%c0_127, %c1_128, %c1_129] : memref<2x18x18xf32, #tpu.memory_space<vmem>>, vector<2x16x16xf32>
    tpu.vector_store %arg7[%c0_127, %c1_128, %c1_129], %230 {strides = array<i32>} : memref<2x18x18xf32, #tpu.memory_space<vmem>>, vector<2x16x16xf32>,
    %c0_130 = arith.constant 0 : index
    %c0_131 = arith.constant 0 : index
    %c0_132 = arith.constant 0 : index
    %232 = vector.load %arg7[%c0_130, %c0_131, %c0_132] : memref<2x18x18xf32, #tpu.memory_space<vmem>>, vector<2x16x16xf32>
    %c18_133 = arith.constant 18 : index
    %233 = memref.load %arg4[%c18_133] : memref<72xf32, #tpu.memory_space<smem>>
    %234 = vector.broadcast %233 : f32 to vector<2x16x16xf32>
    %235 = arith.mulf %232, %234 : vector<2x16x16xf32>
    %236 = arith.addf %190, %235 : vector<2x16x16xf32>
    %c0_134 = arith.constant 0 : index
    %c0_135 = arith.constant 0 : index
    %c1_136 = arith.constant 1 : index
    %237 = vector.load %arg7[%c0_134, %c0_135, %c1_136] : memref<2x18x18xf32, #tpu.memory_space<vmem>>, vector<2x16x16xf32>
    %c19_137 = arith.constant 19 : index
    %238 = memref.load %arg4[%c19_137] : memref<72xf32, #tpu.memory_space<smem>>
    %239 = vector.broadcast %238 : f32 to vector<2x16x16xf32>
    %240 = arith.mulf %237, %239 : vector<2x16x16xf32>
    %241 = arith.addf %236, %240 : vector<2x16x16xf32>
    %c0_138 = arith.constant 0 : index
    %c0_139 = arith.constant 0 : index
    %c2_140 = arith.constant 2 : index
    %242 = vector.load %arg7[%c0_138, %c0_139, %c2_140] : memref<2x18x18xf32, #tpu.memory_space<vmem>>, vector<2x16x16xf32>
    %c20_141 = arith.constant 20 : index
    %243 = memref.load %arg4[%c20_141] : memref<72xf32, #tpu.memory_space<smem>>
    %244 = vector.broadcast %243 : f32 to vector<2x16x16xf32>
    %245 = arith.mulf %242, %244 : vector<2x16x16xf32>
    %246 = arith.addf %241, %245 : vector<2x16x16xf32>
    %c0_142 = arith.constant 0 : index
    %c1_143 = arith.constant 1 : index
    %c0_144 = arith.constant 0 : index
    %247 = vector.load %arg7[%c0_142, %c1_143, %c0_144] : memref<2x18x18xf32, #tpu.memory_space<vmem>>, vector<2x16x16xf32>
    %c21_145 = arith.constant 21 : index
    %248 = memref.load %arg4[%c21_145] : memref<72xf32, #tpu.memory_space<smem>>
    %249 = vector.broadcast %248 : f32 to vector<2x16x16xf32>
    %250 = arith.mulf %247, %249 : vector<2x16x16xf32>
    %251 = arith.addf %246, %250 : vector<2x16x16xf32>
    %c0_146 = arith.constant 0 : index
    %c1_147 = arith.constant 1 : index
    %c1_148 = arith.constant 1 : index
    %252 = vector.load %arg7[%c0_146, %c1_147, %c1_148] : memref<2x18x18xf32, #tpu.memory_space<vmem>>, vector<2x16x16xf32>
    %c22_149 = arith.constant 22 : index
    %253 = memref.load %arg4[%c22_149] : memref<72xf32, #tpu.memory_space<smem>>
    %254 = vector.broadcast %253 : f32 to vector<2x16x16xf32>
    %255 = arith.mulf %252, %254 : vector<2x16x16xf32>
    %256 = arith.addf %251, %255 : vector<2x16x16xf32>
    %c0_150 = arith.constant 0 : index
    %c1_151 = arith.constant 1 : index
    %c2_152 = arith.constant 2 : index
    %257 = vector.load %arg7[%c0_150, %c1_151, %c2_152] : memref<2x18x18xf32, #tpu.memory_space<vmem>>, vector<2x16x16xf32>
    %c23_153 = arith.constant 23 : index
    %258 = memref.load %arg4[%c23_153] : memref<72xf32, #tpu.memory_space<smem>>
    %259 = vector.broadcast %258 : f32 to vector<2x16x16xf32>
    %260 = arith.mulf %257, %259 : vector<2x16x16xf32>
    %261 = arith.addf %256, %260 : vector<2x16x16xf32>
    %c0_154 = arith.constant 0 : index
    %c2_155 = arith.constant 2 : index
    %c0_156 = arith.constant 0 : index
    %262 = vector.load %arg7[%c0_154, %c2_155, %c0_156] : memref<2x18x18xf32, #tpu.memory_space<vmem>>, vector<2x16x16xf32>
    %c24_157 = arith.constant 24 : index
    %263 = memref.load %arg4[%c24_157] : memref<72xf32, #tpu.memory_space<smem>>
    %264 = vector.broadcast %263 : f32 to vector<2x16x16xf32>
    %265 = arith.mulf %262, %264 : vector<2x16x16xf32>
    %266 = arith.addf %261, %265 : vector<2x16x16xf32>
    %c0_158 = arith.constant 0 : index
    %c2_159 = arith.constant 2 : index
    %c1_160 = arith.constant 1 : index
    %267 = vector.load %arg7[%c0_158, %c2_159, %c1_160] : memref<2x18x18xf32, #tpu.memory_space<vmem>>, vector<2x16x16xf32>
    %c25_161 = arith.constant 25 : index
    %268 = memref.load %arg4[%c25_161] : memref<72xf32, #tpu.memory_space<smem>>
    %269 = vector.broadcast %268 : f32 to vector<2x16x16xf32>
    %270 = arith.mulf %267, %269 : vector<2x16x16xf32>
    %271 = arith.addf %266, %270 : vector<2x16x16xf32>
    %c0_162 = arith.constant 0 : index
    %c2_163 = arith.constant 2 : index
    %c2_164 = arith.constant 2 : index
    %272 = vector.load %arg7[%c0_162, %c2_163, %c2_164] : memref<2x18x18xf32, #tpu.memory_space<vmem>>, vector<2x16x16xf32>
    %c26_165 = arith.constant 26 : index
    %273 = memref.load %arg4[%c26_165] : memref<72xf32, #tpu.memory_space<smem>>
    %274 = vector.broadcast %273 : f32 to vector<2x16x16xf32>
    %275 = arith.mulf %272, %274 : vector<2x16x16xf32>
    %276 = arith.addf %271, %275 : vector<2x16x16xf32>
    %c3_166 = arith.constant 3 : index
    %277 = memref.load %arg3[%c3_166] : memref<8xf32, #tpu.memory_space<smem>>
    %278 = vector.broadcast %277 : f32 to vector<2x16x16xf32>
    %c27 = arith.constant 27 : index
    %279 = memref.load %arg2[%c27] : memref<72xf32, #tpu.memory_space<smem>>
    %280 = vector.broadcast %279 : f32 to vector<2x16x16xf32>
    %281 = arith.mulf %8, %280 : vector<2x16x16xf32>
    %282 = arith.addf %278, %281 : vector<2x16x16xf32>
    %c28 = arith.constant 28 : index
    %283 = memref.load %arg2[%c28] : memref<72xf32, #tpu.memory_space<smem>>
    %284 = vector.broadcast %283 : f32 to vector<2x16x16xf32>
    %285 = arith.mulf %9, %284 : vector<2x16x16xf32>
    %286 = arith.addf %282, %285 : vector<2x16x16xf32>
    %c29 = arith.constant 29 : index
    %287 = memref.load %arg2[%c29] : memref<72xf32, #tpu.memory_space<smem>>
    %288 = vector.broadcast %287 : f32 to vector<2x16x16xf32>
    %289 = arith.mulf %10, %288 : vector<2x16x16xf32>
    %290 = arith.addf %286, %289 : vector<2x16x16xf32>
    %c30 = arith.constant 30 : index
    %291 = memref.load %arg2[%c30] : memref<72xf32, #tpu.memory_space<smem>>
    %292 = vector.broadcast %291 : f32 to vector<2x16x16xf32>
    %293 = arith.mulf %11, %292 : vector<2x16x16xf32>
    %294 = arith.addf %290, %293 : vector<2x16x16xf32>
    %c31 = arith.constant 31 : index
    %295 = memref.load %arg2[%c31] : memref<72xf32, #tpu.memory_space<smem>>
    %296 = vector.broadcast %295 : f32 to vector<2x16x16xf32>
    %297 = arith.mulf %12, %296 : vector<2x16x16xf32>
    %298 = arith.addf %294, %297 : vector<2x16x16xf32>
    %c32 = arith.constant 32 : index
    %299 = memref.load %arg2[%c32] : memref<72xf32, #tpu.memory_space<smem>>
    %300 = vector.broadcast %299 : f32 to vector<2x16x16xf32>
    %301 = arith.mulf %13, %300 : vector<2x16x16xf32>
    %302 = arith.addf %298, %301 : vector<2x16x16xf32>
    %c33 = arith.constant 33 : index
    %303 = memref.load %arg2[%c33] : memref<72xf32, #tpu.memory_space<smem>>
    %304 = vector.broadcast %303 : f32 to vector<2x16x16xf32>
    %305 = arith.mulf %14, %304 : vector<2x16x16xf32>
    %306 = arith.addf %302, %305 : vector<2x16x16xf32>
    %c34 = arith.constant 34 : index
    %307 = memref.load %arg2[%c34] : memref<72xf32, #tpu.memory_space<smem>>
    %308 = vector.broadcast %307 : f32 to vector<2x16x16xf32>
    %309 = arith.mulf %15, %308 : vector<2x16x16xf32>
    %310 = arith.addf %306, %309 : vector<2x16x16xf32>
    %c35 = arith.constant 35 : index
    %311 = memref.load %arg2[%c35] : memref<72xf32, #tpu.memory_space<smem>>
    %312 = vector.broadcast %311 : f32 to vector<2x16x16xf32>
    %313 = arith.mulf %16, %312 : vector<2x16x16xf32>
    %314 = arith.addf %310, %313 : vector<2x16x16xf32>
    %cst_167 = arith.constant 0.000000e+00 : f32
    %315 = vector.broadcast %cst_167 : f32 to vector<2x16x16xf32>
    %316 = arith.maximumf %314, %315 : vector<2x16x16xf32>
    %c0_168 = arith.constant 0 : index
    %c1_169 = arith.constant 1 : index
    %c1_170 = arith.constant 1 : index
    %317 = vector.load %arg7[%c0_168, %c1_169, %c1_170] : memref<2x18x18xf32, #tpu.memory_space<vmem>>, vector<2x16x16xf32>
    tpu.vector_store %arg7[%c0_168, %c1_169, %c1_170], %316 {strides = array<i32>} : memref<2x18x18xf32, #tpu.memory_space<vmem>>, vector<2x16x16xf32>,
    %c0_171 = arith.constant 0 : index
    %c0_172 = arith.constant 0 : index
    %c0_173 = arith.constant 0 : index
    %318 = vector.load %arg7[%c0_171, %c0_172, %c0_173] : memref<2x18x18xf32, #tpu.memory_space<vmem>>, vector<2x16x16xf32>
    %c27_174 = arith.constant 27 : index
    %319 = memref.load %arg4[%c27_174] : memref<72xf32, #tpu.memory_space<smem>>
    %320 = vector.broadcast %319 : f32 to vector<2x16x16xf32>
    %321 = arith.mulf %318, %320 : vector<2x16x16xf32>
    %322 = arith.addf %276, %321 : vector<2x16x16xf32>
    %c0_175 = arith.constant 0 : index
    %c0_176 = arith.constant 0 : index
    %c1_177 = arith.constant 1 : index
    %323 = vector.load %arg7[%c0_175, %c0_176, %c1_177] : memref<2x18x18xf32, #tpu.memory_space<vmem>>, vector<2x16x16xf32>
    %c28_178 = arith.constant 28 : index
    %324 = memref.load %arg4[%c28_178] : memref<72xf32, #tpu.memory_space<smem>>
    %325 = vector.broadcast %324 : f32 to vector<2x16x16xf32>
    %326 = arith.mulf %323, %325 : vector<2x16x16xf32>
    %327 = arith.addf %322, %326 : vector<2x16x16xf32>
    %c0_179 = arith.constant 0 : index
    %c0_180 = arith.constant 0 : index
    %c2_181 = arith.constant 2 : index
    %328 = vector.load %arg7[%c0_179, %c0_180, %c2_181] : memref<2x18x18xf32, #tpu.memory_space<vmem>>, vector<2x16x16xf32>
    %c29_182 = arith.constant 29 : index
    %329 = memref.load %arg4[%c29_182] : memref<72xf32, #tpu.memory_space<smem>>
    %330 = vector.broadcast %329 : f32 to vector<2x16x16xf32>
    %331 = arith.mulf %328, %330 : vector<2x16x16xf32>
    %332 = arith.addf %327, %331 : vector<2x16x16xf32>
    %c0_183 = arith.constant 0 : index
    %c1_184 = arith.constant 1 : index
    %c0_185 = arith.constant 0 : index
    %333 = vector.load %arg7[%c0_183, %c1_184, %c0_185] : memref<2x18x18xf32, #tpu.memory_space<vmem>>, vector<2x16x16xf32>
    %c30_186 = arith.constant 30 : index
    %334 = memref.load %arg4[%c30_186] : memref<72xf32, #tpu.memory_space<smem>>
    %335 = vector.broadcast %334 : f32 to vector<2x16x16xf32>
    %336 = arith.mulf %333, %335 : vector<2x16x16xf32>
    %337 = arith.addf %332, %336 : vector<2x16x16xf32>
    %c0_187 = arith.constant 0 : index
    %c1_188 = arith.constant 1 : index
    %c1_189 = arith.constant 1 : index
    %338 = vector.load %arg7[%c0_187, %c1_188, %c1_189] : memref<2x18x18xf32, #tpu.memory_space<vmem>>, vector<2x16x16xf32>
    %c31_190 = arith.constant 31 : index
    %339 = memref.load %arg4[%c31_190] : memref<72xf32, #tpu.memory_space<smem>>
    %340 = vector.broadcast %339 : f32 to vector<2x16x16xf32>
    %341 = arith.mulf %338, %340 : vector<2x16x16xf32>
    %342 = arith.addf %337, %341 : vector<2x16x16xf32>
    %c0_191 = arith.constant 0 : index
    %c1_192 = arith.constant 1 : index
    %c2_193 = arith.constant 2 : index
    %343 = vector.load %arg7[%c0_191, %c1_192, %c2_193] : memref<2x18x18xf32, #tpu.memory_space<vmem>>, vector<2x16x16xf32>
    %c32_194 = arith.constant 32 : index
    %344 = memref.load %arg4[%c32_194] : memref<72xf32, #tpu.memory_space<smem>>
    %345 = vector.broadcast %344 : f32 to vector<2x16x16xf32>
    %346 = arith.mulf %343, %345 : vector<2x16x16xf32>
    %347 = arith.addf %342, %346 : vector<2x16x16xf32>
    %c0_195 = arith.constant 0 : index
    %c2_196 = arith.constant 2 : index
    %c0_197 = arith.constant 0 : index
    %348 = vector.load %arg7[%c0_195, %c2_196, %c0_197] : memref<2x18x18xf32, #tpu.memory_space<vmem>>, vector<2x16x16xf32>
    %c33_198 = arith.constant 33 : index
    %349 = memref.load %arg4[%c33_198] : memref<72xf32, #tpu.memory_space<smem>>
    %350 = vector.broadcast %349 : f32 to vector<2x16x16xf32>
    %351 = arith.mulf %348, %350 : vector<2x16x16xf32>
    %352 = arith.addf %347, %351 : vector<2x16x16xf32>
    %c0_199 = arith.constant 0 : index
    %c2_200 = arith.constant 2 : index
    %c1_201 = arith.constant 1 : index
    %353 = vector.load %arg7[%c0_199, %c2_200, %c1_201] : memref<2x18x18xf32, #tpu.memory_space<vmem>>, vector<2x16x16xf32>
    %c34_202 = arith.constant 34 : index
    %354 = memref.load %arg4[%c34_202] : memref<72xf32, #tpu.memory_space<smem>>
    %355 = vector.broadcast %354 : f32 to vector<2x16x16xf32>
    %356 = arith.mulf %353, %355 : vector<2x16x16xf32>
    %357 = arith.addf %352, %356 : vector<2x16x16xf32>
    %c0_203 = arith.constant 0 : index
    %c2_204 = arith.constant 2 : index
    %c2_205 = arith.constant 2 : index
    %358 = vector.load %arg7[%c0_203, %c2_204, %c2_205] : memref<2x18x18xf32, #tpu.memory_space<vmem>>, vector<2x16x16xf32>
    %c35_206 = arith.constant 35 : index
    %359 = memref.load %arg4[%c35_206] : memref<72xf32, #tpu.memory_space<smem>>
    %360 = vector.broadcast %359 : f32 to vector<2x16x16xf32>
    %361 = arith.mulf %358, %360 : vector<2x16x16xf32>
    %362 = arith.addf %357, %361 : vector<2x16x16xf32>
    %c4_207 = arith.constant 4 : index
    %363 = memref.load %arg3[%c4_207] : memref<8xf32, #tpu.memory_space<smem>>
    %364 = vector.broadcast %363 : f32 to vector<2x16x16xf32>
    %c36 = arith.constant 36 : index
    %365 = memref.load %arg2[%c36] : memref<72xf32, #tpu.memory_space<smem>>
    %366 = vector.broadcast %365 : f32 to vector<2x16x16xf32>
    %367 = arith.mulf %8, %366 : vector<2x16x16xf32>
    %368 = arith.addf %364, %367 : vector<2x16x16xf32>
    %c37 = arith.constant 37 : index
    %369 = memref.load %arg2[%c37] : memref<72xf32, #tpu.memory_space<smem>>
    %370 = vector.broadcast %369 : f32 to vector<2x16x16xf32>
    %371 = arith.mulf %9, %370 : vector<2x16x16xf32>
    %372 = arith.addf %368, %371 : vector<2x16x16xf32>
    %c38 = arith.constant 38 : index
    %373 = memref.load %arg2[%c38] : memref<72xf32, #tpu.memory_space<smem>>
    %374 = vector.broadcast %373 : f32 to vector<2x16x16xf32>
    %375 = arith.mulf %10, %374 : vector<2x16x16xf32>
    %376 = arith.addf %372, %375 : vector<2x16x16xf32>
    %c39 = arith.constant 39 : index
    %377 = memref.load %arg2[%c39] : memref<72xf32, #tpu.memory_space<smem>>
    %378 = vector.broadcast %377 : f32 to vector<2x16x16xf32>
    %379 = arith.mulf %11, %378 : vector<2x16x16xf32>
    %380 = arith.addf %376, %379 : vector<2x16x16xf32>
    %c40 = arith.constant 40 : index
    %381 = memref.load %arg2[%c40] : memref<72xf32, #tpu.memory_space<smem>>
    %382 = vector.broadcast %381 : f32 to vector<2x16x16xf32>
    %383 = arith.mulf %12, %382 : vector<2x16x16xf32>
    %384 = arith.addf %380, %383 : vector<2x16x16xf32>
    %c41 = arith.constant 41 : index
    %385 = memref.load %arg2[%c41] : memref<72xf32, #tpu.memory_space<smem>>
    %386 = vector.broadcast %385 : f32 to vector<2x16x16xf32>
    %387 = arith.mulf %13, %386 : vector<2x16x16xf32>
    %388 = arith.addf %384, %387 : vector<2x16x16xf32>
    %c42 = arith.constant 42 : index
    %389 = memref.load %arg2[%c42] : memref<72xf32, #tpu.memory_space<smem>>
    %390 = vector.broadcast %389 : f32 to vector<2x16x16xf32>
    %391 = arith.mulf %14, %390 : vector<2x16x16xf32>
    %392 = arith.addf %388, %391 : vector<2x16x16xf32>
    %c43 = arith.constant 43 : index
    %393 = memref.load %arg2[%c43] : memref<72xf32, #tpu.memory_space<smem>>
    %394 = vector.broadcast %393 : f32 to vector<2x16x16xf32>
    %395 = arith.mulf %15, %394 : vector<2x16x16xf32>
    %396 = arith.addf %392, %395 : vector<2x16x16xf32>
    %c44 = arith.constant 44 : index
    %397 = memref.load %arg2[%c44] : memref<72xf32, #tpu.memory_space<smem>>
    %398 = vector.broadcast %397 : f32 to vector<2x16x16xf32>
    %399 = arith.mulf %16, %398 : vector<2x16x16xf32>
    %400 = arith.addf %396, %399 : vector<2x16x16xf32>
    %cst_208 = arith.constant 0.000000e+00 : f32
    %401 = vector.broadcast %cst_208 : f32 to vector<2x16x16xf32>
    %402 = arith.maximumf %400, %401 : vector<2x16x16xf32>
    %c0_209 = arith.constant 0 : index
    %c1_210 = arith.constant 1 : index
    %c1_211 = arith.constant 1 : index
    %403 = vector.load %arg7[%c0_209, %c1_210, %c1_211] : memref<2x18x18xf32, #tpu.memory_space<vmem>>, vector<2x16x16xf32>
    tpu.vector_store %arg7[%c0_209, %c1_210, %c1_211], %402 {strides = array<i32>} : memref<2x18x18xf32, #tpu.memory_space<vmem>>, vector<2x16x16xf32>,
    %c0_212 = arith.constant 0 : index
    %c0_213 = arith.constant 0 : index
    %c0_214 = arith.constant 0 : index
    %404 = vector.load %arg7[%c0_212, %c0_213, %c0_214] : memref<2x18x18xf32, #tpu.memory_space<vmem>>, vector<2x16x16xf32>
    %c36_215 = arith.constant 36 : index
    %405 = memref.load %arg4[%c36_215] : memref<72xf32, #tpu.memory_space<smem>>
    %406 = vector.broadcast %405 : f32 to vector<2x16x16xf32>
    %407 = arith.mulf %404, %406 : vector<2x16x16xf32>
    %408 = arith.addf %362, %407 : vector<2x16x16xf32>
    %c0_216 = arith.constant 0 : index
    %c0_217 = arith.constant 0 : index
    %c1_218 = arith.constant 1 : index
    %409 = vector.load %arg7[%c0_216, %c0_217, %c1_218] : memref<2x18x18xf32, #tpu.memory_space<vmem>>, vector<2x16x16xf32>
    %c37_219 = arith.constant 37 : index
    %410 = memref.load %arg4[%c37_219] : memref<72xf32, #tpu.memory_space<smem>>
    %411 = vector.broadcast %410 : f32 to vector<2x16x16xf32>
    %412 = arith.mulf %409, %411 : vector<2x16x16xf32>
    %413 = arith.addf %408, %412 : vector<2x16x16xf32>
    %c0_220 = arith.constant 0 : index
    %c0_221 = arith.constant 0 : index
    %c2_222 = arith.constant 2 : index
    %414 = vector.load %arg7[%c0_220, %c0_221, %c2_222] : memref<2x18x18xf32, #tpu.memory_space<vmem>>, vector<2x16x16xf32>
    %c38_223 = arith.constant 38 : index
    %415 = memref.load %arg4[%c38_223] : memref<72xf32, #tpu.memory_space<smem>>
    %416 = vector.broadcast %415 : f32 to vector<2x16x16xf32>
    %417 = arith.mulf %414, %416 : vector<2x16x16xf32>
    %418 = arith.addf %413, %417 : vector<2x16x16xf32>
    %c0_224 = arith.constant 0 : index
    %c1_225 = arith.constant 1 : index
    %c0_226 = arith.constant 0 : index
    %419 = vector.load %arg7[%c0_224, %c1_225, %c0_226] : memref<2x18x18xf32, #tpu.memory_space<vmem>>, vector<2x16x16xf32>
    %c39_227 = arith.constant 39 : index
    %420 = memref.load %arg4[%c39_227] : memref<72xf32, #tpu.memory_space<smem>>
    %421 = vector.broadcast %420 : f32 to vector<2x16x16xf32>
    %422 = arith.mulf %419, %421 : vector<2x16x16xf32>
    %423 = arith.addf %418, %422 : vector<2x16x16xf32>
    %c0_228 = arith.constant 0 : index
    %c1_229 = arith.constant 1 : index
    %c1_230 = arith.constant 1 : index
    %424 = vector.load %arg7[%c0_228, %c1_229, %c1_230] : memref<2x18x18xf32, #tpu.memory_space<vmem>>, vector<2x16x16xf32>
    %c40_231 = arith.constant 40 : index
    %425 = memref.load %arg4[%c40_231] : memref<72xf32, #tpu.memory_space<smem>>
    %426 = vector.broadcast %425 : f32 to vector<2x16x16xf32>
    %427 = arith.mulf %424, %426 : vector<2x16x16xf32>
    %428 = arith.addf %423, %427 : vector<2x16x16xf32>
    %c0_232 = arith.constant 0 : index
    %c1_233 = arith.constant 1 : index
    %c2_234 = arith.constant 2 : index
    %429 = vector.load %arg7[%c0_232, %c1_233, %c2_234] : memref<2x18x18xf32, #tpu.memory_space<vmem>>, vector<2x16x16xf32>
    %c41_235 = arith.constant 41 : index
    %430 = memref.load %arg4[%c41_235] : memref<72xf32, #tpu.memory_space<smem>>
    %431 = vector.broadcast %430 : f32 to vector<2x16x16xf32>
    %432 = arith.mulf %429, %431 : vector<2x16x16xf32>
    %433 = arith.addf %428, %432 : vector<2x16x16xf32>
    %c0_236 = arith.constant 0 : index
    %c2_237 = arith.constant 2 : index
    %c0_238 = arith.constant 0 : index
    %434 = vector.load %arg7[%c0_236, %c2_237, %c0_238] : memref<2x18x18xf32, #tpu.memory_space<vmem>>, vector<2x16x16xf32>
    %c42_239 = arith.constant 42 : index
    %435 = memref.load %arg4[%c42_239] : memref<72xf32, #tpu.memory_space<smem>>
    %436 = vector.broadcast %435 : f32 to vector<2x16x16xf32>
    %437 = arith.mulf %434, %436 : vector<2x16x16xf32>
    %438 = arith.addf %433, %437 : vector<2x16x16xf32>
    %c0_240 = arith.constant 0 : index
    %c2_241 = arith.constant 2 : index
    %c1_242 = arith.constant 1 : index
    %439 = vector.load %arg7[%c0_240, %c2_241, %c1_242] : memref<2x18x18xf32, #tpu.memory_space<vmem>>, vector<2x16x16xf32>
    %c43_243 = arith.constant 43 : index
    %440 = memref.load %arg4[%c43_243] : memref<72xf32, #tpu.memory_space<smem>>
    %441 = vector.broadcast %440 : f32 to vector<2x16x16xf32>
    %442 = arith.mulf %439, %441 : vector<2x16x16xf32>
    %443 = arith.addf %438, %442 : vector<2x16x16xf32>
    %c0_244 = arith.constant 0 : index
    %c2_245 = arith.constant 2 : index
    %c2_246 = arith.constant 2 : index
    %444 = vector.load %arg7[%c0_244, %c2_245, %c2_246] : memref<2x18x18xf32, #tpu.memory_space<vmem>>, vector<2x16x16xf32>
    %c44_247 = arith.constant 44 : index
    %445 = memref.load %arg4[%c44_247] : memref<72xf32, #tpu.memory_space<smem>>
    %446 = vector.broadcast %445 : f32 to vector<2x16x16xf32>
    %447 = arith.mulf %444, %446 : vector<2x16x16xf32>
    %448 = arith.addf %443, %447 : vector<2x16x16xf32>
    %c5_248 = arith.constant 5 : index
    %449 = memref.load %arg3[%c5_248] : memref<8xf32, #tpu.memory_space<smem>>
    %450 = vector.broadcast %449 : f32 to vector<2x16x16xf32>
    %c45 = arith.constant 45 : index
    %451 = memref.load %arg2[%c45] : memref<72xf32, #tpu.memory_space<smem>>
    %452 = vector.broadcast %451 : f32 to vector<2x16x16xf32>
    %453 = arith.mulf %8, %452 : vector<2x16x16xf32>
    %454 = arith.addf %450, %453 : vector<2x16x16xf32>
    %c46 = arith.constant 46 : index
    %455 = memref.load %arg2[%c46] : memref<72xf32, #tpu.memory_space<smem>>
    %456 = vector.broadcast %455 : f32 to vector<2x16x16xf32>
    %457 = arith.mulf %9, %456 : vector<2x16x16xf32>
    %458 = arith.addf %454, %457 : vector<2x16x16xf32>
    %c47 = arith.constant 47 : index
    %459 = memref.load %arg2[%c47] : memref<72xf32, #tpu.memory_space<smem>>
    %460 = vector.broadcast %459 : f32 to vector<2x16x16xf32>
    %461 = arith.mulf %10, %460 : vector<2x16x16xf32>
    %462 = arith.addf %458, %461 : vector<2x16x16xf32>
    %c48 = arith.constant 48 : index
    %463 = memref.load %arg2[%c48] : memref<72xf32, #tpu.memory_space<smem>>
    %464 = vector.broadcast %463 : f32 to vector<2x16x16xf32>
    %465 = arith.mulf %11, %464 : vector<2x16x16xf32>
    %466 = arith.addf %462, %465 : vector<2x16x16xf32>
    %c49 = arith.constant 49 : index
    %467 = memref.load %arg2[%c49] : memref<72xf32, #tpu.memory_space<smem>>
    %468 = vector.broadcast %467 : f32 to vector<2x16x16xf32>
    %469 = arith.mulf %12, %468 : vector<2x16x16xf32>
    %470 = arith.addf %466, %469 : vector<2x16x16xf32>
    %c50 = arith.constant 50 : index
    %471 = memref.load %arg2[%c50] : memref<72xf32, #tpu.memory_space<smem>>
    %472 = vector.broadcast %471 : f32 to vector<2x16x16xf32>
    %473 = arith.mulf %13, %472 : vector<2x16x16xf32>
    %474 = arith.addf %470, %473 : vector<2x16x16xf32>
    %c51 = arith.constant 51 : index
    %475 = memref.load %arg2[%c51] : memref<72xf32, #tpu.memory_space<smem>>
    %476 = vector.broadcast %475 : f32 to vector<2x16x16xf32>
    %477 = arith.mulf %14, %476 : vector<2x16x16xf32>
    %478 = arith.addf %474, %477 : vector<2x16x16xf32>
    %c52 = arith.constant 52 : index
    %479 = memref.load %arg2[%c52] : memref<72xf32, #tpu.memory_space<smem>>
    %480 = vector.broadcast %479 : f32 to vector<2x16x16xf32>
    %481 = arith.mulf %15, %480 : vector<2x16x16xf32>
    %482 = arith.addf %478, %481 : vector<2x16x16xf32>
    %c53 = arith.constant 53 : index
    %483 = memref.load %arg2[%c53] : memref<72xf32, #tpu.memory_space<smem>>
    %484 = vector.broadcast %483 : f32 to vector<2x16x16xf32>
    %485 = arith.mulf %16, %484 : vector<2x16x16xf32>
    %486 = arith.addf %482, %485 : vector<2x16x16xf32>
    %cst_249 = arith.constant 0.000000e+00 : f32
    %487 = vector.broadcast %cst_249 : f32 to vector<2x16x16xf32>
    %488 = arith.maximumf %486, %487 : vector<2x16x16xf32>
    %c0_250 = arith.constant 0 : index
    %c1_251 = arith.constant 1 : index
    %c1_252 = arith.constant 1 : index
    %489 = vector.load %arg7[%c0_250, %c1_251, %c1_252] : memref<2x18x18xf32, #tpu.memory_space<vmem>>, vector<2x16x16xf32>
    tpu.vector_store %arg7[%c0_250, %c1_251, %c1_252], %488 {strides = array<i32>} : memref<2x18x18xf32, #tpu.memory_space<vmem>>, vector<2x16x16xf32>,
    %c0_253 = arith.constant 0 : index
    %c0_254 = arith.constant 0 : index
    %c0_255 = arith.constant 0 : index
    %490 = vector.load %arg7[%c0_253, %c0_254, %c0_255] : memref<2x18x18xf32, #tpu.memory_space<vmem>>, vector<2x16x16xf32>
    %c45_256 = arith.constant 45 : index
    %491 = memref.load %arg4[%c45_256] : memref<72xf32, #tpu.memory_space<smem>>
    %492 = vector.broadcast %491 : f32 to vector<2x16x16xf32>
    %493 = arith.mulf %490, %492 : vector<2x16x16xf32>
    %494 = arith.addf %448, %493 : vector<2x16x16xf32>
    %c0_257 = arith.constant 0 : index
    %c0_258 = arith.constant 0 : index
    %c1_259 = arith.constant 1 : index
    %495 = vector.load %arg7[%c0_257, %c0_258, %c1_259] : memref<2x18x18xf32, #tpu.memory_space<vmem>>, vector<2x16x16xf32>
    %c46_260 = arith.constant 46 : index
    %496 = memref.load %arg4[%c46_260] : memref<72xf32, #tpu.memory_space<smem>>
    %497 = vector.broadcast %496 : f32 to vector<2x16x16xf32>
    %498 = arith.mulf %495, %497 : vector<2x16x16xf32>
    %499 = arith.addf %494, %498 : vector<2x16x16xf32>
    %c0_261 = arith.constant 0 : index
    %c0_262 = arith.constant 0 : index
    %c2_263 = arith.constant 2 : index
    %500 = vector.load %arg7[%c0_261, %c0_262, %c2_263] : memref<2x18x18xf32, #tpu.memory_space<vmem>>, vector<2x16x16xf32>
    %c47_264 = arith.constant 47 : index
    %501 = memref.load %arg4[%c47_264] : memref<72xf32, #tpu.memory_space<smem>>
    %502 = vector.broadcast %501 : f32 to vector<2x16x16xf32>
    %503 = arith.mulf %500, %502 : vector<2x16x16xf32>
    %504 = arith.addf %499, %503 : vector<2x16x16xf32>
    %c0_265 = arith.constant 0 : index
    %c1_266 = arith.constant 1 : index
    %c0_267 = arith.constant 0 : index
    %505 = vector.load %arg7[%c0_265, %c1_266, %c0_267] : memref<2x18x18xf32, #tpu.memory_space<vmem>>, vector<2x16x16xf32>
    %c48_268 = arith.constant 48 : index
    %506 = memref.load %arg4[%c48_268] : memref<72xf32, #tpu.memory_space<smem>>
    %507 = vector.broadcast %506 : f32 to vector<2x16x16xf32>
    %508 = arith.mulf %505, %507 : vector<2x16x16xf32>
    %509 = arith.addf %504, %508 : vector<2x16x16xf32>
    %c0_269 = arith.constant 0 : index
    %c1_270 = arith.constant 1 : index
    %c1_271 = arith.constant 1 : index
    %510 = vector.load %arg7[%c0_269, %c1_270, %c1_271] : memref<2x18x18xf32, #tpu.memory_space<vmem>>, vector<2x16x16xf32>
    %c49_272 = arith.constant 49 : index
    %511 = memref.load %arg4[%c49_272] : memref<72xf32, #tpu.memory_space<smem>>
    %512 = vector.broadcast %511 : f32 to vector<2x16x16xf32>
    %513 = arith.mulf %510, %512 : vector<2x16x16xf32>
    %514 = arith.addf %509, %513 : vector<2x16x16xf32>
    %c0_273 = arith.constant 0 : index
    %c1_274 = arith.constant 1 : index
    %c2_275 = arith.constant 2 : index
    %515 = vector.load %arg7[%c0_273, %c1_274, %c2_275] : memref<2x18x18xf32, #tpu.memory_space<vmem>>, vector<2x16x16xf32>
    %c50_276 = arith.constant 50 : index
    %516 = memref.load %arg4[%c50_276] : memref<72xf32, #tpu.memory_space<smem>>
    %517 = vector.broadcast %516 : f32 to vector<2x16x16xf32>
    %518 = arith.mulf %515, %517 : vector<2x16x16xf32>
    %519 = arith.addf %514, %518 : vector<2x16x16xf32>
    %c0_277 = arith.constant 0 : index
    %c2_278 = arith.constant 2 : index
    %c0_279 = arith.constant 0 : index
    %520 = vector.load %arg7[%c0_277, %c2_278, %c0_279] : memref<2x18x18xf32, #tpu.memory_space<vmem>>, vector<2x16x16xf32>
    %c51_280 = arith.constant 51 : index
    %521 = memref.load %arg4[%c51_280] : memref<72xf32, #tpu.memory_space<smem>>
    %522 = vector.broadcast %521 : f32 to vector<2x16x16xf32>
    %523 = arith.mulf %520, %522 : vector<2x16x16xf32>
    %524 = arith.addf %519, %523 : vector<2x16x16xf32>
    %c0_281 = arith.constant 0 : index
    %c2_282 = arith.constant 2 : index
    %c1_283 = arith.constant 1 : index
    %525 = vector.load %arg7[%c0_281, %c2_282, %c1_283] : memref<2x18x18xf32, #tpu.memory_space<vmem>>, vector<2x16x16xf32>
    %c52_284 = arith.constant 52 : index
    %526 = memref.load %arg4[%c52_284] : memref<72xf32, #tpu.memory_space<smem>>
    %527 = vector.broadcast %526 : f32 to vector<2x16x16xf32>
    %528 = arith.mulf %525, %527 : vector<2x16x16xf32>
    %529 = arith.addf %524, %528 : vector<2x16x16xf32>
    %c0_285 = arith.constant 0 : index
    %c2_286 = arith.constant 2 : index
    %c2_287 = arith.constant 2 : index
    %530 = vector.load %arg7[%c0_285, %c2_286, %c2_287] : memref<2x18x18xf32, #tpu.memory_space<vmem>>, vector<2x16x16xf32>
    %c53_288 = arith.constant 53 : index
    %531 = memref.load %arg4[%c53_288] : memref<72xf32, #tpu.memory_space<smem>>
    %532 = vector.broadcast %531 : f32 to vector<2x16x16xf32>
    %533 = arith.mulf %530, %532 : vector<2x16x16xf32>
    %534 = arith.addf %529, %533 : vector<2x16x16xf32>
    %c6_289 = arith.constant 6 : index
    %535 = memref.load %arg3[%c6_289] : memref<8xf32, #tpu.memory_space<smem>>
    %536 = vector.broadcast %535 : f32 to vector<2x16x16xf32>
    %c54 = arith.constant 54 : index
    %537 = memref.load %arg2[%c54] : memref<72xf32, #tpu.memory_space<smem>>
    %538 = vector.broadcast %537 : f32 to vector<2x16x16xf32>
    %539 = arith.mulf %8, %538 : vector<2x16x16xf32>
    %540 = arith.addf %536, %539 : vector<2x16x16xf32>
    %c55 = arith.constant 55 : index
    %541 = memref.load %arg2[%c55] : memref<72xf32, #tpu.memory_space<smem>>
    %542 = vector.broadcast %541 : f32 to vector<2x16x16xf32>
    %543 = arith.mulf %9, %542 : vector<2x16x16xf32>
    %544 = arith.addf %540, %543 : vector<2x16x16xf32>
    %c56 = arith.constant 56 : index
    %545 = memref.load %arg2[%c56] : memref<72xf32, #tpu.memory_space<smem>>
    %546 = vector.broadcast %545 : f32 to vector<2x16x16xf32>
    %547 = arith.mulf %10, %546 : vector<2x16x16xf32>
    %548 = arith.addf %544, %547 : vector<2x16x16xf32>
    %c57 = arith.constant 57 : index
    %549 = memref.load %arg2[%c57] : memref<72xf32, #tpu.memory_space<smem>>
    %550 = vector.broadcast %549 : f32 to vector<2x16x16xf32>
    %551 = arith.mulf %11, %550 : vector<2x16x16xf32>
    %552 = arith.addf %548, %551 : vector<2x16x16xf32>
    %c58 = arith.constant 58 : index
    %553 = memref.load %arg2[%c58] : memref<72xf32, #tpu.memory_space<smem>>
    %554 = vector.broadcast %553 : f32 to vector<2x16x16xf32>
    %555 = arith.mulf %12, %554 : vector<2x16x16xf32>
    %556 = arith.addf %552, %555 : vector<2x16x16xf32>
    %c59 = arith.constant 59 : index
    %557 = memref.load %arg2[%c59] : memref<72xf32, #tpu.memory_space<smem>>
    %558 = vector.broadcast %557 : f32 to vector<2x16x16xf32>
    %559 = arith.mulf %13, %558 : vector<2x16x16xf32>
    %560 = arith.addf %556, %559 : vector<2x16x16xf32>
    %c60 = arith.constant 60 : index
    %561 = memref.load %arg2[%c60] : memref<72xf32, #tpu.memory_space<smem>>
    %562 = vector.broadcast %561 : f32 to vector<2x16x16xf32>
    %563 = arith.mulf %14, %562 : vector<2x16x16xf32>
    %564 = arith.addf %560, %563 : vector<2x16x16xf32>
    %c61 = arith.constant 61 : index
    %565 = memref.load %arg2[%c61] : memref<72xf32, #tpu.memory_space<smem>>
    %566 = vector.broadcast %565 : f32 to vector<2x16x16xf32>
    %567 = arith.mulf %15, %566 : vector<2x16x16xf32>
    %568 = arith.addf %564, %567 : vector<2x16x16xf32>
    %c62 = arith.constant 62 : index
    %569 = memref.load %arg2[%c62] : memref<72xf32, #tpu.memory_space<smem>>
    %570 = vector.broadcast %569 : f32 to vector<2x16x16xf32>
    %571 = arith.mulf %16, %570 : vector<2x16x16xf32>
    %572 = arith.addf %568, %571 : vector<2x16x16xf32>
    %cst_290 = arith.constant 0.000000e+00 : f32
    %573 = vector.broadcast %cst_290 : f32 to vector<2x16x16xf32>
    %574 = arith.maximumf %572, %573 : vector<2x16x16xf32>
    %c0_291 = arith.constant 0 : index
    %c1_292 = arith.constant 1 : index
    %c1_293 = arith.constant 1 : index
    %575 = vector.load %arg7[%c0_291, %c1_292, %c1_293] : memref<2x18x18xf32, #tpu.memory_space<vmem>>, vector<2x16x16xf32>
    tpu.vector_store %arg7[%c0_291, %c1_292, %c1_293], %574 {strides = array<i32>} : memref<2x18x18xf32, #tpu.memory_space<vmem>>, vector<2x16x16xf32>,
    %c0_294 = arith.constant 0 : index
    %c0_295 = arith.constant 0 : index
    %c0_296 = arith.constant 0 : index
    %576 = vector.load %arg7[%c0_294, %c0_295, %c0_296] : memref<2x18x18xf32, #tpu.memory_space<vmem>>, vector<2x16x16xf32>
    %c54_297 = arith.constant 54 : index
    %577 = memref.load %arg4[%c54_297] : memref<72xf32, #tpu.memory_space<smem>>
    %578 = vector.broadcast %577 : f32 to vector<2x16x16xf32>
    %579 = arith.mulf %576, %578 : vector<2x16x16xf32>
    %580 = arith.addf %534, %579 : vector<2x16x16xf32>
    %c0_298 = arith.constant 0 : index
    %c0_299 = arith.constant 0 : index
    %c1_300 = arith.constant 1 : index
    %581 = vector.load %arg7[%c0_298, %c0_299, %c1_300] : memref<2x18x18xf32, #tpu.memory_space<vmem>>, vector<2x16x16xf32>
    %c55_301 = arith.constant 55 : index
    %582 = memref.load %arg4[%c55_301] : memref<72xf32, #tpu.memory_space<smem>>
    %583 = vector.broadcast %582 : f32 to vector<2x16x16xf32>
    %584 = arith.mulf %581, %583 : vector<2x16x16xf32>
    %585 = arith.addf %580, %584 : vector<2x16x16xf32>
    %c0_302 = arith.constant 0 : index
    %c0_303 = arith.constant 0 : index
    %c2_304 = arith.constant 2 : index
    %586 = vector.load %arg7[%c0_302, %c0_303, %c2_304] : memref<2x18x18xf32, #tpu.memory_space<vmem>>, vector<2x16x16xf32>
    %c56_305 = arith.constant 56 : index
    %587 = memref.load %arg4[%c56_305] : memref<72xf32, #tpu.memory_space<smem>>
    %588 = vector.broadcast %587 : f32 to vector<2x16x16xf32>
    %589 = arith.mulf %586, %588 : vector<2x16x16xf32>
    %590 = arith.addf %585, %589 : vector<2x16x16xf32>
    %c0_306 = arith.constant 0 : index
    %c1_307 = arith.constant 1 : index
    %c0_308 = arith.constant 0 : index
    %591 = vector.load %arg7[%c0_306, %c1_307, %c0_308] : memref<2x18x18xf32, #tpu.memory_space<vmem>>, vector<2x16x16xf32>
    %c57_309 = arith.constant 57 : index
    %592 = memref.load %arg4[%c57_309] : memref<72xf32, #tpu.memory_space<smem>>
    %593 = vector.broadcast %592 : f32 to vector<2x16x16xf32>
    %594 = arith.mulf %591, %593 : vector<2x16x16xf32>
    %595 = arith.addf %590, %594 : vector<2x16x16xf32>
    %c0_310 = arith.constant 0 : index
    %c1_311 = arith.constant 1 : index
    %c1_312 = arith.constant 1 : index
    %596 = vector.load %arg7[%c0_310, %c1_311, %c1_312] : memref<2x18x18xf32, #tpu.memory_space<vmem>>, vector<2x16x16xf32>
    %c58_313 = arith.constant 58 : index
    %597 = memref.load %arg4[%c58_313] : memref<72xf32, #tpu.memory_space<smem>>
    %598 = vector.broadcast %597 : f32 to vector<2x16x16xf32>
    %599 = arith.mulf %596, %598 : vector<2x16x16xf32>
    %600 = arith.addf %595, %599 : vector<2x16x16xf32>
    %c0_314 = arith.constant 0 : index
    %c1_315 = arith.constant 1 : index
    %c2_316 = arith.constant 2 : index
    %601 = vector.load %arg7[%c0_314, %c1_315, %c2_316] : memref<2x18x18xf32, #tpu.memory_space<vmem>>, vector<2x16x16xf32>
    %c59_317 = arith.constant 59 : index
    %602 = memref.load %arg4[%c59_317] : memref<72xf32, #tpu.memory_space<smem>>
    %603 = vector.broadcast %602 : f32 to vector<2x16x16xf32>
    %604 = arith.mulf %601, %603 : vector<2x16x16xf32>
    %605 = arith.addf %600, %604 : vector<2x16x16xf32>
    %c0_318 = arith.constant 0 : index
    %c2_319 = arith.constant 2 : index
    %c0_320 = arith.constant 0 : index
    %606 = vector.load %arg7[%c0_318, %c2_319, %c0_320] : memref<2x18x18xf32, #tpu.memory_space<vmem>>, vector<2x16x16xf32>
    %c60_321 = arith.constant 60 : index
    %607 = memref.load %arg4[%c60_321] : memref<72xf32, #tpu.memory_space<smem>>
    %608 = vector.broadcast %607 : f32 to vector<2x16x16xf32>
    %609 = arith.mulf %606, %608 : vector<2x16x16xf32>
    %610 = arith.addf %605, %609 : vector<2x16x16xf32>
    %c0_322 = arith.constant 0 : index
    %c2_323 = arith.constant 2 : index
    %c1_324 = arith.constant 1 : index
    %611 = vector.load %arg7[%c0_322, %c2_323, %c1_324] : memref<2x18x18xf32, #tpu.memory_space<vmem>>, vector<2x16x16xf32>
    %c61_325 = arith.constant 61 : index
    %612 = memref.load %arg4[%c61_325] : memref<72xf32, #tpu.memory_space<smem>>
    %613 = vector.broadcast %612 : f32 to vector<2x16x16xf32>
    %614 = arith.mulf %611, %613 : vector<2x16x16xf32>
    %615 = arith.addf %610, %614 : vector<2x16x16xf32>
    %c0_326 = arith.constant 0 : index
    %c2_327 = arith.constant 2 : index
    %c2_328 = arith.constant 2 : index
    %616 = vector.load %arg7[%c0_326, %c2_327, %c2_328] : memref<2x18x18xf32, #tpu.memory_space<vmem>>, vector<2x16x16xf32>
    %c62_329 = arith.constant 62 : index
    %617 = memref.load %arg4[%c62_329] : memref<72xf32, #tpu.memory_space<smem>>
    %618 = vector.broadcast %617 : f32 to vector<2x16x16xf32>
    %619 = arith.mulf %616, %618 : vector<2x16x16xf32>
    %620 = arith.addf %615, %619 : vector<2x16x16xf32>
    %c7_330 = arith.constant 7 : index
    %621 = memref.load %arg3[%c7_330] : memref<8xf32, #tpu.memory_space<smem>>
    %622 = vector.broadcast %621 : f32 to vector<2x16x16xf32>
    %c63 = arith.constant 63 : index
    %623 = memref.load %arg2[%c63] : memref<72xf32, #tpu.memory_space<smem>>
    %624 = vector.broadcast %623 : f32 to vector<2x16x16xf32>
    %625 = arith.mulf %8, %624 : vector<2x16x16xf32>
    %626 = arith.addf %622, %625 : vector<2x16x16xf32>
    %c64 = arith.constant 64 : index
    %627 = memref.load %arg2[%c64] : memref<72xf32, #tpu.memory_space<smem>>
    %628 = vector.broadcast %627 : f32 to vector<2x16x16xf32>
    %629 = arith.mulf %9, %628 : vector<2x16x16xf32>
    %630 = arith.addf %626, %629 : vector<2x16x16xf32>
    %c65 = arith.constant 65 : index
    %631 = memref.load %arg2[%c65] : memref<72xf32, #tpu.memory_space<smem>>
    %632 = vector.broadcast %631 : f32 to vector<2x16x16xf32>
    %633 = arith.mulf %10, %632 : vector<2x16x16xf32>
    %634 = arith.addf %630, %633 : vector<2x16x16xf32>
    %c66 = arith.constant 66 : index
    %635 = memref.load %arg2[%c66] : memref<72xf32, #tpu.memory_space<smem>>
    %636 = vector.broadcast %635 : f32 to vector<2x16x16xf32>
    %637 = arith.mulf %11, %636 : vector<2x16x16xf32>
    %638 = arith.addf %634, %637 : vector<2x16x16xf32>
    %c67 = arith.constant 67 : index
    %639 = memref.load %arg2[%c67] : memref<72xf32, #tpu.memory_space<smem>>
    %640 = vector.broadcast %639 : f32 to vector<2x16x16xf32>
    %641 = arith.mulf %12, %640 : vector<2x16x16xf32>
    %642 = arith.addf %638, %641 : vector<2x16x16xf32>
    %c68 = arith.constant 68 : index
    %643 = memref.load %arg2[%c68] : memref<72xf32, #tpu.memory_space<smem>>
    %644 = vector.broadcast %643 : f32 to vector<2x16x16xf32>
    %645 = arith.mulf %13, %644 : vector<2x16x16xf32>
    %646 = arith.addf %642, %645 : vector<2x16x16xf32>
    %c69 = arith.constant 69 : index
    %647 = memref.load %arg2[%c69] : memref<72xf32, #tpu.memory_space<smem>>
    %648 = vector.broadcast %647 : f32 to vector<2x16x16xf32>
    %649 = arith.mulf %14, %648 : vector<2x16x16xf32>
    %650 = arith.addf %646, %649 : vector<2x16x16xf32>
    %c70 = arith.constant 70 : index
    %651 = memref.load %arg2[%c70] : memref<72xf32, #tpu.memory_space<smem>>
    %652 = vector.broadcast %651 : f32 to vector<2x16x16xf32>
    %653 = arith.mulf %15, %652 : vector<2x16x16xf32>
    %654 = arith.addf %650, %653 : vector<2x16x16xf32>
    %c71 = arith.constant 71 : index
    %655 = memref.load %arg2[%c71] : memref<72xf32, #tpu.memory_space<smem>>
    %656 = vector.broadcast %655 : f32 to vector<2x16x16xf32>
    %657 = arith.mulf %16, %656 : vector<2x16x16xf32>
    %658 = arith.addf %654, %657 : vector<2x16x16xf32>
    %cst_331 = arith.constant 0.000000e+00 : f32
    %659 = vector.broadcast %cst_331 : f32 to vector<2x16x16xf32>
    %660 = arith.maximumf %658, %659 : vector<2x16x16xf32>
    %c0_332 = arith.constant 0 : index
    %c1_333 = arith.constant 1 : index
    %c1_334 = arith.constant 1 : index
    %661 = vector.load %arg7[%c0_332, %c1_333, %c1_334] : memref<2x18x18xf32, #tpu.memory_space<vmem>>, vector<2x16x16xf32>
    tpu.vector_store %arg7[%c0_332, %c1_333, %c1_334], %660 {strides = array<i32>} : memref<2x18x18xf32, #tpu.memory_space<vmem>>, vector<2x16x16xf32>,
    %c0_335 = arith.constant 0 : index
    %c0_336 = arith.constant 0 : index
    %c0_337 = arith.constant 0 : index
    %662 = vector.load %arg7[%c0_335, %c0_336, %c0_337] : memref<2x18x18xf32, #tpu.memory_space<vmem>>, vector<2x16x16xf32>
    %c63_338 = arith.constant 63 : index
    %663 = memref.load %arg4[%c63_338] : memref<72xf32, #tpu.memory_space<smem>>
    %664 = vector.broadcast %663 : f32 to vector<2x16x16xf32>
    %665 = arith.mulf %662, %664 : vector<2x16x16xf32>
    %666 = arith.addf %620, %665 : vector<2x16x16xf32>
    %c0_339 = arith.constant 0 : index
    %c0_340 = arith.constant 0 : index
    %c1_341 = arith.constant 1 : index
    %667 = vector.load %arg7[%c0_339, %c0_340, %c1_341] : memref<2x18x18xf32, #tpu.memory_space<vmem>>, vector<2x16x16xf32>
    %c64_342 = arith.constant 64 : index
    %668 = memref.load %arg4[%c64_342] : memref<72xf32, #tpu.memory_space<smem>>
    %669 = vector.broadcast %668 : f32 to vector<2x16x16xf32>
    %670 = arith.mulf %667, %669 : vector<2x16x16xf32>
    %671 = arith.addf %666, %670 : vector<2x16x16xf32>
    %c0_343 = arith.constant 0 : index
    %c0_344 = arith.constant 0 : index
    %c2_345 = arith.constant 2 : index
    %672 = vector.load %arg7[%c0_343, %c0_344, %c2_345] : memref<2x18x18xf32, #tpu.memory_space<vmem>>, vector<2x16x16xf32>
    %c65_346 = arith.constant 65 : index
    %673 = memref.load %arg4[%c65_346] : memref<72xf32, #tpu.memory_space<smem>>
    %674 = vector.broadcast %673 : f32 to vector<2x16x16xf32>
    %675 = arith.mulf %672, %674 : vector<2x16x16xf32>
    %676 = arith.addf %671, %675 : vector<2x16x16xf32>
    %c0_347 = arith.constant 0 : index
    %c1_348 = arith.constant 1 : index
    %c0_349 = arith.constant 0 : index
    %677 = vector.load %arg7[%c0_347, %c1_348, %c0_349] : memref<2x18x18xf32, #tpu.memory_space<vmem>>, vector<2x16x16xf32>
    %c66_350 = arith.constant 66 : index
    %678 = memref.load %arg4[%c66_350] : memref<72xf32, #tpu.memory_space<smem>>
    %679 = vector.broadcast %678 : f32 to vector<2x16x16xf32>
    %680 = arith.mulf %677, %679 : vector<2x16x16xf32>
    %681 = arith.addf %676, %680 : vector<2x16x16xf32>
    %c0_351 = arith.constant 0 : index
    %c1_352 = arith.constant 1 : index
    %c1_353 = arith.constant 1 : index
    %682 = vector.load %arg7[%c0_351, %c1_352, %c1_353] : memref<2x18x18xf32, #tpu.memory_space<vmem>>, vector<2x16x16xf32>
    %c67_354 = arith.constant 67 : index
    %683 = memref.load %arg4[%c67_354] : memref<72xf32, #tpu.memory_space<smem>>
    %684 = vector.broadcast %683 : f32 to vector<2x16x16xf32>
    %685 = arith.mulf %682, %684 : vector<2x16x16xf32>
    %686 = arith.addf %681, %685 : vector<2x16x16xf32>
    %c0_355 = arith.constant 0 : index
    %c1_356 = arith.constant 1 : index
    %c2_357 = arith.constant 2 : index
    %687 = vector.load %arg7[%c0_355, %c1_356, %c2_357] : memref<2x18x18xf32, #tpu.memory_space<vmem>>, vector<2x16x16xf32>
    %c68_358 = arith.constant 68 : index
    %688 = memref.load %arg4[%c68_358] : memref<72xf32, #tpu.memory_space<smem>>
    %689 = vector.broadcast %688 : f32 to vector<2x16x16xf32>
    %690 = arith.mulf %687, %689 : vector<2x16x16xf32>
    %691 = arith.addf %686, %690 : vector<2x16x16xf32>
    %c0_359 = arith.constant 0 : index
    %c2_360 = arith.constant 2 : index
    %c0_361 = arith.constant 0 : index
    %692 = vector.load %arg7[%c0_359, %c2_360, %c0_361] : memref<2x18x18xf32, #tpu.memory_space<vmem>>, vector<2x16x16xf32>
    %c69_362 = arith.constant 69 : index
    %693 = memref.load %arg4[%c69_362] : memref<72xf32, #tpu.memory_space<smem>>
    %694 = vector.broadcast %693 : f32 to vector<2x16x16xf32>
    %695 = arith.mulf %692, %694 : vector<2x16x16xf32>
    %696 = arith.addf %691, %695 : vector<2x16x16xf32>
    %c0_363 = arith.constant 0 : index
    %c2_364 = arith.constant 2 : index
    %c1_365 = arith.constant 1 : index
    %697 = vector.load %arg7[%c0_363, %c2_364, %c1_365] : memref<2x18x18xf32, #tpu.memory_space<vmem>>, vector<2x16x16xf32>
    %c70_366 = arith.constant 70 : index
    %698 = memref.load %arg4[%c70_366] : memref<72xf32, #tpu.memory_space<smem>>
    %699 = vector.broadcast %698 : f32 to vector<2x16x16xf32>
    %700 = arith.mulf %697, %699 : vector<2x16x16xf32>
    %701 = arith.addf %696, %700 : vector<2x16x16xf32>
    %c0_367 = arith.constant 0 : index
    %c2_368 = arith.constant 2 : index
    %c2_369 = arith.constant 2 : index
    %702 = vector.load %arg7[%c0_367, %c2_368, %c2_369] : memref<2x18x18xf32, #tpu.memory_space<vmem>>, vector<2x16x16xf32>
    %c71_370 = arith.constant 71 : index
    %703 = memref.load %arg4[%c71_370] : memref<72xf32, #tpu.memory_space<smem>>
    %704 = vector.broadcast %703 : f32 to vector<2x16x16xf32>
    %705 = arith.mulf %702, %704 : vector<2x16x16xf32>
    %706 = arith.addf %701, %705 : vector<2x16x16xf32>
    %c0_371 = arith.constant 0 : index
    %c0_372 = arith.constant 0 : index
    %c0_373 = arith.constant 0 : index
    %707 = vector.load %arg6[%c0_371, %c0_372, %c0_373] : memref<2x16x16xf32, #tpu.memory_space<vmem>>, vector<2x16x16xf32>
    tpu.vector_store %arg6[%c0_371, %c0_372, %c0_373], %706 {strides = array<i32>} : memref<2x16x16xf32, #tpu.memory_space<vmem>>, vector<2x16x16xf32>,
    return
  }
  func.func @transform_0(%arg0: i32) -> (i32, i32, i32) {
    %c0_i32 = arith.constant 0 : i32
    %c0_i32_0 = arith.constant 0 : i32
    %c0_i32_1 = arith.constant 0 : i32
    return %arg0, %c0_i32, %c0_i32_0 : i32, i32, i32
  }
  func.func @transform_1(%arg0: i32) -> i32 {
    %c0_i32 = arith.constant 0 : i32
    %c0_i32_0 = arith.constant 0 : i32
    return %c0_i32 : i32
  }
  func.func @transform_2(%arg0: i32) -> i32 {
    %c0_i32 = arith.constant 0 : i32
    %c0_i32_0 = arith.constant 0 : i32
    return %c0_i32 : i32
  }
  func.func @transform_3(%arg0: i32) -> i32 {
    %c0_i32 = arith.constant 0 : i32
    %c0_i32_0 = arith.constant 0 : i32
    return %c0_i32 : i32
  }
  func.func @transform_4(%arg0: i32) -> i32 {
    %c0_i32 = arith.constant 0 : i32
    %c0_i32_0 = arith.constant 0 : i32
    return %c0_i32 : i32
  }
  func.func @transform_5(%arg0: i32) -> (i32, i32, i32) {
    %c0_i32 = arith.constant 0 : i32
    %c0_i32_0 = arith.constant 0 : i32
    %c0_i32_1 = arith.constant 0 : i32
    return %arg0, %c0_i32, %c0_i32_0 : i32, i32, i32
  }
}

</mosaic_0001>

<bundles_post_ra>
// kernel: tpu_custom_call.1
= control target key start
LH: loop header
LB: loop body
LE: loop exit
PB: predicated region body
PF: predicated region fallthrough
CT: control target
= control target key end

     0   :  { %11 = vsyncpa [#allocation6], 0  ;;  %s5552_s0 = inlined_call_operand.vmem [shape: f32[2,18,18], index: 0, kind: input, shape index: {}]   ;;  %s5553_s1 = inlined_call_operand.vmem [shape: f32[72], index: 1, kind: input, shape index: {}]   ;;  %s5554_s2 = inlined_call_operand.vmem [shape: f32[8], index: 2, kind: input, shape index: {}]   ;;  %s5555_s3 = inlined_call_operand.vmem [shape: f32[72], index: 3, kind: input, shape index: {}]   ;;  %s5556_s4 = inlined_call_operand.<no memory space> [shape: f32[1], index: 4, kind: input, shape index: {}]   ;;  %s5557_s5 = inlined_call_operand.hbm [shape: f32[2,16,16], index: 5, kind: output, shape index: {}]  }
   0x1   :  { %12 = vsyncpa [#allocation8], 0  ;;  %s32_s20 = sshll.u32 %s5554_s2, 4  ;;  %s33_s20 = int_to_ptr.vmem [resolvable:$true] %s32_s20 }
   0x2   :  { %13 = vsyncpa [#allocation5], 0  ;;  %s22_s23 = sshll.u32 %s5553_s1, 4  ;;  %s3580_s24 = scalar_lea.vmem %s33_s20, 16  ;;  %s23_s23 = int_to_ptr.vmem [resolvable:$true] %s22_s23 }
   0x3   :  { %p3581_p0 = scmp.ne.s32.totalorder %s33_s20, %s3580_s24  ;;  %p3585_p1 = scmp.lt.s32.totalorder %s33_s20, %s33_s20 }
   0x4   :  { %p3586_p2 = scmp.lt.s32.totalorder %s3580_s24, %s3580_s24 }
   0x6   :  { %p3587_p3 = por %p3586_p2, %p3585_p1 }
   0x8   :  { %p3588_p4 = pnand %p3587_p3, %p3581_p0 }
   0xa   :  { %3591 = shalt.err (!%p3588_p4)
}
   0xb   :  { %s3644_s25 = smov [#allocation7]   ;;  %s3592_s26 = scalar_lea.vmem %s23_s23, 16 }
   0xc   :  { %35 = dma.vmem_to_smem %s33_s20, 16, %s3644_s25, [#allocation8]  }
   0xd   :  { %p3593_p5 = scmp.ne.s32.totalorder %s23_s23, %s3592_s26  ;;  %p3597_p6 = scmp.lt.s32.totalorder %s23_s23, %s23_s23 }
   0xe   :  { %p3598_p7 = scmp.lt.s32.totalorder %s3592_s26, %s3592_s26 }
  0x10   :  { %p3599_p8 = por %p3598_p7, %p3597_p6 }
  0x12   :  { %p3600_p9 = pnand %p3599_p8, %p3593_p5 }
  0x14   :  { %3603 = shalt.err (!%p3600_p9)
}
  0x15   :  { %s3645_s2 = smov [#allocation4]   ;;  %s42_s28 = sshll.u32 %s5555_s3, 4  ;;  %s43_s28 = int_to_ptr.vmem [resolvable:$true] %s42_s28 }
  0x16   :  { %25 = dma.vmem_to_smem %s23_s23, 16, %s3645_s2, [#allocation6]  }
  0x17   :  { %s3604_s29 = scalar_lea.vmem %s43_s28, 16  ;;  %p3609_p11 = scmp.lt.s32.totalorder %s43_s28, %s43_s28 }
  0x18   :  { %p3605_p10 = scmp.ne.s32.totalorder %s43_s28, %s3604_s29  ;;  %p3610_p12 = scmp.lt.s32.totalorder %s3604_s29, %s3604_s29 }
  0x1a   :  { %p3611_p13 = por %p3610_p12, %p3609_p11 }
  0x1c   :  { %p3612_p0 = pnand %p3611_p13, %p3605_p10 }
  0x1e   :  { %3615 = shalt.err (!%p3612_p0)
}
  0x1f   :  { %s3646_s30 = smov [#allocation9]  }
  0x20   :  { %45 = dma.vmem_to_smem %s43_s28, 16, %s3646_s30, [#allocation8]  }
  0x21   :  { %3638 = dma.done.wait [#allocation6], 16  }
  0x22   :  { %3639 = vsyncadd [#allocation6], 4294967280 }
  0x23   :  { %3640 = dma.done.wait [#allocation8], 32  }
  0x24   :  { %3641 = vsyncadd [#allocation8], 4294967264 }
  0x25   :  { %57 = sfence }
  0x26   :  { %s3397_s6 = sld [smem:[#allocation4 + $0x1]]  ;;  %s3398_s7 = sld [smem:[#allocation4 + $0x2]]  ;;  %v3696_v0 = vld [vmem:[%s5552_s0 + $0x18] sm:$0xff]  ;;  %v3701_v1 = vld [vmem:[%s5552_s0] sm:$0xff]  ;;  %v3711_v4 = vld [vmem:[%s5552_s0 + $0x8] sm:$0xff]  ;;  %vm58_vm0 = vcmask 139264  }
  0x27   :  { %v3706_v3 = vld [vmem:[%s5552_s0 + $0x20] sm:$0xff]  ;;  %s3647_s15 = smov 127   ;;  %s3400_s16 = sld [smem:[#allocation4 + $0x4]]  ;;  %v3730_v14 = vld [vmem:[%s5552_s0 + $0x9] sm:$0xff]  ;;  %vm63_vm1 = vcmask 7168   ;;  %vm66_vm2 = vcmask 1024  }
  0x28   :  { %s3648_s17 = smov 126   ;;  %v3735_v16 = vld [vmem:[%s5552_s0 + $0x1] sm:$0xff]  ;;  %s3401_s22 = sld [smem:[#allocation4 + $0x5]]  ;;  %v3749_v20 = vld [vmem:[%s5552_s0 + $0x19] sm:$0xff]  ;;  %v3766_v28 = vld [vmem:[%s5552_s0 + $0xa] sm:$0xff]  ;;  %vm71_vm3 = vcmask 146568  }
  0x29   :  { %v3744_v19 = vld [vmem:[%s5552_s0 + $0x21] sm:$0xff]  ;;  %s3403_s2 = sld [smem:[#allocation4 + $0x7]]  ;;  %s3404_s30 = sld [smem:[#allocation4 + $0x8]]  ;;  %vm74_vm4 = vcmask 140424   ;;  %vm301_vm5 = vcmask 138248   ;;  %vm3374_vm6 = vcmask 130048  }
  0x2a   :  { %v3771_v30 = vld [vmem:[%s5552_s0 + $0x2] sm:$0xff]  ;;  %v3785_v34 = vld [vmem:[%s5552_s0 + $0x1a] sm:$0xff]  ;;  %s3415_s3 = sld [smem:[#allocation4 + $0xa]]  ;;  %s3416_s10 = sld [smem:[#allocation4 + $0xb]] }
  0x2b   :  { %v3780_v33 = vld [vmem:[%s5552_s0 + $0x22] sm:$0xff]  ;;  %s3418_s11 = sld [smem:[#allocation4 + $0xd]]  ;;  %s3419_s12 = sld [smem:[#allocation4 + $0xe]] }
  0x2c   :  { %v106_v2 = vstv %s3397_s6  ;;  %v132_v9 = vstv %s3398_s7  ;;  %s3421_s13 = sld [smem:[#allocation4 + $0x10]]  ;;  %s3422_s14 = sld [smem:[#allocation4 + $0x11]] }
  0x2d   :  { %v109_v5 = vmul.f32 %v106_v2, %v3696_v0  ;;  %v107_v6 = vmul.f32 %v106_v2, %v3701_v1  ;;  %v110_v7 = vmul.f32 %v106_v2, %v3706_v3  ;;  %v108_v8 = vmul.f32 %v106_v2, %v3711_v4  ;;  %s3435_s18 = sld [smem:[#allocation4 + $0x14]]  ;;  %s3437_s19 = sld [smem:[#allocation4 + $0x16]] }
  0x2e   :  { %v134_v10 = vmul.f32 %v132_v9, %v3711_v4  ;;  %v133_v11 = vmul.f32 %v132_v9, %v3701_v1  ;;  %v136_v12 = vmul.f32 %v132_v9, %v3706_v3  ;;  %v135_v13 = vmul.f32 %v132_v9, %v3696_v0  ;;  %s3438_s20 = sld [smem:[#allocation4 + $0x17]]  ;;  %s95_s21 = sld [smem:[#allocation4]] }
  0x2f   :  { %119 = vrot.lane.b32.xlu1 %v109_v5, %s3647_s15  ;;  %115 = vrot.lane.b32.xlu0 %v107_v6, %s3647_s15  ;;  %v168_v15 = vstv %s3400_s16  ;;  %v194_v23 = vstv %s3401_s22  ;;  %s3434_s16 = sld [smem:[#allocation4 + $0x13]]  ;;  %s93_s22 = sld [smem:[#allocation7]] }
  0x30   :  { %v170_v17 = vmul.f32 %v168_v15, %v3730_v14  ;;  %v169_v18 = vmul.f32 %v168_v15, %v3735_v16  ;;  %v172_v21 = vmul.f32 %v168_v15, %v3744_v19  ;;  %v171_v22 = vmul.f32 %v168_v15, %v3749_v20  ;;  %s3399_s23 = sld [smem:[#allocation4 + $0x3]]  ;;  %s3402_s24 = sld [smem:[#allocation4 + $0x6]] }
  0x31   :  { %v196_v24 = vmul.f32 %v194_v23, %v3730_v14  ;;  %v195_v25 = vmul.f32 %v194_v23, %v3735_v16  ;;  %v198_v26 = vmul.f32 %v194_v23, %v3744_v19  ;;  %v197_v27 = vmul.f32 %v194_v23, %v3749_v20  ;;  %s3650_s25 = smov 1   ;;  %s3414_s26 = sld [smem:[#allocation4 + $0x9]] }
  0x32   :  { %v230_v29 = vstv %s3403_s2  ;;  %v256_v37 = vstv %s3404_s30  ;;  %v517_v42 = vstv %s3415_s3  ;;  %v543_v47 = vstv %s3416_s10  ;;  %s3413_s2 = sld [smem:[#allocation7 + $0x1]]  ;;  %s3417_s1 = sld [smem:[#allocation4 + $0xc]] }
  0x33   :  { %121 = vrot.lane.b32.xlu1 %v110_v7, %s3647_s15  ;;  %117 = vrot.lane.b32.xlu0 %v108_v8, %s3647_s15  ;;  %v232_v31 = vmul.f32 %v230_v29, %v3766_v28  ;;  %v231_v32 = vmul.f32 %v230_v29, %v3771_v30  ;;  %v234_v35 = vmul.f32 %v230_v29, %v3780_v33  ;;  %v579_v52 = vstv %s3418_s11  ;;  %s3420_s27 = sld [smem:[#allocation4 + $0xf]]  ;;  %s3440_s28 = sld [smem:[#allocation4 + $0x19]] }
  0x34   :  { %v233_v36 = vmul.f32 %v230_v29, %v3785_v34  ;;  %v258_v38 = vmul.f32 %v256_v37, %v3766_v28  ;;  %v257_v39 = vmul.f32 %v256_v37, %v3771_v30  ;;  %v260_v40 = vmul.f32 %v256_v37, %v3780_v33  ;;  %s3441_s29 = sld [smem:[#allocation4 + $0x1a]]  ;;  %s3436_s7 = sld [smem:[#allocation4 + $0x15]] }
  0x35   :  { %v259_v41 = vmul.f32 %v256_v37, %v3785_v34  ;;  %v519_v43 = vmul.f32 %v517_v42, %v3711_v4  ;;  %v518_v44 = vmul.f32 %v517_v42, %v3701_v1  ;;  %v521_v45 = vmul.f32 %v517_v42, %v3706_v3  ;;  %s3433_s30 = sld [smem:[#allocation4 + $0x12]]  ;;  %s3439_s8 = sld [smem:[#allocation4 + $0x18]] }
  0x36   :  { %v520_v46 = vmul.f32 %v517_v42, %v3696_v0  ;;  %v545_v48 = vmul.f32 %v543_v47, %v3711_v4  ;;  %v544_v49 = vmul.f32 %v543_v47, %v3701_v1  ;;  %v547_v50 = vmul.f32 %v543_v47, %v3706_v3  ;;  %s3432_s6 = sld [smem:[#allocation7 + $0x2]]  ;;  %s3405_s9 = sld [smem:[#allocation9 + $0x1]] }
  0x37   :  { %143 = vrot.lane.b32.xlu1 %v134_v10, %s3648_s17  ;;  %141 = vrot.lane.b32.xlu0 %v133_v11, %s3648_s17  ;;  %v546_v51 = vmul.f32 %v543_v47, %v3696_v0  ;;  %v581_v53 = vmul.f32 %v579_v52, %v3730_v14  ;;  %v580_v54 = vmul.f32 %v579_v52, %v3735_v16  ;;  %v605_v57 = vstv %s3419_s12  ;;  %s3406_s3 = sld [smem:[#allocation9 + $0x2]]  ;;  %s3408_s10 = sld [smem:[#allocation9 + $0x4]] }
  0x38   :  { %v583_v55 = vmul.f32 %v579_v52, %v3744_v19  ;;  %v582_v56 = vmul.f32 %v579_v52, %v3749_v20  ;;  %v607_v58 = vmul.f32 %v605_v57, %v3730_v14  ;;  %v606_v59 = vmul.f32 %v605_v57, %v3735_v16  ;;  %s3409_s11 = sld [smem:[#allocation9 + $0x5]]  ;;  %s3411_s12 = sld [smem:[#allocation9 + $0x7]] }
  0x39   :  { %v609_v60 = vmul.f32 %v605_v57, %v3744_v19  ;;  %v608_v61 = vmul.f32 %v605_v57, %v3749_v20  ;;  %v641_v62 = vstv %s3421_s13  ;;  %v667_v7 = vstv %s3422_s14  ;;  %s3412_s13 = sld [smem:[#allocation9 + $0x8]]  ;;  %s3424_s14 = sld [smem:[#allocation9 + $0xa]] }
  0x3a   :  { %v643_v63 = vmul.f32 %v641_v62, %v3766_v28  ;;  %v642_v2 = vmul.f32 %v641_v62, %v3771_v30  ;;  %v645_v5 = vmul.f32 %v641_v62, %v3780_v33  ;;  %v644_v6 = vmul.f32 %v641_v62, %v3785_v34 }
  0x3b   :  { %147 = vrot.lane.b32.xlu1 %v136_v12, %s3648_s17  ;;  %145 = vrot.lane.b32.xlu0 %v135_v13, %s3648_s17  ;;  %v669_v8 = vmul.f32 %v667_v7, %v3766_v28  ;;  %v668_v9 = vmul.f32 %v667_v7, %v3771_v30  ;;  %v671_v10 = vmul.f32 %v667_v7, %v3780_v33  ;;  %v927_v12 = vstv %s3434_s16  ;;  %s3425_s16 = sld [smem:[#allocation9 + $0xb]] }
  0x3c   :  { %v670_v11 = vmul.f32 %v667_v7, %v3785_v34  ;;  %v929_v13 = vmul.f32 %v927_v12, %v3711_v4  ;;  %v928_v15 = vmul.f32 %v927_v12, %v3701_v1 }
  0x3f   :  { %179 = vrot.lane.b32.xlu1 %v170_v17, %s3647_s15  ;;  %177 = vrot.lane.b32.xlu0 %v169_v18, %s3647_s15  ;;  %v931_v17 = vmul.f32 %v927_v12, %v3706_v3  ;;  %v930_v18 = vmul.f32 %v927_v12, %v3696_v0 }
  0x43   :  { %183 = vrot.lane.b32.xlu1 %v172_v21, %s3647_s15  ;;  %181 = vrot.lane.b32.xlu0 %v171_v22, %s3647_s15  ;;  %v953_v21 = vstv %s3435_s18  ;;  %s3427_s18 = sld [smem:[#allocation9 + $0xd]] }
  0x44   :  { %v955_v22 = vmul.f32 %v953_v21, %v3711_v4  ;;  %v954_v23 = vmul.f32 %v953_v21, %v3701_v1 }
  0x47   :  { %205 = vrot.lane.b32.xlu1 %v196_v24, %s3648_s17  ;;  %203 = vrot.lane.b32.xlu0 %v195_v25, %s3648_s17  ;;  %v957_v24 = vmul.f32 %v953_v21, %v3706_v3  ;;  %v956_v25 = vmul.f32 %v953_v21, %v3696_v0 }
  0x4b   :  { %209 = vrot.lane.b32.xlu1 %v198_v26, %s3648_s17  ;;  %207 = vrot.lane.b32.xlu0 %v197_v27, %s3648_s17  ;;  %v989_v26 = vstv %s3437_s19  ;;  %s3428_s19 = sld [smem:[#allocation9 + $0xe]] }
  0x4c   :  { %v991_v27 = vmul.f32 %v989_v26, %v3730_v14  ;;  %v990_v29 = vmul.f32 %v989_v26, %v3735_v16 }
  0x4f   :  { %241 = vrot.lane.b32.xlu1 %v232_v31, %s3647_s15  ;;  %239 = vrot.lane.b32.xlu0 %v231_v32, %s3647_s15  ;;  %v993_v31 = vmul.f32 %v989_v26, %v3744_v19  ;;  %v992_v32 = vmul.f32 %v989_v26, %v3749_v20  ;;  %v3649_v26 = vmov 0.0  }
  0x50   :  { %59 = vst.msk [vmem:[#allocation2] sm:$0x1] %vm58_vm0, %v3649_v26  ;;  %60 = vst.msk [vmem:[#allocation2 + $0x18] sm:$0x1] %vm58_vm0, %v3649_v26 }
  0x51   :  { %61 = vst.msk [vmem:[#allocation2 + $0x11] sm:$0x1] %vm58_vm0, %v3649_v26  ;;  %62 = vst.msk [vmem:[#allocation2 + $0x29] sm:$0x1] %vm58_vm0, %v3649_v26 }
  0x52   :  { %64 = vst.msk [vmem:[#allocation2] sm:$0xff] %vm63_vm1, %v3649_v26  ;;  %65 = vst.msk [vmem:[#allocation2 + $0x8] sm:$0xff] %vm63_vm1, %v3649_v26 }
  0x53   :  { %245 = vrot.lane.b32.xlu1 %v234_v35, %s3647_s15  ;;  %243 = vrot.lane.b32.xlu0 %v233_v36, %s3647_s15  ;;  %v1015_v35 = vstv %s3438_s20  ;;  %67 = vst.msk [vmem:[#allocation2 + $0x10] sm:$0x3] %vm66_vm2, %v3649_v26  ;;  %70 = vst.msk [vmem:[#allocation2 + $0x28] sm:$0x3] %vm66_vm2, %v3649_v26  ;;  %s3430_s20 = sld [smem:[#allocation9 + $0x10]] }
  0x54   :  { %v1019_v42 = vmul.f32 %v1015_v35, %v3744_v19  ;;  %68 = vst.msk [vmem:[#allocation2 + $0x18] sm:$0xff] %vm63_vm1, %v3649_v26  ;;  %69 = vst.msk [vmem:[#allocation2 + $0x20] sm:$0xff] %vm63_vm1, %v3649_v26 }
  0x55   :  { %72 = vst.msk [vmem:[#allocation2] sm:$0xff] %vm71_vm3, %v3649_v26  ;;  %73 = vst.msk [vmem:[#allocation2 + $0x8] sm:$0xff] %vm71_vm3, %v3649_v26 }
  0x56   :  { %75 = vst.msk [vmem:[#allocation2 + $0x10] sm:$0x3] %vm74_vm4, %v3649_v26  ;;  %78 = vst.msk [vmem:[#allocation2 + $0x28] sm:$0x3] %vm74_vm4, %v3649_v26 }
  0x57   :  { %267 = vrot.lane.b32.xlu1 %v258_v38, %s3648_s17  ;;  %265 = vrot.lane.b32.xlu0 %v257_v39, %s3648_s17  ;;  %v1017_v38 = vmul.f32 %v1015_v35, %v3730_v14  ;;  %v1016_v39 = vmul.f32 %v1015_v35, %v3735_v16  ;;  %76 = vst.msk [vmem:[#allocation2 + $0x18] sm:$0xff] %vm71_vm3, %v3649_v26  ;;  %77 = vst.msk [vmem:[#allocation2 + $0x20] sm:$0xff] %vm71_vm3, %v3649_v26 }
  0x5b   :  { %271 = vrot.lane.b32.xlu1 %v260_v40, %s3648_s17  ;;  %269 = vrot.lane.b32.xlu0 %v259_v41, %s3648_s17 }
  0x5f   :  { %528 = vrot.lane.b32.xlu1 %v519_v43, %s3647_s15  ;;  %526 = vrot.lane.b32.xlu0 %v518_v44, %s3647_s15  ;;  %v1018_v43 = vmul.f32 %v1015_v35, %v3749_v20 }
  0x63   :  { %532 = vrot.lane.b32.xlu1 %v521_v45, %s3647_s15  ;;  %530 = vrot.lane.b32.xlu0 %v520_v46, %s3647_s15  ;;  %v96_v46 = vstv %s95_s21  ;;  %s3431_s21 = sld [smem:[#allocation9 + $0x11]] }
  0x64   :  { %v100_v57 = vmul.f32 %v96_v46, %v3706_v3 }
  0x67   :  { %554 = vrot.lane.b32.xlu1 %v545_v48, %s3648_s17  ;;  %552 = vrot.lane.b32.xlu0 %v544_v49, %s3648_s17  ;;  %v97_v49 = vmul.f32 %v96_v46, %v3701_v1 }
  0x6b   :  { %558 = vrot.lane.b32.xlu1 %v547_v50, %s3648_s17  ;;  %556 = vrot.lane.b32.xlu0 %v546_v51, %s3648_s17  ;;  %v98_v50 = vmul.f32 %v96_v46, %v3711_v4  ;;  %v94_v51 = vstv %s93_s22  ;;  %s3443_s22 = sld [smem:[#allocation9 + $0x13]] }
  0x6f   :  { %590 = vrot.lane.b32.xlu1 %v581_v53, %s3647_s15  ;;  %588 = vrot.lane.b32.xlu0 %v580_v54, %s3647_s15  ;;  %v101_v54 = vadd.f32 %v97_v49, %v94_v51 }
  0x73   :  { %594 = vrot.lane.b32.xlu1 %v583_v55, %s3647_s15  ;;  %592 = vrot.lane.b32.xlu0 %v582_v56, %s3647_s15  ;;  %v102_v55 = vadd.f32 %v98_v50, %v94_v51  ;;  %v99_v56 = vmul.f32 %v96_v46, %v3696_v0 }
  0x77   :  { %616 = vrot.lane.b32.xlu1 %v607_v58, %s3648_s17  ;;  %614 = vrot.lane.b32.xlu0 %v606_v59, %s3648_s17 }
  0x7b   :  { %620 = vrot.lane.b32.xlu1 %v609_v60, %s3648_s17  ;;  %618 = vrot.lane.b32.xlu0 %v608_v61, %s3648_s17  ;;  %v158_v60 = vstv %s3399_s23  ;;  %s3444_s23 = sld [smem:[#allocation9 + $0x14]] }
  0x7c   :  { %v160_v7 = vmul.f32 %v158_v60, %v3730_v14 }
  0x7f   :  { %652 = vrot.lane.b32.xlu1 %v643_v63, %s3647_s15  ;;  %650 = vrot.lane.b32.xlu0 %v642_v2, %s3647_s15  ;;  %v103_v63 = vadd.f32 %v99_v56, %v94_v51  ;;  %v104_v2 = vadd.f32 %v100_v57, %v94_v51 }
  0x83   :  { %656 = vrot.lane.b32.xlu1 %v645_v5, %s3647_s15  ;;  %654 = vrot.lane.b32.xlu0 %v644_v6, %s3647_s15 }
  0x87   :  { %678 = vrot.lane.b32.xlu1 %v669_v8, %s3648_s17  ;;  %676 = vrot.lane.b32.xlu0 %v668_v9, %s3648_s17  ;;  %v159_v8 = vmul.f32 %v158_v60, %v3735_v16 }
  0x8b   :  { %682 = vrot.lane.b32.xlu1 %v671_v10, %s3648_s17  ;;  %680 = vrot.lane.b32.xlu0 %v670_v11, %s3648_s17  ;;  %v162_v11 = vmul.f32 %v158_v60, %v3744_v19 }
  0x8f   :  { %938 = vrot.lane.b32.xlu1 %v929_v13, %s3647_s15  ;;  %936 = vrot.lane.b32.xlu0 %v928_v15, %s3647_s15  ;;  %v161_v15 = vmul.f32 %v158_v60, %v3749_v20 }
  0x93   :  { %942 = vrot.lane.b32.xlu1 %v931_v17, %s3647_s15  ;;  %940 = vrot.lane.b32.xlu0 %v930_v18, %s3647_s15  ;;  %v220_v17 = vstv %s3402_s24  ;;  %s3446_s24 = sld [smem:[#allocation9 + $0x16]] }
  0x94   :  { %v221_v35 = vmul.f32 %v220_v17, %v3771_v30 }
  0x97   :  { %964 = vrot.lane.b32.xlu1 %v955_v22, %s3648_s17  ;;  %962 = vrot.lane.b32.xlu0 %v954_v23, %s3648_s17 }
  0x9b   :  { %968 = vrot.lane.b32.xlu1 %v957_v24, %s3648_s17  ;;  %966 = vrot.lane.b32.xlu0 %v956_v25, %s3648_s17 }
  0x9f   :  { %1000 = vrot.lane.b32.xlu1 %v991_v27, %s3647_s15  ;;  %998 = vrot.lane.b32.xlu0 %v990_v29, %s3647_s15 }
  0xa1   :  { %v120_v36 = vpop.permute.xlu1 %119  ;;  %v116_v37 = vpop.permute.xlu0 %115 }
  0xa2   :  { %v127_v61 = vadd.f32 %v116_v37, %v101_v54  ;;  %v129_v12 = vadd.f32 %v120_v36, %v103_v63 }
  0xa3   :  { %1004 = vrot.lane.b32.xlu1 %v993_v31, %s3647_s15  ;;  %1002 = vrot.lane.b32.xlu0 %v992_v32, %s3647_s15  ;;  %v222_v31 = vmul.f32 %v220_v17, %v3766_v28 }
  0xa5   :  { %v122_v40 = vpop.permute.xlu1 %121  ;;  %v118_v41 = vpop.permute.xlu0 %117 }
  0xa6   :  { %v128_v62 = vadd.f32 %v118_v41, %v102_v55  ;;  %v130_v13 = vadd.f32 %v122_v40, %v104_v2 }
  0xa7   :  { %1026 = vrot.lane.b32.xlu1 %v1017_v38, %s3648_s17  ;;  %1024 = vrot.lane.b32.xlu0 %v1016_v39, %s3648_s17 }
  0xa9   :  { %v144_v44 = vpop.permute.xlu1 %143  ;;  %v142_v45 = vpop.permute.xlu0 %141 }
  0xaa   :  { %v154_v5 = vadd.f32 %v144_v44, %v128_v62  ;;  %v153_v6 = vadd.f32 %v142_v45, %v127_v61  ;;  %v223_v45 = vmul.f32 %v220_v17, %v3785_v34 }
  0xab   :  { %1030 = vrot.lane.b32.xlu1 %v1019_v42, %s3648_s17  ;;  %1028 = vrot.lane.b32.xlu0 %v1018_v43, %s3648_s17  ;;  %v224_v43 = vmul.f32 %v220_v17, %v3780_v33  ;;  %v507_v17 = vstv %s3414_s26  ;;  %s3447_s26 = sld [smem:[#allocation9 + $0x17]] }
  0xac   :  { %v164_v18 = vadd.f32 %v160_v7, %v154_v5  ;;  %v163_v21 = vadd.f32 %v159_v8, %v153_v6 }
  0xad   :  { %v148_v47 = vpop.permute.xlu1 %147  ;;  %v146_v48 = vpop.permute.xlu0 %145 }
  0xae   :  { %v156_v24 = vadd.f32 %v148_v47, %v130_v13  ;;  %v155_v25 = vadd.f32 %v146_v48, %v129_v12 }
  0xb0   :  { %v166_v37 = vadd.f32 %v162_v11, %v156_v24  ;;  %v165_v38 = vadd.f32 %v161_v15, %v155_v25  ;;  %v505_v24 = vstv %s3413_s2  ;;  %s3449_s2 = sld [smem:[#allocation9 + $0x19]] }
  0xb1   :  { %v180_v52 = vpop.permute.xlu1 %179  ;;  %v178_v53 = vpop.permute.xlu0 %177 }
  0xb2   :  { %v190_v27 = vadd.f32 %v180_v52, %v164_v18  ;;  %v189_v29 = vadd.f32 %v178_v53, %v163_v21 }
  0xb5   :  { %v184_v58 = vpop.permute.xlu1 %183  ;;  %v182_v59 = vpop.permute.xlu0 %181 }
  0xb6   :  { %v192_v41 = vadd.f32 %v184_v58, %v166_v37  ;;  %v191_v42 = vadd.f32 %v182_v59, %v165_v38  ;;  %v569_v37 = vstv %s3417_s1  ;;  %s3450_s1 = sld [smem:[#allocation9 + $0x1a]] }
  0xb9   :  { %v206_v9 = vpop.permute.xlu1 %205  ;;  %v204_v10 = vpop.permute.xlu0 %203 }
  0xba   :  { %v216_v39 = vadd.f32 %v206_v9, %v190_v27  ;;  %v215_v40 = vadd.f32 %v204_v10, %v189_v29 }
  0xbc   :  { %v226_v49 = vadd.f32 %v222_v31, %v216_v39  ;;  %v225_v50 = vadd.f32 %v221_v35, %v215_v40  ;;  %v511_v31 = vmul.f32 %v507_v17, %v3706_v3 }
  0xbd   :  { %v210_v22 = vpop.permute.xlu1 %209  ;;  %v208_v23 = vpop.permute.xlu0 %207 }
  0xbe   :  { %v218_v47 = vadd.f32 %v210_v22, %v192_v41  ;;  %v217_v48 = vadd.f32 %v208_v23, %v191_v42  ;;  %v509_v22 = vmul.f32 %v507_v17, %v3711_v4  ;;  %v508_v23 = vmul.f32 %v507_v17, %v3701_v1 }
  0xbf   :  { %v515_v40 = vadd.f32 %v511_v31, %v505_v24 }
  0xc0   :  { %v228_v55 = vadd.f32 %v224_v43, %v218_v47  ;;  %v227_v56 = vadd.f32 %v223_v45, %v217_v48  ;;  %v513_v27 = vadd.f32 %v509_v22, %v505_v24  ;;  %v512_v29 = vadd.f32 %v508_v23, %v505_v24 }
  0xc1   :  { %v242_v32 = vpop.permute.xlu1 %241  ;;  %v240_v36 = vpop.permute.xlu0 %239  ;;  %v570_v47 = vmul.f32 %v569_v37, %v3735_v16 }
  0xc2   :  { %v252_v51 = vadd.f32 %v242_v32, %v226_v49  ;;  %v251_v52 = vadd.f32 %v240_v36, %v225_v50  ;;  %v510_v32 = vmul.f32 %v507_v17, %v3696_v0  ;;  %v573_v50 = vmul.f32 %v569_v37, %v3744_v19 }
  0xc4   :  { %v514_v41 = vadd.f32 %v510_v32, %v505_v24 }
  0xc5   :  { %v246_v44 = vpop.permute.xlu1 %245  ;;  %v244_v46 = vpop.permute.xlu0 %243 }
  0xc6   :  { %v254_v58 = vadd.f32 %v246_v44, %v228_v55  ;;  %v253_v59 = vadd.f32 %v244_v46, %v227_v56  ;;  %v571_v46 = vmul.f32 %v569_v37, %v3730_v14 }
  0xc9   :  { %v268_v53 = vpop.permute.xlu1 %267  ;;  %v266_v54 = vpop.permute.xlu0 %265 }
  0xca   :  { %v278_v57 = vadd.f32 %v268_v53, %v252_v51  ;;  %v277_v60 = vadd.f32 %v266_v54, %v251_v52  ;;  %v572_v51 = vmul.f32 %v569_v37, %v3749_v20  ;;  %v631_v54 = vstv %s3420_s27  ;;  %s3453_s27 = sld [smem:[#allocation4 + $0x1c]] }
  0xcc   :  { %v282_v61 = vmax.f32 %v278_v57, 0.0  ;;  %v281_v62 = vmax.f32 %v277_v60, 0.0 }
  0xcd   :  { %v272_v63 = vpop.permute.xlu1 %271  ;;  %v270_v2 = vpop.permute.xlu0 %269 }
  0xce   :  { %v280_v5 = vadd.f32 %v272_v63, %v254_v58  ;;  %v279_v6 = vadd.f32 %v270_v2, %v253_v59  ;;  %291 = vrot.lane.b32.xlu1 %v282_v61, %s3650_s25  ;;  %289 = vrot.lane.b32.xlu0 %v281_v62, %s3650_s25  ;;  %v633_v61 = vmul.f32 %v631_v54, %v3766_v28 }
  0xcf   :  { %v632_v63 = vmul.f32 %v631_v54, %v3771_v30 }
  0xd0   :  { %v284_v7 = vmax.f32 %v280_v5, 0.0  ;;  %v283_v8 = vmax.f32 %v279_v6, 0.0 }
  0xd1   :  { %v529_v9 = vpop.permute.xlu1 %528  ;;  %v527_v10 = vpop.permute.xlu0 %526 }
  0xd2   :  { %295 = vrot.lane.b32.xlu1 %v284_v7, %s3650_s25  ;;  %293 = vrot.lane.b32.xlu0 %v283_v8, %s3650_s25  ;;  %v539_v38 = vadd.f32 %v529_v9, %v513_v27  ;;  %v538_v39 = vadd.f32 %v527_v10, %v512_v29 }
  0xd5   :  { %v533_v11 = vpop.permute.xlu1 %532  ;;  %v531_v12 = vpop.permute.xlu0 %530 }
  0xd6   :  { %v541_v48 = vadd.f32 %v533_v11, %v515_v40  ;;  %v540_v49 = vadd.f32 %v531_v12, %v514_v41  ;;  %v635_v11 = vmul.f32 %v631_v54, %v3780_v33 }
  0xd9   :  { %v555_v13 = vpop.permute.xlu1 %554  ;;  %v553_v15 = vpop.permute.xlu0 %552 }
  0xda   :  { %v565_v44 = vadd.f32 %v555_v13, %v539_v38  ;;  %v564_v45 = vadd.f32 %v553_v15, %v538_v39  ;;  %v634_v13 = vmul.f32 %v631_v54, %v3785_v34 }
  0xdc   :  { %v575_v57 = vadd.f32 %v571_v46, %v565_v44  ;;  %v574_v60 = vadd.f32 %v570_v47, %v564_v45 }
  0xdd   :  { %v559_v18 = vpop.permute.xlu1 %558  ;;  %v557_v21 = vpop.permute.xlu0 %556 }
  0xde   :  { %v567_v55 = vadd.f32 %v559_v18, %v541_v48  ;;  %v566_v56 = vadd.f32 %v557_v21, %v540_v49 }
  0xe0   :  { %v577_v5 = vadd.f32 %v573_v50, %v567_v55  ;;  %v576_v6 = vadd.f32 %v572_v51, %v566_v56  ;;  %v1077_v50 = vstv %s3441_s29  ;;  %s3484_s29 = sld [smem:[#allocation9 + $0x28]] }
  0xe1   :  { %v591_v25 = vpop.permute.xlu1 %590  ;;  %v589_v26 = vpop.permute.xlu0 %588  ;;  %v1079_v51 = vmul.f32 %v1077_v50, %v3766_v28  ;;  %v1080_v54 = vmul.f32 %v1077_v50, %v3785_v34 }
  0xe2   :  { %v601_v58 = vadd.f32 %v591_v25, %v575_v57  ;;  %v600_v59 = vadd.f32 %v589_v26, %v574_v60 }
  0xe5   :  { %v595_v35 = vpop.permute.xlu1 %594  ;;  %v593_v36 = vpop.permute.xlu0 %592 }
  0xe6   :  { %v603_v9 = vadd.f32 %v595_v35, %v577_v5  ;;  %v602_v10 = vadd.f32 %v593_v36, %v576_v6 }
  0xe9   :  { %v617_v42 = vpop.permute.xlu1 %616  ;;  %v615_v43 = vpop.permute.xlu0 %614 }
  0xea   :  { %v627_v7 = vadd.f32 %v617_v42, %v601_v58  ;;  %v626_v8 = vadd.f32 %v615_v43, %v600_v59  ;;  %v1051_v43 = vstv %s3440_s28  ;;  %s3454_s28 = sld [smem:[#allocation4 + $0x1d]] }
  0xeb   :  { %v1053_v46 = vmul.f32 %v1051_v43, %v3766_v28  ;;  %v1052_v47 = vmul.f32 %v1051_v43, %v3771_v30  ;;  %v1055_v48 = vmul.f32 %v1051_v43, %v3780_v33  ;;  %v1054_v49 = vmul.f32 %v1051_v43, %v3785_v34 }
  0xec   :  { %v637_v21 = vadd.f32 %v633_v61, %v627_v7  ;;  %v636_v22 = vadd.f32 %v632_v63, %v626_v8 }
  0xed   :  { %v621_v52 = vpop.permute.xlu1 %620  ;;  %v619_v53 = vpop.permute.xlu0 %618 }
  0xee   :  { %v629_v17 = vadd.f32 %v621_v52, %v603_v9  ;;  %v628_v18 = vadd.f32 %v619_v53, %v602_v10  ;;  %v1078_v52 = vmul.f32 %v1077_v50, %v3771_v30  ;;  %v1081_v53 = vmul.f32 %v1077_v50, %v3780_v33 }
  0xf0   :  { %v639_v27 = vadd.f32 %v635_v11, %v629_v17  ;;  %v638_v29 = vadd.f32 %v634_v13, %v628_v18  ;;  %v917_v17 = vstv %s3433_s30  ;;  %s3485_s30 = sld [smem:[#allocation9 + $0x29]] }
  0xf1   :  { %v653_v62 = vpop.permute.xlu1 %652  ;;  %v651_v2 = vpop.permute.xlu0 %650  ;;  %v919_v18 = vmul.f32 %v917_v17, %v3711_v4 }
  0xf2   :  { %v663_v23 = vadd.f32 %v653_v62, %v637_v21  ;;  %v662_v24 = vadd.f32 %v651_v2, %v636_v22  ;;  %v918_v21 = vmul.f32 %v917_v17, %v3701_v1  ;;  %v915_v22 = vstv %s3432_s6  ;;  %s3487_s6 = sld [smem:[#allocation9 + $0x2b]] }
  0xf5   :  { %v657_v12 = vpop.permute.xlu1 %656  ;;  %v655_v15 = vpop.permute.xlu0 %654 }
  0xf6   :  { %v665_v35 = vadd.f32 %v657_v12, %v639_v27  ;;  %v664_v36 = vadd.f32 %v655_v15, %v638_v29  ;;  %v979_v27 = vstv %s3436_s7  ;;  %s3452_s7 = sld [smem:[#allocation4 + $0x1b]] }
  0xf9   :  { %v679_v25 = vpop.permute.xlu1 %678  ;;  %v677_v26 = vpop.permute.xlu0 %676 }
  0xfa   :  { %v689_v31 = vadd.f32 %v679_v25, %v663_v23  ;;  %v688_v32 = vadd.f32 %v677_v26, %v662_v24  ;;  %v923_v23 = vadd.f32 %v919_v18, %v915_v22  ;;  %v922_v24 = vadd.f32 %v918_v21, %v915_v22 }
  0xfb   :  { %v921_v25 = vmul.f32 %v917_v17, %v3706_v3  ;;  %v920_v26 = vmul.f32 %v917_v17, %v3696_v0  ;;  %v983_v0 = vmul.f32 %v979_v27, %v3744_v19 }
  0xfc   :  { %v693_v37 = vmax.f32 %v689_v31, 0.0  ;;  %v692_v38 = vmax.f32 %v688_v32, 0.0 }
  0xfd   :  { %v683_v39 = vpop.permute.xlu1 %682  ;;  %v681_v40 = vpop.permute.xlu0 %680  ;;  %v925_v32 = vadd.f32 %v921_v25, %v915_v22 }
  0xfe   :  { %v691_v41 = vadd.f32 %v683_v39, %v665_v35  ;;  %v690_v42 = vadd.f32 %v681_v40, %v664_v36  ;;  %702 = vrot.lane.b32.xlu1 %v693_v37, %s3650_s25  ;;  %700 = vrot.lane.b32.xlu0 %v692_v38, %s3650_s25  ;;  %v924_v35 = vadd.f32 %v920_v26, %v915_v22 }
  0xff   :  { %v981_v36 = vmul.f32 %v979_v27, %v3730_v14  ;;  %v980_v37 = vmul.f32 %v979_v27, %v3735_v16 }
 0x100   :  { %v695_v44 = vmax.f32 %v691_v41, 0.0  ;;  %v694_v45 = vmax.f32 %v690_v42, 0.0  ;;  %v982_v42 = vmul.f32 %v979_v27, %v3749_v20 }
 0x101   :  { %v939_v55 = vpop.permute.xlu1 %938  ;;  %v937_v56 = vpop.permute.xlu0 %936 }
 0x102   :  { %706 = vrot.lane.b32.xlu1 %v695_v44, %s3650_s25  ;;  %704 = vrot.lane.b32.xlu0 %v694_v45, %s3650_s25  ;;  %v949_v29 = vadd.f32 %v939_v55, %v923_v23  ;;  %v948_v31 = vadd.f32 %v937_v56, %v922_v24  ;;  %v1041_v56 = vstv %s3439_s8  ;;  %s3451_s8 = sld [smem:[#allocation7 + $0x3]] }
 0x103   :  { %v1045_v17 = vmul.f32 %v1041_v56, %v3780_v33  ;;  %v1044_v21 = vmul.f32 %v1041_v56, %v3785_v34 }
 0x105   :  { %v943_v57 = vpop.permute.xlu1 %942  ;;  %v941_v60 = vpop.permute.xlu0 %940 }
 0x106   :  { %1062 = vrot.lane.b32.xlu1 %v1053_v46, %s3647_s15  ;;  %1060 = vrot.lane.b32.xlu0 %v1052_v47, %s3647_s15  ;;  %v951_v4 = vadd.f32 %v943_v57, %v925_v32  ;;  %v950_v38 = vadd.f32 %v941_v60, %v924_v35 }
 0x109   :  { %v965_v58 = vpop.permute.xlu1 %964  ;;  %v963_v59 = vpop.permute.xlu0 %962 }
 0x10a   :  { %1066 = vrot.lane.b32.xlu1 %v1055_v48, %s3647_s15  ;;  %1064 = vrot.lane.b32.xlu0 %v1054_v49, %s3647_s15  ;;  %v975_v1 = vadd.f32 %v965_v58, %v949_v29  ;;  %v974_v39 = vadd.f32 %v963_v59, %v948_v31 }
 0x10c   :  { %v985_v48 = vadd.f32 %v981_v36, %v975_v1  ;;  %v984_v49 = vadd.f32 %v980_v37, %v974_v39 }
 0x10d   :  { %v969_v61 = vpop.permute.xlu1 %968  ;;  %v967_v62 = vpop.permute.xlu0 %966 }
 0x10e   :  { %1088 = vrot.lane.b32.xlu1 %v1079_v51, %s3648_s17  ;;  %1086 = vrot.lane.b32.xlu0 %v1078_v52, %s3648_s17  ;;  %v977_v46 = vadd.f32 %v969_v61, %v951_v4  ;;  %v976_v47 = vadd.f32 %v967_v62, %v950_v38  ;;  %v1043_v61 = vmul.f32 %v1041_v56, %v3766_v28  ;;  %v321_v38 = vstv %s3405_s9  ;;  %s3455_s9 = sld [smem:[#allocation4 + $0x1e]] }
 0x110   :  { %v987_v58 = vadd.f32 %v983_v0, %v977_v46  ;;  %v986_v59 = vadd.f32 %v982_v42, %v976_v47 }
 0x111   :  { %v3929_v63 = vpop.permute.xlu1 %1000  ;;  %v3931_v2 = vpop.permute.xlu0 %998 }
 0x112   :  { %1092 = vrot.lane.b32.xlu1 %v1081_v53, %s3648_s17  ;;  %1090 = vrot.lane.b32.xlu0 %v1080_v54, %s3648_s17  ;;  %v1011_v57 = vadd.f32 %v3929_v63, %v985_v48  ;;  %v1010_v60 = vadd.f32 %v3931_v2, %v984_v49  ;;  %v387_v49 = vstv %s3408_s10  ;;  %s3462_s10 = sld [smem:[#allocation9 + $0x1c]] }
 0x115   :  { %v3933_v5 = vpop.permute.xlu1 %1004  ;;  %v3935_v6 = vpop.permute.xlu0 %1002 }
 0x119   :  { %v3937_v7 = vpop.permute.xlu1 %1026  ;;  %v3939_v8 = vpop.permute.xlu0 %1024 }
 0x11a   :  { %v1037_v63 = vadd.f32 %v3937_v7, %v1011_v57  ;;  %v1036_v2 = vadd.f32 %v3939_v8, %v1010_v60  ;;  %v413_v60 = vstv %s3409_s11  ;;  %s3456_s11 = sld [smem:[#allocation4 + $0x1f]] }
 0x11d   :  { %v3941_v9 = vpop.permute.xlu1 %1030  ;;  %v3943_v10 = vpop.permute.xlu0 %1028 }
 0x140   :  { %v292_v11 = vpop.permute.xlu1 %291  ;;  %v290_v12 = vpop.permute.xlu0 %289 }
 0x141   :  { %303 = vst.msk [vmem:[#allocation2 + $0x9] sm:$0xff] %vm301_vm5, %v292_v11  ;;  %302 = vst.msk [vmem:[#allocation2 + $0x1] sm:$0xff] %vm301_vm5, %v290_v12  ;;  %v1042_v11 = vmul.f32 %v1041_v56, %v3771_v30  ;;  %v1047_v30 = vadd.f32 %v1043_v61, %v1037_v63 }
 0x143   :  { %v1046_v24 = vadd.f32 %v1042_v11, %v1036_v2  ;;  %v453_v11 = vstv %s3411_s12  ;;  %v479_v2 = vstv %s3412_s13  ;;  %s3457_s12 = sld [smem:[#allocation4 + $0x20]] }
 0x144   :  { %v296_v13 = vpop.permute.xlu1 %295  ;;  %v294_v15 = vpop.permute.xlu0 %293  ;;  %s3466_s13 = sld [smem:[#allocation9 + $0x20]] }
 0x145   :  { %305 = vst.msk [vmem:[#allocation2 + $0x21] sm:$0xff] %vm301_vm5, %v296_v13  ;;  %304 = vst.msk [vmem:[#allocation2 + $0x19] sm:$0xff] %vm301_vm5, %v294_v15  ;;  %v1013_v13 = vadd.f32 %v3933_v5, %v987_v58  ;;  %v1012_v15 = vadd.f32 %v3935_v6, %v986_v59 }
 0x147   :  { %v1039_v28 = vadd.f32 %v3941_v9, %v1013_v13  ;;  %v1038_v23 = vadd.f32 %v3943_v10, %v1012_v15 }
 0x148   :  { %v3955_v40 = vld [vmem:[#allocation2 + $0x9] sm:$0xff]  ;;  %v3959_v3 = vld [vmem:[#allocation2] sm:$0xff] }
 0x149   :  { %v3957_v41 = vld [vmem:[#allocation2 + $0xa] sm:$0xff]  ;;  %v3965_v14 = vld [vmem:[#allocation2 + $0x1] sm:$0xff]  ;;  %v1049_v7 = vadd.f32 %v1045_v17, %v1039_v28  ;;  %v1048_v27 = vadd.f32 %v1044_v21, %v1038_v23  ;;  %v322_v39 = vmul.f32 %v321_v38, %v3959_v3  ;;  %v415_v58 = vmul.f32 %v413_v60, %v3955_v40 }
 0x14a   :  { %5620 = vst [vmem:[#allocation14_spill] sm:$0xff] %v3957_v41  ;;  %v3963_v43 = vld [vmem:[#allocation2 + $0x8] sm:$0xff]  ;;  %v414_v59 = vmul.f32 %v413_v60, %v3965_v14  ;;  %v481_v17 = vmul.f32 %v479_v2, %v3957_v41  ;;  %v731_v23 = vstv %s3424_s14  ;;  %s3468_s14 = sld [smem:[#allocation9 + $0x22]] }
 0x14b   :  { %v3967_v16 = vld [vmem:[#allocation2 + $0x2] sm:$0xff]  ;;  %v323_v1 = vmul.f32 %v321_v38, %v3963_v43 }
 0x14c   :  { %5621 = vst [vmem:[#allocation15_spill] sm:$0xff] %v3967_v16  ;;  %v3971_v50 = vld [vmem:[#allocation2 + $0x21] sm:$0xff]  ;;  %v3975_v20 = vld [vmem:[#allocation2 + $0x18] sm:$0xff]  ;;  %v454_v13 = vmul.f32 %v453_v11, %v3967_v16 }
 0x14d   :  { %v3973_v19 = vld [vmem:[#allocation2 + $0x22] sm:$0xff]  ;;  %v3979_v52 = vld [vmem:[#allocation2 + $0x19] sm:$0xff]  ;;  %v324_v42 = vmul.f32 %v321_v38, %v3975_v20  ;;  %v391_v56 = vmul.f32 %v387_v49, %v3971_v50  ;;  %v417_v61 = vmul.f32 %v413_v60, %v3971_v50 }
 0x14e   :  { %5622 = vst [vmem:[#allocation16_spill] sm:$0xff] %v3973_v19  ;;  %v3977_v51 = vld [vmem:[#allocation2 + $0x20] sm:$0xff]  ;;  %v390_v57 = vmul.f32 %v387_v49, %v3979_v52  ;;  %v457_v15 = vmul.f32 %v453_v11, %v3973_v19  ;;  %v483_v21 = vmul.f32 %v479_v2, %v3973_v19 }
 0x14f   :  { %v3981_v53 = vld [vmem:[#allocation2 + $0x1a] sm:$0xff]  ;;  %v325_v0 = vmul.f32 %v321_v38, %v3977_v51 }
 0x150   :  { %5623 = vst [vmem:[#allocation17_spill] sm:$0xff] %v3981_v53  ;;  %v456_v63 = vmul.f32 %v453_v11, %v3981_v53 }
 0x170   :  { %v703_v44 = vpop.permute.xlu1 %702  ;;  %v701_v45 = vpop.permute.xlu0 %700 }
 0x171   :  { %713 = vst.msk [vmem:[#allocation2 + $0x9] sm:$0xff] %vm301_vm5, %v703_v44  ;;  %712 = vst.msk [vmem:[#allocation2 + $0x1] sm:$0xff] %vm301_vm5, %v701_v45  ;;  %v347_v44 = vstv %s3406_s3  ;;  %s3458_s3 = sld [smem:[#allocation4 + $0x21]] }
 0x172   :  { %v349_v45 = vmul.f32 %v347_v44, %v3963_v43  ;;  %v348_v46 = vmul.f32 %v347_v44, %v3959_v3  ;;  %v351_v47 = vmul.f32 %v347_v44, %v3977_v51  ;;  %v350_v48 = vmul.f32 %v347_v44, %v3975_v20 }
 0x174   :  { %v707_v54 = vpop.permute.xlu1 %706  ;;  %v705_v55 = vpop.permute.xlu0 %704 }
 0x175   :  { %715 = vst.msk [vmem:[#allocation2 + $0x21] sm:$0xff] %vm301_vm5, %v707_v54  ;;  %714 = vst.msk [vmem:[#allocation2 + $0x19] sm:$0xff] %vm301_vm5, %v705_v55  ;;  %v389_v54 = vmul.f32 %v387_v49, %v3955_v40  ;;  %v388_v55 = vmul.f32 %v387_v49, %v3965_v14 }
 0x178   :  { %v1063_v62 = vpop.permute.xlu1 %1062  ;;  %v1061_v12 = vpop.permute.xlu0 %1060  ;;  %v4047_v28 = vld [vmem:[#allocation2 + $0x8] sm:$0xff] }
 0x179   :  { %v1073_v25 = vadd.f32 %v1063_v62, %v1047_v30  ;;  %v1072_v5 = vadd.f32 %v1061_v12, %v1046_v24  ;;  %v416_v62 = vmul.f32 %v413_v60, %v3979_v52  ;;  %v455_v12 = vmul.f32 %v453_v11, %v3957_v41  ;;  %5624 = vst [vmem:[#allocation18_spill] sm:$0xff] %v4047_v28  ;;  %v4049_v30 = vld [vmem:[#allocation2] sm:$0xff] }
 0x17a   :  { %5625 = vst [vmem:[#allocation19_spill] sm:$0xff] %v4049_v30  ;;  %v733_v24 = vmul.f32 %v731_v23, %v4047_v28  ;;  %v889_v60 = vstv %s3431_s21  ;;  %s3476_s21 = sld [smem:[#allocation4 + $0x29]] }
 0x17c   :  { %v1067_v18 = vpop.permute.xlu1 %1066  ;;  %v1065_v22 = vpop.permute.xlu0 %1064 }
 0x17d   :  { %v1075_v33 = vadd.f32 %v1067_v18, %v1049_v7  ;;  %v1074_v31 = vadd.f32 %v1065_v22, %v1048_v27  ;;  %v480_v18 = vmul.f32 %v479_v2, %v3967_v16  ;;  %v482_v22 = vmul.f32 %v479_v2, %v3981_v53 }
 0x17e   :  { %v757_v27 = vstv %s3425_s16  ;;  %s3469_s16 = sld [smem:[#allocation9 + $0x23]] }
 0x180   :  { %v1089_v26 = vpop.permute.xlu1 %1088  ;;  %v1087_v6 = vpop.permute.xlu0 %1086 }
 0x181   :  { %v1099_v8 = vadd.f32 %v1089_v26, %v1073_v25  ;;  %v1098_v29 = vadd.f32 %v1087_v6, %v1072_v5  ;;  %v732_v25 = vmul.f32 %v731_v23, %v4049_v30  ;;  %v4055_v5 = vld [vmem:[#allocation2 + $0x20] sm:$0xff]  ;;  %v4057_v26 = vld [vmem:[#allocation2 + $0x18] sm:$0xff] }
 0x182   :  { %5626 = vst [vmem:[#allocation20_spill] sm:$0xff] %v4055_v5  ;;  %5627 = vst [vmem:[#allocation21_spill] sm:$0xff] %v4057_v26  ;;  %v735_v6 = vmul.f32 %v731_v23, %v4055_v5  ;;  %v734_v7 = vmul.f32 %v731_v23, %v4057_v26 }
 0x183   :  { %v1103_v32 = vmax.f32 %v1099_v8, 0.0  ;;  %v1102_v34 = vmax.f32 %v1098_v29, 0.0  ;;  %v759_v8 = vmul.f32 %v757_v27, %v4047_v28  ;;  %v758_v29 = vmul.f32 %v757_v27, %v4049_v30 }
 0x184   :  { %v1093_v35 = vpop.permute.xlu1 %1092  ;;  %v1091_v36 = vpop.permute.xlu0 %1090 }
 0x185   :  { %v1101_v9 = vadd.f32 %v1093_v35, %v1075_v33  ;;  %v1100_v37 = vadd.f32 %v1091_v36, %v1074_v31  ;;  %1112 = vrot.lane.b32.xlu1 %v1103_v32, %s3650_s25  ;;  %1110 = vrot.lane.b32.xlu0 %v1102_v34, %s3650_s25  ;;  %v761_v33 = vmul.f32 %v757_v27, %v4055_v5  ;;  %v4071_v32 = vld [vmem:[#allocation2 + $0x9] sm:$0xff]  ;;  %v797_v34 = vstv %s3427_s18  ;;  %v4073_v35 = vld [vmem:[#allocation2 + $0x1] sm:$0xff]  ;;  %s3472_s18 = sld [smem:[#allocation4 + $0x25]] }
 0x186   :  { %v760_v31 = vmul.f32 %v757_v27, %v4057_v26  ;;  %5628 = vst [vmem:[#allocation22_spill] sm:$0xff] %v4071_v32  ;;  %5629 = vst [vmem:[#allocation23_spill] sm:$0xff] %v4073_v35  ;;  %v799_v36 = vmul.f32 %v797_v34, %v4071_v32  ;;  %v1327_v26 = vstv %s3452_s7  ;;  %s3488_s7 = sld [smem:[#allocation9 + $0x2c]] }
 0x187   :  { %v1105_v10 = vmax.f32 %v1101_v9, 0.0  ;;  %v1104_v4 = vmax.f32 %v1100_v37, 0.0  ;;  %v798_v9 = vmul.f32 %v797_v34, %v4073_v35  ;;  %v4079_v37 = vld [vmem:[#allocation2 + $0x21] sm:$0xff] }
 0x188   :  { %5630 = vst [vmem:[#allocation24_spill] sm:$0xff] %v4079_v37 }
 0x189   :  { %1116 = vrot.lane.b32.xlu1 %v1105_v10, %s3650_s25  ;;  %1114 = vrot.lane.b32.xlu0 %v1104_v4, %s3650_s25  ;;  %v4081_v10 = vld [vmem:[#allocation2 + $0x19] sm:$0xff]  ;;  %v801_v4 = vmul.f32 %v797_v34, %v4079_v37 }
 0x18a   :  { %5631 = vst [vmem:[#allocation25_spill] sm:$0xff] %v4081_v10  ;;  %v800_v38 = vmul.f32 %v797_v34, %v4081_v10 }
 0x18d   :  { %332 = vrot.lane.b32.xlu1 %v323_v1, %s3647_s15  ;;  %330 = vrot.lane.b32.xlu0 %v322_v39, %s3647_s15  ;;  %v823_v1 = vstv %s3428_s19  ;;  %s3473_s19 = sld [smem:[#allocation4 + $0x26]] }
 0x18e   :  { %v825_v39 = vmul.f32 %v823_v1, %v4071_v32  ;;  %v826_v44 = vmul.f32 %v823_v1, %v4081_v10 }
 0x191   :  { %336 = vrot.lane.b32.xlu1 %v325_v0, %s3647_s15  ;;  %334 = vrot.lane.b32.xlu0 %v324_v42, %s3647_s15  ;;  %v824_v0 = vmul.f32 %v823_v1, %v4073_v35  ;;  %v827_v42 = vmul.f32 %v823_v1, %v4079_v37  ;;  %v1425_v37 = vstv %s3457_s12  ;;  %s3465_s12 = sld [smem:[#allocation9 + $0x1f]] }
 0x195   :  { %358 = vrot.lane.b32.xlu1 %v349_v45, %s3648_s17  ;;  %356 = vrot.lane.b32.xlu0 %v348_v46, %s3648_s17  ;;  %v4095_v45 = vld [vmem:[#allocation2 + $0x2] sm:$0xff]  ;;  %v4097_v46 = vld [vmem:[#allocation2 + $0xa] sm:$0xff] }
 0x196   :  { %5632 = vst [vmem:[#allocation26_spill] sm:$0xff] %v4095_v45  ;;  %5633 = vst [vmem:[#allocation27_spill] sm:$0xff] %v4097_v46 }
 0x199   :  { %362 = vrot.lane.b32.xlu1 %v351_v47, %s3648_s17  ;;  %360 = vrot.lane.b32.xlu0 %v350_v48, %s3648_s17  ;;  %v863_v47 = vstv %s3430_s20  ;;  %s3475_s20 = sld [smem:[#allocation4 + $0x28]] }
 0x19a   :  { %v865_v48 = vmul.f32 %v863_v47, %v4097_v46  ;;  %v864_v49 = vmul.f32 %v863_v47, %v4095_v45 }
 0x19d   :  { %398 = vrot.lane.b32.xlu1 %v389_v54, %s3647_s15  ;;  %396 = vrot.lane.b32.xlu0 %v388_v55, %s3647_s15  ;;  %v4103_v54 = vld [vmem:[#allocation2 + $0x1a] sm:$0xff]  ;;  %v4105_v55 = vld [vmem:[#allocation2 + $0x22] sm:$0xff] }
 0x19e   :  { %5634 = vst [vmem:[#allocation28_spill] sm:$0xff] %v4103_v54  ;;  %5635 = vst [vmem:[#allocation29_spill] sm:$0xff] %v4105_v55 }
 0x1a1   :  { %402 = vrot.lane.b32.xlu1 %v391_v56, %s3647_s15  ;;  %400 = vrot.lane.b32.xlu0 %v390_v57, %s3647_s15  ;;  %v867_v56 = vmul.f32 %v863_v47, %v4105_v55  ;;  %v866_v57 = vmul.f32 %v863_v47, %v4103_v54 }
 0x1a5   :  { %424 = vrot.lane.b32.xlu1 %v415_v58, %s3648_s17  ;;  %422 = vrot.lane.b32.xlu0 %v414_v59, %s3648_s17  ;;  %v891_v58 = vmul.f32 %v889_v60, %v4097_v46  ;;  %v890_v59 = vmul.f32 %v889_v60, %v4095_v45  ;;  %v4320_v46 = vld [vmem:[%s5552_s0 + $0x19] sm:$0xff] }
 0x1a6   :  { %v1428_v32 = vmul.f32 %v4320_v46, %v1425_v37 }
 0x1a9   :  { %428 = vrot.lane.b32.xlu1 %v417_v61, %s3648_s17  ;;  %426 = vrot.lane.b32.xlu0 %v416_v62, %s3648_s17  ;;  %v893_v61 = vmul.f32 %v889_v60, %v4105_v55  ;;  %v892_v62 = vmul.f32 %v889_v60, %v4103_v54  ;;  %v1399_v55 = vstv %s3456_s11  ;;  %s3463_s11 = sld [smem:[#allocation9 + $0x1d]] }
 0x1aa   :  { %v1402_v10 = vmul.f32 %v4320_v46, %v1399_v55 }
 0x1ad   :  { %464 = vrot.lane.b32.xlu1 %v455_v12, %s3647_s15  ;;  %462 = vrot.lane.b32.xlu0 %v454_v13, %s3647_s15 }
 0x1b1   :  { %468 = vrot.lane.b32.xlu1 %v457_v15, %s3647_s15  ;;  %466 = vrot.lane.b32.xlu0 %v456_v63, %s3647_s15  ;;  %v1141_v63 = vstv %s3443_s22  ;;  %s3478_s22 = sld [smem:[#allocation4 + $0x2b]] }
 0x1b5   :  { %490 = vrot.lane.b32.xlu1 %v481_v17, %s3648_s17  ;;  %488 = vrot.lane.b32.xlu0 %v480_v18, %s3648_s17 }
 0x1b9   :  { %494 = vrot.lane.b32.xlu1 %v483_v21, %s3648_s17  ;;  %492 = vrot.lane.b32.xlu0 %v482_v22, %s3648_s17 }
 0x1bd   :  { %742 = vrot.lane.b32.xlu1 %v733_v24, %s3647_s15  ;;  %740 = vrot.lane.b32.xlu0 %v732_v25, %s3647_s15 }
 0x1c1   :  { %746 = vrot.lane.b32.xlu1 %v735_v6, %s3647_s15  ;;  %744 = vrot.lane.b32.xlu0 %v734_v7, %s3647_s15 }
 0x1c5   :  { %768 = vrot.lane.b32.xlu1 %v759_v8, %s3648_s17  ;;  %766 = vrot.lane.b32.xlu0 %v758_v29, %s3648_s17  ;;  %v1167_v29 = vstv %s3444_s23  ;;  %s3459_s23 = sld [smem:[#allocation4 + $0x22]] }
 0x1c9   :  { %772 = vrot.lane.b32.xlu1 %v761_v33, %s3648_s17  ;;  %770 = vrot.lane.b32.xlu0 %v760_v31, %s3648_s17 }
 0x1cd   :  { %808 = vrot.lane.b32.xlu1 %v799_v36, %s3647_s15  ;;  %806 = vrot.lane.b32.xlu0 %v798_v9, %s3647_s15 }
 0x1d1   :  { %812 = vrot.lane.b32.xlu1 %v801_v4, %s3647_s15  ;;  %810 = vrot.lane.b32.xlu0 %v800_v38, %s3647_s15 }
 0x1d5   :  { %834 = vrot.lane.b32.xlu1 %v825_v39, %s3648_s17  ;;  %832 = vrot.lane.b32.xlu0 %v824_v0, %s3648_s17  ;;  %v1207_v0 = vstv %s3446_s24  ;;  %s3460_s24 = sld [smem:[#allocation4 + $0x23]] }
 0x1d9   :  { %838 = vrot.lane.b32.xlu1 %v827_v42, %s3648_s17  ;;  %836 = vrot.lane.b32.xlu0 %v826_v44, %s3648_s17 }
 0x1dd   :  { %874 = vrot.lane.b32.xlu1 %v865_v48, %s3647_s15  ;;  %872 = vrot.lane.b32.xlu0 %v864_v49, %s3647_s15 }
 0x1e1   :  { %878 = vrot.lane.b32.xlu1 %v867_v56, %s3647_s15  ;;  %876 = vrot.lane.b32.xlu0 %v866_v57, %s3647_s15 }
 0x1e5   :  { %900 = vrot.lane.b32.xlu1 %v891_v58, %s3648_s17  ;;  %898 = vrot.lane.b32.xlu0 %v890_v59, %s3648_s17 }
 0x1e9   :  { %904 = vrot.lane.b32.xlu1 %v893_v61, %s3648_s17  ;;  %902 = vrot.lane.b32.xlu0 %v892_v62, %s3648_s17  ;;  %v1233_v62 = vstv %s3447_s26  ;;  %s3470_s26 = sld [smem:[#allocation7 + $0x4]] }
 0x1f7   :  { %v1113_v11 = vpop.permute.xlu1 %1112  ;;  %v1111_v12 = vpop.permute.xlu0 %1110 }
 0x1f8   :  { %1123 = vst.msk [vmem:[#allocation2 + $0x9] sm:$0xff] %vm301_vm5, %v1113_v11  ;;  %1122 = vst.msk [vmem:[#allocation2 + $0x1] sm:$0xff] %vm301_vm5, %v1111_v12 }
 0x1fb   :  { %v1117_v13 = vpop.permute.xlu1 %1116  ;;  %v1115_v15 = vpop.permute.xlu0 %1114 }
 0x1fc   :  { %1125 = vst.msk [vmem:[#allocation2 + $0x21] sm:$0xff] %vm301_vm5, %v1117_v13  ;;  %1124 = vst.msk [vmem:[#allocation2 + $0x19] sm:$0xff] %vm301_vm5, %v1115_v15 }
 0x1ff   :  { %v4125_v2 = vpop.permute.xlu1 %332  ;;  %v4127_v17 = vpop.permute.xlu0 %330  ;;  %v4129_v18 = vld [vmem:[#allocation2 + $0x8] sm:$0xff]  ;;  %v4131_v21 = vld [vmem:[#allocation2] sm:$0xff] }
 0x200   :  { %5636 = vst [vmem:[#allocation30_spill] sm:$0xff] %v4129_v18  ;;  %5637 = vst [vmem:[#allocation31_spill] sm:$0xff] %v4131_v21  ;;  %v1143_v22 = vmul.f32 %v1141_v63, %v4129_v18  ;;  %v1142_v23 = vmul.f32 %v1141_v63, %v4131_v21  ;;  %v1169_v34 = vmul.f32 %v1167_v29, %v4129_v18  ;;  %v4163_v39 = vld [vmem:[#allocation2 + $0x9] sm:$0xff]  ;;  %v4165_v42 = vld [vmem:[#allocation2 + $0x1] sm:$0xff] }
 0x201   :  { %v1168_v36 = vmul.f32 %v1167_v29, %v4131_v21  ;;  %5640 = vst [vmem:[#allocation34_spill] sm:$0xff] %v4163_v39  ;;  %5641 = vst [vmem:[#allocation35_spill] sm:$0xff] %v4165_v42  ;;  %v1209_v48 = vmul.f32 %v1207_v0, %v4163_v39  ;;  %v1208_v49 = vmul.f32 %v1207_v0, %v4165_v42 }
 0x202   :  { %1152 = vrot.lane.b32.xlu1 %v1143_v22, %s3647_s15  ;;  %1150 = vrot.lane.b32.xlu0 %v1142_v23, %s3647_s15  ;;  %v1235_v13 = vmul.f32 %v1233_v62, %v4163_v39  ;;  %v1234_v15 = vmul.f32 %v1233_v62, %v4165_v42  ;;  %v1363_v39 = vstv %s3454_s28  ;;  %s3482_s28 = sld [smem:[#allocation9 + $0x26]] }
 0x203   :  { %v4137_v24 = vpop.permute.xlu1 %336  ;;  %v4139_v25 = vpop.permute.xlu0 %334  ;;  %v4141_v6 = vld [vmem:[#allocation2 + $0x20] sm:$0xff]  ;;  %v4143_v7 = vld [vmem:[#allocation2 + $0x18] sm:$0xff] }
 0x204   :  { %5638 = vst [vmem:[#allocation32_spill] sm:$0xff] %v4141_v6  ;;  %5639 = vst [vmem:[#allocation33_spill] sm:$0xff] %v4143_v7  ;;  %v1145_v27 = vmul.f32 %v1141_v63, %v4141_v6  ;;  %v1144_v8 = vmul.f32 %v1141_v63, %v4143_v7  ;;  %v1171_v38 = vmul.f32 %v1167_v29, %v4141_v6  ;;  %v4175_v56 = vld [vmem:[#allocation2 + $0x21] sm:$0xff]  ;;  %v4177_v57 = vld [vmem:[#allocation2 + $0x19] sm:$0xff] }
 0x205   :  { %v1170_v1 = vmul.f32 %v1167_v29, %v4143_v7  ;;  %5644 = vst [vmem:[#allocation38_spill] sm:$0xff] %v4175_v56  ;;  %5645 = vst [vmem:[#allocation39_spill] sm:$0xff] %v4177_v57  ;;  %v1211_v59 = vmul.f32 %v1207_v0, %v4175_v56  ;;  %v1210_v61 = vmul.f32 %v1207_v0, %v4177_v57  ;;  %v1273_v29 = vstv %s3449_s2  ;;  %s3474_s2 = sld [smem:[#allocation4 + $0x27]] }
 0x206   :  { %1156 = vrot.lane.b32.xlu1 %v1145_v27, %s3647_s15  ;;  %1154 = vrot.lane.b32.xlu0 %v1144_v8, %s3647_s15  ;;  %v1237_v23 = vmul.f32 %v1233_v62, %v4175_v56  ;;  %v1236_v27 = vmul.f32 %v1233_v62, %v4177_v57  ;;  %v4203_v8 = vld [vmem:[#allocation2 + $0xa] sm:$0xff]  ;;  %v1337_v56 = vstv %s3453_s27  ;;  %s3481_s27 = sld [smem:[#allocation9 + $0x25]] }
 0x207   :  { %v4149_v33 = vpop.permute.xlu1 %358  ;;  %v4151_v31 = vpop.permute.xlu0 %356  ;;  %5652 = vst [vmem:[#allocation46_spill] sm:$0xff] %v4203_v8 }
 0x20a   :  { %1178 = vrot.lane.b32.xlu1 %v1169_v34, %s3648_s17  ;;  %1176 = vrot.lane.b32.xlu0 %v1168_v36, %s3648_s17  ;;  %v4205_v34 = vld [vmem:[#allocation2 + $0x2] sm:$0xff] }
 0x20b   :  { %v4157_v9 = vpop.permute.xlu1 %362  ;;  %v4159_v4 = vpop.permute.xlu0 %360  ;;  %5653 = vst [vmem:[#allocation47_spill] sm:$0xff] %v4205_v34  ;;  %v1274_v0 = vmul.f32 %v1273_v29, %v4205_v34 }
 0x20e   :  { %1182 = vrot.lane.b32.xlu1 %v1171_v38, %s3648_s17  ;;  %1180 = vrot.lane.b32.xlu0 %v1170_v1, %s3648_s17  ;;  %v1275_v1 = vmul.f32 %v1273_v29, %v4203_v8 }
 0x20f   :  { %v4169_v44 = vpop.permute.xlu1 %398  ;;  %v4171_v47 = vpop.permute.xlu0 %396 }
 0x210   :  { %5642 = vst [vmem:[#allocation36_spill] sm:$0xff] %v4169_v44  ;;  %5643 = vst [vmem:[#allocation37_spill] sm:$0xff] %v4171_v47 }
 0x212   :  { %1218 = vrot.lane.b32.xlu1 %v1209_v48, %s3647_s15  ;;  %1216 = vrot.lane.b32.xlu0 %v1208_v49, %s3647_s15  ;;  %v4215_v48 = vld [vmem:[#allocation2 + $0x22] sm:$0xff]  ;;  %v4217_v49 = vld [vmem:[#allocation2 + $0x1a] sm:$0xff] }
 0x213   :  { %v4181_v60 = vpop.permute.xlu1 %402  ;;  %v4183_v58 = vpop.permute.xlu0 %400  ;;  %5656 = vst [vmem:[#allocation50_spill] sm:$0xff] %v4215_v48  ;;  %5657 = vst [vmem:[#allocation51_spill] sm:$0xff] %v4217_v49  ;;  %v1277_v62 = vmul.f32 %v1273_v29, %v4215_v48 }
 0x214   :  { %5646 = vst [vmem:[#allocation40_spill] sm:$0xff] %v4181_v60  ;;  %5647 = vst [vmem:[#allocation41_spill] sm:$0xff] %v4183_v58 }
 0x216   :  { %1222 = vrot.lane.b32.xlu1 %v1211_v59, %s3647_s15  ;;  %1220 = vrot.lane.b32.xlu0 %v1210_v61, %s3647_s15 }
 0x217   :  { %v4189_v11 = vpop.permute.xlu1 %424  ;;  %v4191_v12 = vpop.permute.xlu0 %422 }
 0x218   :  { %5648 = vst [vmem:[#allocation42_spill] sm:$0xff] %v4189_v11  ;;  %5649 = vst [vmem:[#allocation43_spill] sm:$0xff] %v4191_v12 }
 0x21a   :  { %1244 = vrot.lane.b32.xlu1 %v1235_v13, %s3648_s17  ;;  %1242 = vrot.lane.b32.xlu0 %v1234_v15, %s3648_s17  ;;  %v1276_v13 = vmul.f32 %v1273_v29, %v4217_v49  ;;  %v1299_v15 = vstv %s3450_s1  ;;  %s3477_s1 = sld [smem:[#allocation4 + $0x2a]] }
 0x21b   :  { %v4197_v63 = vpop.permute.xlu1 %428  ;;  %v4199_v22 = vpop.permute.xlu0 %426 }
 0x21c   :  { %5650 = vst [vmem:[#allocation44_spill] sm:$0xff] %v4197_v63  ;;  %5651 = vst [vmem:[#allocation45_spill] sm:$0xff] %v4199_v22 }
 0x21e   :  { %1248 = vrot.lane.b32.xlu1 %v1237_v23, %s3648_s17  ;;  %1246 = vrot.lane.b32.xlu0 %v1236_v27, %s3648_s17 }
 0x21f   :  { %v4209_v36 = vpop.permute.xlu1 %464  ;;  %v4211_v38 = vpop.permute.xlu0 %462 }
 0x220   :  { %5654 = vst [vmem:[#allocation48_spill] sm:$0xff] %v4209_v36  ;;  %5655 = vst [vmem:[#allocation49_spill] sm:$0xff] %v4211_v38 }
 0x222   :  { %1284 = vrot.lane.b32.xlu1 %v1275_v1, %s3647_s15  ;;  %1282 = vrot.lane.b32.xlu0 %v1274_v0, %s3647_s15  ;;  %v1301_v1 = vmul.f32 %v1299_v15, %v4203_v8  ;;  %v1300_v0 = vmul.f32 %v1299_v15, %v4205_v34  ;;  %v4254_v34 = vld [vmem:[%s5552_s0] sm:$0xff] }
 0x223   :  { %v4221_v59 = vpop.permute.xlu1 %468  ;;  %v4223_v61 = vpop.permute.xlu0 %466  ;;  %v1364_v6 = vmul.f32 %v4254_v34, %v1363_v39 }
 0x224   :  { %5658 = vst [vmem:[#allocation52_spill] sm:$0xff] %v4221_v59  ;;  %5659 = vst [vmem:[#allocation53_spill] sm:$0xff] %v4223_v61  ;;  %v1389_v61 = vstv %s3455_s9  ;;  %s3492_s9 = sld [smem:[#allocation4 + $0x2f]] }
 0x225   :  { %v1392_v11 = vmul.f32 %v4320_v46, %v1389_v61 }
 0x226   :  { %1288 = vrot.lane.b32.xlu1 %v1277_v62, %s3647_s15  ;;  %1286 = vrot.lane.b32.xlu0 %v1276_v13, %s3647_s15  ;;  %v1303_v62 = vmul.f32 %v1299_v15, %v4215_v48  ;;  %v1302_v13 = vmul.f32 %v1299_v15, %v4217_v49  ;;  %v1338_v48 = vmul.f32 %v4254_v34, %v1337_v56  ;;  %v4272_v49 = vld [vmem:[%s5552_s0 + $0x18] sm:$0xff] }
 0x227   :  { %v4229_v23 = vpop.permute.xlu1 %490  ;;  %v4231_v27 = vpop.permute.xlu0 %488  ;;  %v1340_v42 = vmul.f32 %v4272_v49, %v1337_v56  ;;  %v1366_v54 = vmul.f32 %v4272_v49, %v1363_v39 }
 0x228   :  { %5660 = vst [vmem:[#allocation54_spill] sm:$0xff] %v4229_v23  ;;  %5661 = vst [vmem:[#allocation55_spill] sm:$0xff] %v4231_v27 }
 0x22a   :  { %1310 = vrot.lane.b32.xlu1 %v1301_v1, %s3648_s17  ;;  %1308 = vrot.lane.b32.xlu0 %v1300_v0, %s3648_s17  ;;  %v4248_v1 = vld [vmem:[%s5552_s0 + $0x8] sm:$0xff] }
 0x22b   :  { %v4237_v57 = vpop.permute.xlu1 %494  ;;  %v4239_v29 = vpop.permute.xlu0 %492  ;;  %v1339_v0 = vmul.f32 %v4248_v1, %v1337_v56 }
 0x22c   :  { %5662 = vst [vmem:[#allocation56_spill] sm:$0xff] %v4237_v57  ;;  %5663 = vst [vmem:[#allocation57_spill] sm:$0xff] %v4239_v29  ;;  %v1330_v57 = vmul.f32 %v4272_v49, %v1327_v26 }
 0x22e   :  { %1314 = vrot.lane.b32.xlu1 %v1303_v62, %s3648_s17  ;;  %1312 = vrot.lane.b32.xlu0 %v1302_v13, %s3648_s17  ;;  %v4266_v62 = vld [vmem:[%s5552_s0 + $0x20] sm:$0xff] }
 0x22f   :  { %v4257_v8 = vpop.permute.xlu1 %742  ;;  %v4259_v15 = vpop.permute.xlu0 %740  ;;  %v1341_v13 = vmul.f32 %v4266_v62, %v1337_v56  ;;  %v1367_v56 = vmul.f32 %v4266_v62, %v1363_v39  ;;  %v1331_v28 = vmul.f32 %v4266_v62, %v1327_v26 }
 0x230   :  { %5664 = vst [vmem:[#allocation58_spill] sm:$0xff] %v4257_v8  ;;  %5665 = vst [vmem:[#allocation59_spill] sm:$0xff] %v4259_v15 }
 0x232   :  { %1348 = vrot.lane.b32.xlu1 %v1339_v0, %s3647_s15  ;;  %1346 = vrot.lane.b32.xlu0 %v1338_v48, %s3647_s15  ;;  %v1365_v48 = vmul.f32 %v4248_v1, %v1363_v39 }
 0x233   :  { %v4275_v7 = vpop.permute.xlu1 %746  ;;  %v4277_v0 = vpop.permute.xlu0 %744 }
 0x234   :  { %5666 = vst [vmem:[#allocation60_spill] sm:$0xff] %v4275_v7  ;;  %5667 = vst [vmem:[#allocation61_spill] sm:$0xff] %v4277_v0 }
 0x236   :  { %1352 = vrot.lane.b32.xlu1 %v1341_v13, %s3647_s15  ;;  %1350 = vrot.lane.b32.xlu0 %v1340_v42, %s3647_s15  ;;  %v4296_v42 = vld [vmem:[%s5552_s0 + $0x9] sm:$0xff] }
 0x237   :  { %v4283_v21 = vpop.permute.xlu1 %768  ;;  %v4285_v18 = vpop.permute.xlu0 %766  ;;  %v1401_v13 = vmul.f32 %v4296_v42, %v1399_v55  ;;  %v1391_v63 = vmul.f32 %v4296_v42, %v1389_v61 }
 0x238   :  { %5668 = vst [vmem:[#allocation62_spill] sm:$0xff] %v4283_v21  ;;  %5669 = vst [vmem:[#allocation63_spill] sm:$0xff] %v4285_v18  ;;  %v1487_v18 = vstv %s3460_s24  ;;  %s3471_s24 = sld [smem:[#allocation4 + $0x24]] }
 0x23a   :  { %1374 = vrot.lane.b32.xlu1 %v1365_v48, %s3648_s17  ;;  %1372 = vrot.lane.b32.xlu0 %v1364_v6, %s3648_s17  ;;  %v4302_v6 = vld [vmem:[%s5552_s0 + $0x1] sm:$0xff] }
 0x23b   :  { %v1400_v39 = vmul.f32 %v4302_v6, %v1399_v55  ;;  %v4305_v48 = vpop.permute.xlu1 %772  ;;  %v4307_v45 = vpop.permute.xlu0 %770  ;;  %v1426_v35 = vmul.f32 %v4302_v6, %v1425_v37 }
 0x23c   :  { %5670 = vst [vmem:[#allocation64_spill] sm:$0xff] %v4305_v48  ;;  %5671 = vst [vmem:[#allocation65_spill] sm:$0xff] %v4307_v45  ;;  %v1461_v48 = vstv %s3459_s23  ;;  %s3479_s23 = sld [smem:[#allocation4 + $0x2c]] }
 0x23e   :  { %1378 = vrot.lane.b32.xlu1 %v1367_v56, %s3648_s17  ;;  %1376 = vrot.lane.b32.xlu0 %v1366_v54, %s3648_s17  ;;  %v4314_v54 = vld [vmem:[%s5552_s0 + $0x21] sm:$0xff] }
 0x23f   :  { %v1403_v56 = vmul.f32 %v4314_v54, %v1399_v55  ;;  %v4323_v45 = vpop.permute.xlu1 %808  ;;  %v1429_v55 = vmul.f32 %v4314_v54, %v1425_v37 }
 0x240   :  { %5672 = vst [vmem:[#allocation66_spill] sm:$0xff] %v4323_v45 }
 0x242   :  { %1410 = vrot.lane.b32.xlu1 %v1401_v13, %s3647_s15  ;;  %1408 = vrot.lane.b32.xlu0 %v1400_v39, %s3647_s15  ;;  %v4325_v13 = vpop.permute.xlu0 %806  ;;  %v1427_v39 = vmul.f32 %v4296_v42, %v1425_v37  ;;  %v4350_v37 = vld [vmem:[%s5552_s0 + $0x2] sm:$0xff] }
 0x243   :  { %5673 = vst [vmem:[#allocation67_spill] sm:$0xff] %v4325_v13  ;;  %v4335_v45 = vpop.permute.xlu1 %812 }
 0x244   :  { %5674 = vst [vmem:[#allocation68_spill] sm:$0xff] %v4335_v45  ;;  %v4368_v45 = vld [vmem:[%s5552_s0 + $0x1a] sm:$0xff] }
 0x246   :  { %1414 = vrot.lane.b32.xlu1 %v1403_v56, %s3647_s15  ;;  %1412 = vrot.lane.b32.xlu0 %v1402_v10, %s3647_s15  ;;  %v4337_v13 = vpop.permute.xlu0 %810  ;;  %v4344_v10 = vld [vmem:[%s5552_s0 + $0xa] sm:$0xff]  ;;  %v1462_v56 = vmul.f32 %v4350_v37, %v1461_v48 }
 0x247   :  { %5675 = vst [vmem:[#allocation69_spill] sm:$0xff] %v4337_v13 }
 0x24a   :  { %1436 = vrot.lane.b32.xlu1 %v1427_v39, %s3648_s17  ;;  %1434 = vrot.lane.b32.xlu0 %v1426_v35, %s3648_s17  ;;  %v1463_v35 = vmul.f32 %v4344_v10, %v1461_v48  ;;  %v4353_v39 = vpop.permute.xlu1 %834  ;;  %v4355_v13 = vpop.permute.xlu0 %832 }
 0x24b   :  { %5676 = vst [vmem:[#allocation70_spill] sm:$0xff] %v4353_v39  ;;  %5677 = vst [vmem:[#allocation71_spill] sm:$0xff] %v4355_v13  ;;  %v1464_v39 = vmul.f32 %v4368_v45, %v1461_v48 }
 0x24e   :  { %1440 = vrot.lane.b32.xlu1 %v1429_v55, %s3648_s17  ;;  %1438 = vrot.lane.b32.xlu0 %v1428_v32, %s3648_s17  ;;  %v4362_v32 = vld [vmem:[%s5552_s0 + $0x22] sm:$0xff]  ;;  %v4375_v13 = vpop.permute.xlu1 %838  ;;  %v4377_v21 = vpop.permute.xlu0 %836 }
 0x24f   :  { %v1465_v55 = vmul.f32 %v4362_v32, %v1461_v48  ;;  %5678 = vst [vmem:[#allocation72_spill] sm:$0xff] %v4375_v13  ;;  %5679 = vst [vmem:[#allocation73_spill] sm:$0xff] %v4377_v21  ;;  %v1491_v0 = vmul.f32 %v4362_v32, %v1487_v18  ;;  %v1490_v48 = vmul.f32 %v4368_v45, %v1487_v18 }
 0x252   :  { %1472 = vrot.lane.b32.xlu1 %v1463_v35, %s3647_s15  ;;  %1470 = vrot.lane.b32.xlu0 %v1462_v56, %s3647_s15  ;;  %v1489_v35 = vmul.f32 %v4344_v10, %v1487_v18  ;;  %v1488_v56 = vmul.f32 %v4350_v37, %v1487_v18  ;;  %v4383_v7 = vpop.permute.xlu1 %874 }
 0x253   :  { %5680 = vst [vmem:[#allocation74_spill] sm:$0xff] %v4383_v7 }
 0x256   :  { %1476 = vrot.lane.b32.xlu1 %v1465_v55, %s3647_s15  ;;  %1474 = vrot.lane.b32.xlu0 %v1464_v39, %s3647_s15  ;;  %v4385_v55 = vpop.permute.xlu0 %872  ;;  %v4389_v39 = vpop.permute.xlu1 %878 }
 0x257   :  { %5681 = vst [vmem:[#allocation75_spill] sm:$0xff] %v4385_v55  ;;  %5682 = vst [vmem:[#allocation76_spill] sm:$0xff] %v4389_v39 }
 0x25a   :  { %1498 = vrot.lane.b32.xlu1 %v1489_v35, %s3648_s17  ;;  %1496 = vrot.lane.b32.xlu0 %v1488_v56, %s3648_s17  ;;  %v4391_v13 = vpop.permute.xlu0 %876  ;;  %v4393_v21 = vpop.permute.xlu1 %900 }
 0x25b   :  { %5683 = vst [vmem:[#allocation77_spill] sm:$0xff] %v4391_v13  ;;  %5684 = vst [vmem:[#allocation78_spill] sm:$0xff] %v4393_v21 }
 0x25e   :  { %1502 = vrot.lane.b32.xlu1 %v1491_v0, %s3648_s17  ;;  %1500 = vrot.lane.b32.xlu0 %v1490_v48, %s3648_s17  ;;  %v4395_v35 = vpop.permute.xlu0 %898  ;;  %v4397_v56 = vpop.permute.xlu1 %904 }
 0x25f   :  { %5685 = vst [vmem:[#allocation79_spill] sm:$0xff] %v4395_v35  ;;  %5686 = vst [vmem:[#allocation80_spill] sm:$0xff] %v4397_v56 }
 0x262   :  { %v4399_v15 = vpop.permute.xlu0 %902 }
 0x263   :  { %5687 = vst [vmem:[#allocation81_spill] sm:$0xff] %v4399_v15 }
 0x274   :  { %v4401_v18 = vpop.permute.xlu1 %1152  ;;  %v4403_v7 = vpop.permute.xlu0 %1150 }
 0x275   :  { %5688 = vst [vmem:[#allocation82_spill] sm:$0xff] %v4401_v18  ;;  %5689 = vst [vmem:[#allocation83_spill] sm:$0xff] %v4403_v7 }
 0x278   :  { %v4405_v55 = vpop.permute.xlu1 %1156  ;;  %v4407_v0 = vpop.permute.xlu0 %1154 }
 0x279   :  { %5690 = vst [vmem:[#allocation84_spill] sm:$0xff] %v4405_v55  ;;  %5691 = vst [vmem:[#allocation85_spill] sm:$0xff] %v4407_v0 }
 0x27c   :  { %v4409_v48 = vpop.permute.xlu1 %1178  ;;  %v4411_v39 = vpop.permute.xlu0 %1176 }
 0x27d   :  { %5692 = vst [vmem:[#allocation86_spill] sm:$0xff] %v4409_v48  ;;  %5693 = vst [vmem:[#allocation87_spill] sm:$0xff] %v4411_v39 }
 0x280   :  { %v4413_v13 = vpop.permute.xlu1 %1182  ;;  %v4415_v21 = vpop.permute.xlu0 %1180 }
 0x281   :  { %5694 = vst [vmem:[#allocation88_spill] sm:$0xff] %v4413_v13  ;;  %5695 = vst [vmem:[#allocation89_spill] sm:$0xff] %v4415_v21 }
 0x284   :  { %v4417_v35 = vpop.permute.xlu1 %1218  ;;  %v4419_v56 = vpop.permute.xlu0 %1216 }
 0x285   :  { %5696 = vst [vmem:[#allocation90_spill] sm:$0xff] %v4417_v35  ;;  %5697 = vst [vmem:[#allocation91_spill] sm:$0xff] %v4419_v56 }
 0x288   :  { %v4421_v15 = vpop.permute.xlu1 %1222  ;;  %v4423_v18 = vpop.permute.xlu0 %1220 }
 0x289   :  { %5698 = vst [vmem:[#allocation92_spill] sm:$0xff] %v4421_v15  ;;  %5699 = vst [vmem:[#allocation93_spill] sm:$0xff] %v4423_v18 }
 0x28c   :  { %v4425_v7 = vpop.permute.xlu1 %1244  ;;  %v4427_v55 = vpop.permute.xlu0 %1242 }
 0x28d   :  { %5700 = vst [vmem:[#allocation94_spill] sm:$0xff] %v4425_v7  ;;  %5701 = vst [vmem:[#allocation95_spill] sm:$0xff] %v4427_v55 }
 0x290   :  { %v4429_v0 = vpop.permute.xlu1 %1248  ;;  %v4431_v48 = vpop.permute.xlu0 %1246 }
 0x291   :  { %5702 = vst [vmem:[#allocation96_spill] sm:$0xff] %v4429_v0  ;;  %5703 = vst [vmem:[#allocation97_spill] sm:$0xff] %v4431_v48 }
 0x294   :  { %v4433_v39 = vpop.permute.xlu1 %1284  ;;  %v4435_v13 = vpop.permute.xlu0 %1282 }
 0x295   :  { %5704 = vst [vmem:[#allocation98_spill] sm:$0xff] %v4433_v39  ;;  %5705 = vst [vmem:[#allocation99_spill] sm:$0xff] %v4435_v13 }
 0x298   :  { %v4437_v21 = vpop.permute.xlu1 %1288  ;;  %v4439_v35 = vpop.permute.xlu0 %1286 }
 0x299   :  { %5706 = vst [vmem:[#allocation100_spill] sm:$0xff] %v4437_v21  ;;  %5707 = vst [vmem:[#allocation101_spill] sm:$0xff] %v4439_v35  ;;  %v1325_v35 = vstv %s3451_s8  ;;  %s3491_s8 = sld [smem:[#allocation4 + $0x2e]] }
 0x29a   :  { %v1335_v36 = vadd.f32 %v1331_v28, %v1325_v35  ;;  %v1334_v53 = vadd.f32 %v1330_v57, %v1325_v35 }
 0x29c   :  { %v4441_v56 = vpop.permute.xlu1 %1310  ;;  %v4443_v15 = vpop.permute.xlu0 %1308 }
 0x29d   :  { %5708 = vst [vmem:[#allocation102_spill] sm:$0xff] %v4441_v56  ;;  %5709 = vst [vmem:[#allocation103_spill] sm:$0xff] %v4443_v15  ;;  %v1329_v56 = vmul.f32 %v4248_v1, %v1327_v26  ;;  %v1328_v15 = vmul.f32 %v4254_v34, %v1327_v26  ;;  %v1393_v26 = vmul.f32 %v4314_v54, %v1389_v61 }
 0x29f   :  { %v1332_v30 = vadd.f32 %v1328_v15, %v1325_v35  ;;  %v1390_v15 = vmul.f32 %v4302_v6, %v1389_v61 }
 0x2a0   :  { %v4445_v18 = vpop.permute.xlu1 %1314  ;;  %v4447_v7 = vpop.permute.xlu0 %1312 }
 0x2a1   :  { %5710 = vst [vmem:[#allocation104_spill] sm:$0xff] %v4445_v18  ;;  %5711 = vst [vmem:[#allocation105_spill] sm:$0xff] %v4447_v7  ;;  %v1333_v7 = vadd.f32 %v1329_v56, %v1325_v35 }
 0x2a4   :  { %v1349_v55 = vpop.permute.xlu1 %1348  ;;  %v1347_v0 = vpop.permute.xlu0 %1346 }
 0x2a5   :  { %v1359_v59 = vadd.f32 %v1349_v55, %v1333_v7  ;;  %v1358_v38 = vadd.f32 %v1347_v0, %v1332_v30  ;;  %v1451_v7 = vstv %s3458_s3  ;;  %s3528_s3 = sld [smem:[#allocation4 + $0x3f]] }
 0x2a6   :  { %v1455_v44 = vmul.f32 %v4362_v32, %v1451_v7 }
 0x2a8   :  { %v1353_v48 = vpop.permute.xlu1 %1352  ;;  %v1351_v8 = vpop.permute.xlu0 %1350 }
 0x2a9   :  { %v1361_v56 = vadd.f32 %v1353_v48, %v1335_v36  ;;  %v1360_v12 = vadd.f32 %v1351_v8, %v1334_v53 }
 0x2ac   :  { %v1375_v39 = vpop.permute.xlu1 %1374  ;;  %v1373_v13 = vpop.permute.xlu0 %1372 }
 0x2ad   :  { %v1385_v16 = vadd.f32 %v1375_v39, %v1359_v59  ;;  %v1384_v41 = vadd.f32 %v1373_v13, %v1358_v38  ;;  %v1453_v38 = vmul.f32 %v4344_v10, %v1451_v7  ;;  %v1452_v39 = vmul.f32 %v4350_v37, %v1451_v7 }
 0x2af   :  { %v1395_v57 = vadd.f32 %v1391_v63, %v1385_v16  ;;  %v1394_v55 = vadd.f32 %v1390_v15, %v1384_v41  ;;  %v1454_v16 = vmul.f32 %v4368_v45, %v1451_v7 }
 0x2b0   :  { %v1379_v21 = vpop.permute.xlu1 %1378  ;;  %v1377_v5 = vpop.permute.xlu0 %1376 }
 0x2b1   :  { %v1387_v30 = vadd.f32 %v1379_v21, %v1361_v56  ;;  %v1386_v28 = vadd.f32 %v1377_v5, %v1360_v12 }
 0x2b3   :  { %v1397_v53 = vadd.f32 %v1393_v26, %v1387_v30  ;;  %v1396_v8 = vadd.f32 %v1392_v11, %v1386_v28 }
 0x2b4   :  { %v1411_v18 = vpop.permute.xlu1 %1410  ;;  %v1409_v29 = vpop.permute.xlu0 %1408 }
 0x2b5   :  { %v1421_v35 = vadd.f32 %v1411_v18, %v1395_v57  ;;  %v1420_v59 = vadd.f32 %v1409_v29, %v1394_v55 }
 0x2b8   :  { %v1415_v27 = vpop.permute.xlu1 %1414  ;;  %v1413_v23 = vpop.permute.xlu0 %1412 }
 0x2b9   :  { %v1423_v61 = vadd.f32 %v1415_v27, %v1397_v53  ;;  %v1422_v47 = vadd.f32 %v1413_v23, %v1396_v8 }
 0x2bc   :  { %v1437_v19 = vpop.permute.xlu1 %1436  ;;  %v1435_v22 = vpop.permute.xlu0 %1434 }
 0x2bd   :  { %v1447_v0 = vadd.f32 %v1437_v19, %v1421_v35  ;;  %v1446_v48 = vadd.f32 %v1435_v22, %v1420_v59 }
 0x2bf   :  { %v1457_v63 = vadd.f32 %v1453_v38, %v1447_v0  ;;  %v1456_v29 = vadd.f32 %v1452_v39, %v1446_v48  ;;  %v1551_v39 = vstv %s3462_s10  ;;  %s3527_s10 = sld [smem:[#allocation7 + $0x7]] }
 0x2c0   :  { %v1441_v58 = vpop.permute.xlu1 %1440  ;;  %v1439_v60 = vpop.permute.xlu0 %1438 }
 0x2c1   :  { %v1449_v5 = vadd.f32 %v1441_v58, %v1423_v61  ;;  %v1448_v12 = vadd.f32 %v1439_v60, %v1422_v47 }
 0x2c3   :  { %v1459_v26 = vadd.f32 %v1455_v44, %v1449_v5  ;;  %v1458_v11 = vadd.f32 %v1454_v16, %v1448_v12 }
 0x2c4   :  { %v1473_v13 = vpop.permute.xlu1 %1472  ;;  %v1471_v36 = vpop.permute.xlu0 %1470 }
 0x2c5   :  { %v1483_v18 = vadd.f32 %v1473_v13, %v1457_v63  ;;  %v1482_v15 = vadd.f32 %v1471_v36, %v1456_v29 }
 0x2c8   :  { %v1477_v21 = vpop.permute.xlu1 %1476  ;;  %v1475_v41 = vpop.permute.xlu0 %1474 }
 0x2c9   :  { %v1485_v27 = vadd.f32 %v1477_v21, %v1459_v26  ;;  %v1484_v23 = vadd.f32 %v1475_v41, %v1458_v11  ;;  %v1577_v41 = vstv %s3463_s11  ;;  %s3531_s11 = sld [smem:[#allocation4 + $0x42]] }
 0x2cc   :  { %v1499_v56 = vpop.permute.xlu1 %1498  ;;  %v1497_v57 = vpop.permute.xlu0 %1496 }
 0x2cd   :  { %v1509_v19 = vadd.f32 %v1499_v56, %v1483_v18  ;;  %v1508_v22 = vadd.f32 %v1497_v57, %v1482_v15  ;;  %v1617_v15 = vstv %s3465_s12  ;;  %s3489_s12 = sld [smem:[#allocation7 + $0x5]] }
 0x2cf   :  { %v1513_v30 = vmax.f32 %v1509_v19, 0.0  ;;  %v1512_v28 = vmax.f32 %v1508_v22, 0.0 }
 0x2d0   :  { %v1503_v55 = vpop.permute.xlu1 %1502  ;;  %v1501_v35 = vpop.permute.xlu0 %1500 }
 0x2d1   :  { %v1511_v7 = vadd.f32 %v1503_v55, %v1485_v27  ;;  %v1510_v59 = vadd.f32 %v1501_v35, %v1484_v23  ;;  %1522 = vrot.lane.b32.xlu1 %v1513_v30, %s3650_s25  ;;  %1520 = vrot.lane.b32.xlu0 %v1512_v28, %s3650_s25  ;;  %v1643_v23 = vstv %s3466_s13  ;;  %s3493_s13 = sld [smem:[#allocation4 + $0x30]] }
 0x2d3   :  { %v1515_v47 = vmax.f32 %v1511_v7, 0.0  ;;  %v1514_v60 = vmax.f32 %v1510_v59, 0.0  ;;  %v1683_v59 = vstv %s3468_s14  ;;  %s3496_s14 = sld [smem:[#allocation4 + $0x33]] }
 0x2d5   :  { %1526 = vrot.lane.b32.xlu1 %v1515_v47, %s3650_s25  ;;  %1524 = vrot.lane.b32.xlu0 %v1514_v60, %s3650_s25 }
 0x343   :  { %v1523_v44 = vpop.permute.xlu1 %1522  ;;  %v1521_v58 = vpop.permute.xlu0 %1520 }
 0x344   :  { %1533 = vst.msk [vmem:[#allocation2 + $0x9] sm:$0xff] %vm301_vm5, %v1523_v44  ;;  %1532 = vst.msk [vmem:[#allocation2 + $0x1] sm:$0xff] %vm301_vm5, %v1521_v58 }
 0x347   :  { %v1527_v38 = vpop.permute.xlu1 %1526  ;;  %v1525_v13 = vpop.permute.xlu0 %1524 }
 0x348   :  { %1535 = vst.msk [vmem:[#allocation2 + $0x21] sm:$0xff] %vm301_vm5, %v1527_v38  ;;  %1534 = vst.msk [vmem:[#allocation2 + $0x19] sm:$0xff] %vm301_vm5, %v1525_v13 }
 0x34b   :  { %v4469_v36 = vld [vmem:[#allocation2 + $0x8] sm:$0xff]  ;;  %v4471_v53 = vld [vmem:[#allocation2] sm:$0xff] }
 0x34c   :  { %5712 = vst [vmem:[#allocation106_spill] sm:$0xff] %v4469_v36  ;;  %5713 = vst [vmem:[#allocation107_spill] sm:$0xff] %v4471_v53  ;;  %v1553_v8 = vmul.f32 %v1551_v39, %v4469_v36  ;;  %v1552_v0 = vmul.f32 %v1551_v39, %v4471_v53  ;;  %v1579_v5 = vmul.f32 %v1577_v41, %v4469_v36  ;;  %v4491_v18 = vld [vmem:[#allocation2 + $0x9] sm:$0xff]  ;;  %v4493_v56 = vld [vmem:[#allocation2 + $0x1] sm:$0xff] }
 0x34d   :  { %v1578_v12 = vmul.f32 %v1577_v41, %v4471_v53  ;;  %5716 = vst [vmem:[#allocation110_spill] sm:$0xff] %v4491_v18  ;;  %5717 = vst [vmem:[#allocation111_spill] sm:$0xff] %v4493_v56  ;;  %v1619_v57 = vmul.f32 %v1617_v15, %v4491_v18  ;;  %v1618_v26 = vmul.f32 %v1617_v15, %v4493_v56  ;;  %v4515_v7 = vld [vmem:[#allocation2 + $0xa] sm:$0xff]  ;;  %v4517_v47 = vld [vmem:[#allocation2 + $0x2] sm:$0xff] }
 0x34e   :  { %1562 = vrot.lane.b32.xlu1 %v1553_v8, %s3647_s15  ;;  %1560 = vrot.lane.b32.xlu0 %v1552_v0, %s3647_s15  ;;  %v1645_v30 = vmul.f32 %v1643_v23, %v4491_v18  ;;  %v1644_v28 = vmul.f32 %v1643_v23, %v4493_v56  ;;  %5720 = vst [vmem:[#allocation114_spill] sm:$0xff] %v4515_v7  ;;  %5721 = vst [vmem:[#allocation115_spill] sm:$0xff] %v4517_v47  ;;  %v1709_v8 = vstv %s3469_s16  ;;  %s3500_s16 = sld [smem:[#allocation9 + $0x2e]] }
 0x34f   :  { %v4477_v48 = vld [vmem:[#allocation2 + $0x20] sm:$0xff]  ;;  %v4479_v61 = vld [vmem:[#allocation2 + $0x18] sm:$0xff]  ;;  %v1685_v60 = vmul.f32 %v1683_v59, %v4515_v7  ;;  %v1684_v44 = vmul.f32 %v1683_v59, %v4517_v47  ;;  %v1711_v0 = vmul.f32 %v1709_v8, %v4515_v7 }
 0x350   :  { %5714 = vst [vmem:[#allocation108_spill] sm:$0xff] %v4477_v48  ;;  %5715 = vst [vmem:[#allocation109_spill] sm:$0xff] %v4479_v61  ;;  %v1555_v21 = vmul.f32 %v1551_v39, %v4477_v48  ;;  %v1554_v16 = vmul.f32 %v1551_v39, %v4479_v61  ;;  %v1581_v63 = vmul.f32 %v1577_v41, %v4477_v48  ;;  %v4499_v11 = vld [vmem:[#allocation2 + $0x21] sm:$0xff]  ;;  %v4501_v19 = vld [vmem:[#allocation2 + $0x19] sm:$0xff] }
 0x351   :  { %v1580_v29 = vmul.f32 %v1577_v41, %v4479_v61  ;;  %5718 = vst [vmem:[#allocation112_spill] sm:$0xff] %v4499_v11  ;;  %5719 = vst [vmem:[#allocation113_spill] sm:$0xff] %v4501_v19  ;;  %v1621_v22 = vmul.f32 %v1617_v15, %v4499_v11  ;;  %v1620_v27 = vmul.f32 %v1617_v15, %v4501_v19  ;;  %v4523_v58 = vld [vmem:[#allocation2 + $0x22] sm:$0xff]  ;;  %v4525_v38 = vld [vmem:[#allocation2 + $0x1a] sm:$0xff] }
 0x352   :  { %1566 = vrot.lane.b32.xlu1 %v1555_v21, %s3647_s15  ;;  %1564 = vrot.lane.b32.xlu0 %v1554_v16, %s3647_s15  ;;  %v1647_v55 = vmul.f32 %v1643_v23, %v4499_v11  ;;  %v1646_v35 = vmul.f32 %v1643_v23, %v4501_v19  ;;  %5722 = vst [vmem:[#allocation116_spill] sm:$0xff] %v4523_v58  ;;  %5723 = vst [vmem:[#allocation117_spill] sm:$0xff] %v4525_v38  ;;  %v1747_v16 = vstv %s3472_s18  ;;  %s3501_s18 = sld [smem:[#allocation9 + $0x2f]] }
 0x353   :  { %v1687_v13 = vmul.f32 %v1683_v59, %v4523_v58  ;;  %v1686_v39 = vmul.f32 %v1683_v59, %v4525_v38  ;;  %v1710_v21 = vmul.f32 %v1709_v8, %v4517_v47  ;;  %v1713_v41 = vmul.f32 %v1709_v8, %v4523_v58 }
 0x354   :  { %v1750_v15 = vmul.f32 %v4272_v49, %v1747_v16  ;;  %v1799_v19 = vstv %s3474_s2  ;;  %s3529_s2 = sld [smem:[#allocation4 + $0x40]] }
 0x356   :  { %1588 = vrot.lane.b32.xlu1 %v1579_v5, %s3648_s17  ;;  %1586 = vrot.lane.b32.xlu0 %v1578_v12, %s3648_s17  ;;  %v1712_v5 = vmul.f32 %v1709_v8, %v4525_v38  ;;  %v1749_v12 = vmul.f32 %v4248_v1, %v1747_v16 }
 0x35a   :  { %1592 = vrot.lane.b32.xlu1 %v1581_v63, %s3648_s17  ;;  %1590 = vrot.lane.b32.xlu0 %v1580_v29, %s3648_s17  ;;  %v1748_v63 = vmul.f32 %v4254_v34, %v1747_v16  ;;  %v1751_v29 = vmul.f32 %v4266_v62, %v1747_v16 }
 0x35e   :  { %1628 = vrot.lane.b32.xlu1 %v1619_v57, %s3647_s15  ;;  %1626 = vrot.lane.b32.xlu0 %v1618_v26, %s3647_s15  ;;  %v1773_v57 = vstv %s3473_s19  ;;  %s3494_s19 = sld [smem:[#allocation4 + $0x31]] }
 0x35f   :  { %v1775_v26 = vmul.f32 %v4248_v1, %v1773_v57  ;;  %v1776_v23 = vmul.f32 %v4272_v49, %v1773_v57 }
 0x362   :  { %1632 = vrot.lane.b32.xlu1 %v1621_v22, %s3647_s15  ;;  %1630 = vrot.lane.b32.xlu0 %v1620_v27, %s3647_s15  ;;  %v1774_v22 = vmul.f32 %v4254_v34, %v1773_v57  ;;  %v1777_v27 = vmul.f32 %v4266_v62, %v1773_v57 }
 0x366   :  { %1654 = vrot.lane.b32.xlu1 %v1645_v30, %s3648_s17  ;;  %1652 = vrot.lane.b32.xlu0 %v1644_v28, %s3648_s17  ;;  %v1809_v30 = vstv %s3475_s20  ;;  %s3495_s20 = sld [smem:[#allocation4 + $0x32]] }
 0x367   :  { %v1811_v28 = vmul.f32 %v4296_v42, %v1809_v30  ;;  %v1812_v59 = vmul.f32 %v4320_v46, %v1809_v30 }
 0x36a   :  { %1658 = vrot.lane.b32.xlu1 %v1647_v55, %s3648_s17  ;;  %1656 = vrot.lane.b32.xlu0 %v1646_v35, %s3648_s17  ;;  %v1810_v55 = vmul.f32 %v4302_v6, %v1809_v30  ;;  %v1813_v35 = vmul.f32 %v4314_v54, %v1809_v30 }
 0x36e   :  { %1694 = vrot.lane.b32.xlu1 %v1685_v60, %s3647_s15  ;;  %1692 = vrot.lane.b32.xlu0 %v1684_v44, %s3647_s15  ;;  %v1835_v60 = vstv %s3476_s21  ;;  %s3511_s21 = sld [smem:[#allocation4 + $0x38]] }
 0x36f   :  { %v1837_v44 = vmul.f32 %v4296_v42, %v1835_v60  ;;  %v1838_v8 = vmul.f32 %v4320_v46, %v1835_v60 }
 0x372   :  { %1698 = vrot.lane.b32.xlu1 %v1687_v13, %s3647_s15  ;;  %1696 = vrot.lane.b32.xlu0 %v1686_v39, %s3647_s15  ;;  %v1836_v13 = vmul.f32 %v4302_v6, %v1835_v60  ;;  %v1839_v39 = vmul.f32 %v4314_v54, %v1835_v60 }
 0x376   :  { %1720 = vrot.lane.b32.xlu1 %v1711_v0, %s3648_s17  ;;  %1718 = vrot.lane.b32.xlu0 %v1710_v21, %s3648_s17  ;;  %v1871_v0 = vstv %s3478_s22  ;;  %s3513_s22 = sld [smem:[#allocation4 + $0x3a]] }
 0x377   :  { %v1873_v21 = vmul.f32 %v4344_v10, %v1871_v0  ;;  %v1872_v16 = vmul.f32 %v4350_v37, %v1871_v0 }
 0x37a   :  { %1724 = vrot.lane.b32.xlu1 %v1713_v41, %s3648_s17  ;;  %1722 = vrot.lane.b32.xlu0 %v1712_v5, %s3648_s17  ;;  %v1875_v41 = vmul.f32 %v4362_v32, %v1871_v0  ;;  %v1874_v5 = vmul.f32 %v4368_v45, %v1871_v0 }
 0x37e   :  { %1758 = vrot.lane.b32.xlu1 %v1749_v12, %s3647_s15  ;;  %1756 = vrot.lane.b32.xlu0 %v1748_v63, %s3647_s15  ;;  %v1897_v12 = vstv %s3479_s23  ;;  %s3514_s23 = sld [smem:[#allocation4 + $0x3b]] }
 0x37f   :  { %v1899_v63 = vmul.f32 %v4344_v10, %v1897_v12  ;;  %v1900_v57 = vmul.f32 %v4368_v45, %v1897_v12 }
 0x382   :  { %1762 = vrot.lane.b32.xlu1 %v1751_v29, %s3647_s15  ;;  %1760 = vrot.lane.b32.xlu0 %v1750_v15, %s3647_s15  ;;  %v1898_v29 = vmul.f32 %v4350_v37, %v1897_v12  ;;  %v1901_v15 = vmul.f32 %v4362_v32, %v1897_v12 }
 0x386   :  { %1784 = vrot.lane.b32.xlu1 %v1775_v26, %s3648_s17  ;;  %1782 = vrot.lane.b32.xlu0 %v1774_v22, %s3648_s17 }
 0x38a   :  { %1788 = vrot.lane.b32.xlu1 %v1777_v27, %s3648_s17  ;;  %1786 = vrot.lane.b32.xlu0 %v1776_v23, %s3648_s17 }
 0x38e   :  { %1820 = vrot.lane.b32.xlu1 %v1811_v28, %s3647_s15  ;;  %1818 = vrot.lane.b32.xlu0 %v1810_v55, %s3647_s15 }
 0x392   :  { %1824 = vrot.lane.b32.xlu1 %v1813_v35, %s3647_s15  ;;  %1822 = vrot.lane.b32.xlu0 %v1812_v59, %s3647_s15 }
 0x396   :  { %1846 = vrot.lane.b32.xlu1 %v1837_v44, %s3648_s17  ;;  %1844 = vrot.lane.b32.xlu0 %v1836_v13, %s3648_s17 }
 0x39a   :  { %1850 = vrot.lane.b32.xlu1 %v1839_v39, %s3648_s17  ;;  %1848 = vrot.lane.b32.xlu0 %v1838_v8, %s3648_s17 }
 0x39e   :  { %1882 = vrot.lane.b32.xlu1 %v1873_v21, %s3647_s15  ;;  %1880 = vrot.lane.b32.xlu0 %v1872_v16, %s3647_s15 }
 0x3a2   :  { %1886 = vrot.lane.b32.xlu1 %v1875_v41, %s3647_s15  ;;  %1884 = vrot.lane.b32.xlu0 %v1874_v5, %s3647_s15 }
 0x3a6   :  { %1908 = vrot.lane.b32.xlu1 %v1899_v63, %s3648_s17  ;;  %1906 = vrot.lane.b32.xlu0 %v1898_v29, %s3648_s17 }
 0x3aa   :  { %1912 = vrot.lane.b32.xlu1 %v1901_v15, %s3648_s17  ;;  %1910 = vrot.lane.b32.xlu0 %v1900_v57, %s3648_s17 }
 0x3c0   :  { %v4589_v26 = vpop.permute.xlu1 %1562  ;;  %v4591_v22 = vpop.permute.xlu0 %1560 }
 0x3c1   :  { %5724 = vst [vmem:[#allocation118_spill] sm:$0xff] %v4589_v26  ;;  %5725 = vst [vmem:[#allocation119_spill] sm:$0xff] %v4591_v22 }
 0x3c4   :  { %v4593_v27 = vpop.permute.xlu1 %1566  ;;  %v4595_v23 = vpop.permute.xlu0 %1564 }
 0x3c5   :  { %5726 = vst [vmem:[#allocation120_spill] sm:$0xff] %v4593_v27  ;;  %5727 = vst [vmem:[#allocation121_spill] sm:$0xff] %v4595_v23 }
 0x3c8   :  { %v4597_v30 = vpop.permute.xlu1 %1588  ;;  %v4599_v28 = vpop.permute.xlu0 %1586 }
 0x3c9   :  { %5728 = vst [vmem:[#allocation122_spill] sm:$0xff] %v4597_v30  ;;  %5729 = vst [vmem:[#allocation123_spill] sm:$0xff] %v4599_v28  ;;  %v1801_v30 = vmul.f32 %v4296_v42, %v1799_v19 }
 0x3cc   :  { %v4601_v55 = vpop.permute.xlu1 %1592  ;;  %v4603_v35 = vpop.permute.xlu0 %1590 }
 0x3cd   :  { %5730 = vst [vmem:[#allocation124_spill] sm:$0xff] %v4601_v55  ;;  %5731 = vst [vmem:[#allocation125_spill] sm:$0xff] %v4603_v35 }
 0x3d0   :  { %v4605_v59 = vpop.permute.xlu1 %1628  ;;  %v4607_v60 = vpop.permute.xlu0 %1626 }
 0x3d1   :  { %5732 = vst [vmem:[#allocation126_spill] sm:$0xff] %v4605_v59  ;;  %5733 = vst [vmem:[#allocation127_spill] sm:$0xff] %v4607_v60 }
 0x3d4   :  { %v4609_v44 = vpop.permute.xlu1 %1632  ;;  %v4611_v13 = vpop.permute.xlu0 %1630 }
 0x3d5   :  { %5734 = vst [vmem:[#allocation128_spill] sm:$0xff] %v4609_v44  ;;  %5735 = vst [vmem:[#allocation129_spill] sm:$0xff] %v4611_v13 }
 0x3d8   :  { %v4613_v39 = vpop.permute.xlu1 %1654  ;;  %v4615_v8 = vpop.permute.xlu0 %1652 }
 0x3d9   :  { %5736 = vst [vmem:[#allocation130_spill] sm:$0xff] %v4613_v39  ;;  %5737 = vst [vmem:[#allocation131_spill] sm:$0xff] %v4615_v8 }
 0x3dc   :  { %v4617_v0 = vpop.permute.xlu1 %1658  ;;  %v4619_v21 = vpop.permute.xlu0 %1656 }
 0x3dd   :  { %5738 = vst [vmem:[#allocation132_spill] sm:$0xff] %v4617_v0  ;;  %5739 = vst [vmem:[#allocation133_spill] sm:$0xff] %v4619_v21  ;;  %v1737_v21 = vstv %s3471_s24  ;;  %s3516_s24 = sld [smem:[#allocation4 + $0x3d]] }
 0x3de   :  { %v1741_v13 = vmul.f32 %v4266_v62, %v1737_v21  ;;  %v1740_v44 = vmul.f32 %v4272_v49, %v1737_v21  ;;  %v1803_v49 = vmul.f32 %v4314_v54, %v1799_v19 }
 0x3e0   :  { %v4621_v16 = vpop.permute.xlu1 %1694  ;;  %v4623_v41 = vpop.permute.xlu0 %1692 }
 0x3e1   :  { %5740 = vst [vmem:[#allocation134_spill] sm:$0xff] %v4621_v16  ;;  %5741 = vst [vmem:[#allocation135_spill] sm:$0xff] %v4623_v41 }
 0x3e4   :  { %v4625_v5 = vpop.permute.xlu1 %1698  ;;  %v4627_v12 = vpop.permute.xlu0 %1696 }
 0x3e5   :  { %5742 = vst [vmem:[#allocation136_spill] sm:$0xff] %v4625_v5  ;;  %5743 = vst [vmem:[#allocation137_spill] sm:$0xff] %v4627_v12  ;;  %v1735_v12 = vstv %s3470_s26  ;;  %s3517_s26 = sld [smem:[#allocation4 + $0x3e]] }
 0x3e6   :  { %v1745_v18 = vadd.f32 %v1741_v13, %v1735_v12  ;;  %v1744_v35 = vadd.f32 %v1740_v44, %v1735_v12 }
 0x3e8   :  { %v4629_v63 = vpop.permute.xlu1 %1720  ;;  %v4631_v29 = vpop.permute.xlu0 %1718 }
 0x3e9   :  { %5744 = vst [vmem:[#allocation138_spill] sm:$0xff] %v4629_v63  ;;  %5745 = vst [vmem:[#allocation139_spill] sm:$0xff] %v4631_v29  ;;  %v1739_v63 = vmul.f32 %v4248_v1, %v1737_v21  ;;  %v1738_v29 = vmul.f32 %v4254_v34, %v1737_v21  ;;  %v1802_v21 = vmul.f32 %v4320_v46, %v1799_v19 }
 0x3eb   :  { %v1742_v39 = vadd.f32 %v1738_v29, %v1735_v12 }
 0x3ec   :  { %v4633_v15 = vpop.permute.xlu1 %1724  ;;  %v4635_v57 = vpop.permute.xlu0 %1722 }
 0x3ed   :  { %5746 = vst [vmem:[#allocation140_spill] sm:$0xff] %v4633_v15  ;;  %5747 = vst [vmem:[#allocation141_spill] sm:$0xff] %v4635_v57  ;;  %v1743_v57 = vadd.f32 %v1739_v63, %v1735_v12  ;;  %v1800_v63 = vmul.f32 %v4302_v6, %v1799_v19 }
 0x3f0   :  { %v1759_v38 = vpop.permute.xlu1 %1758  ;;  %v1757_v58 = vpop.permute.xlu0 %1756 }
 0x3f1   :  { %v1769_v11 = vadd.f32 %v1759_v38, %v1743_v57  ;;  %v1768_v56 = vadd.f32 %v1757_v58, %v1742_v39  ;;  %v1861_v38 = vstv %s3477_s1  ;;  %s3530_s1 = sld [smem:[#allocation4 + $0x41]] }
 0x3f2   :  { %v1862_v6 = vmul.f32 %v4350_v37, %v1861_v38 }
 0x3f4   :  { %v1763_v47 = vpop.permute.xlu1 %1762  ;;  %v1761_v7 = vpop.permute.xlu0 %1760 }
 0x3f5   :  { %v1771_v29 = vadd.f32 %v1763_v47, %v1745_v18  ;;  %v1770_v62 = vadd.f32 %v1761_v7, %v1744_v35 }
 0x3f8   :  { %v1785_v16 = vpop.permute.xlu1 %1784  ;;  %v1783_v41 = vpop.permute.xlu0 %1782 }
 0x3f9   :  { %v1795_v34 = vadd.f32 %v1785_v16, %v1769_v11  ;;  %v1794_v28 = vadd.f32 %v1783_v41, %v1768_v56  ;;  %v1863_v56 = vmul.f32 %v4344_v10, %v1861_v38  ;;  %v1865_v16 = vmul.f32 %v4362_v32, %v1861_v38 }
 0x3fb   :  { %v1805_v44 = vadd.f32 %v1801_v30, %v1795_v34  ;;  %v1804_v39 = vadd.f32 %v1800_v63, %v1794_v28  ;;  %v1864_v30 = vmul.f32 %v4368_v45, %v1861_v38 }
 0x3fc   :  { %v1789_v5 = vpop.permute.xlu1 %1788  ;;  %v1787_v0 = vpop.permute.xlu0 %1786 }
 0x3fd   :  { %v1797_v58 = vadd.f32 %v1789_v5, %v1771_v29  ;;  %v1796_v13 = vadd.f32 %v1787_v0, %v1770_v62 }
 0x3ff   :  { %v1807_v7 = vadd.f32 %v1803_v49, %v1797_v58  ;;  %v1806_v47 = vadd.f32 %v1802_v21, %v1796_v13 }
 0x400   :  { %v1821_v15 = vpop.permute.xlu1 %1820  ;;  %v1819_v8 = vpop.permute.xlu0 %1818 }
 0x401   :  { %v1831_v12 = vadd.f32 %v1821_v15, %v1805_v44  ;;  %v1830_v11 = vadd.f32 %v1819_v8, %v1804_v39 }
 0x404   :  { %v1825_v60 = vpop.permute.xlu1 %1824  ;;  %v1823_v59 = vpop.permute.xlu0 %1822 }
 0x405   :  { %v1833_v46 = vadd.f32 %v1825_v60, %v1807_v7  ;;  %v1832_v19 = vadd.f32 %v1823_v59, %v1806_v47 }
 0x408   :  { %v1847_v1 = vpop.permute.xlu1 %1846  ;;  %v1845_v55 = vpop.permute.xlu0 %1844 }
 0x409   :  { %v1857_v54 = vadd.f32 %v1847_v1, %v1831_v12  ;;  %v1856_v35 = vadd.f32 %v1845_v55, %v1830_v11  ;;  %v1961_v12 = vstv %s3481_s27  ;;  %s3532_s27 = sld [smem:[#allocation4 + $0x43]] }
 0x40b   :  { %v1867_v5 = vadd.f32 %v1863_v56, %v1857_v54  ;;  %v1866_v10 = vadd.f32 %v1862_v6, %v1856_v35  ;;  %v1987_v35 = vstv %s3482_s28  ;;  %s3497_s28 = sld [smem:[#allocation4 + $0x34]] }
 0x40c   :  { %v1851_v23 = vpop.permute.xlu1 %1850  ;;  %v1849_v27 = vpop.permute.xlu0 %1848 }
 0x40d   :  { %v1859_v0 = vadd.f32 %v1851_v23, %v1833_v46  ;;  %v1858_v8 = vadd.f32 %v1849_v27, %v1832_v19 }
 0x40f   :  { %v1869_v63 = vadd.f32 %v1865_v16, %v1859_v0  ;;  %v1868_v29 = vadd.f32 %v1864_v30, %v1858_v8 }
 0x410   :  { %v1883_v42 = vpop.permute.xlu1 %1882  ;;  %v1881_v18 = vpop.permute.xlu0 %1880 }
 0x411   :  { %v1893_v15 = vadd.f32 %v1883_v42, %v1867_v5  ;;  %v1892_v57 = vadd.f32 %v1881_v18, %v1866_v10 }
 0x414   :  { %v1887_v41 = vpop.permute.xlu1 %1886  ;;  %v1885_v28 = vpop.permute.xlu0 %1884 }
 0x415   :  { %v1895_v60 = vadd.f32 %v1887_v41, %v1869_v63  ;;  %v1894_v59 = vadd.f32 %v1885_v28, %v1868_v29  ;;  %v2027_v28 = vstv %s3484_s29  ;;  %s3498_s29 = sld [smem:[#allocation4 + $0x35]] }
 0x418   :  { %v1909_v37 = vpop.permute.xlu1 %1908  ;;  %v1907_v34 = vpop.permute.xlu0 %1906 }
 0x419   :  { %v1919_v1 = vadd.f32 %v1909_v37, %v1893_v15  ;;  %v1918_v55 = vadd.f32 %v1907_v34, %v1892_v57  ;;  %v2053_v34 = vstv %s3485_s30  ;;  %s3536_s30 = sld [smem:[#allocation4 + $0x47]] }
 0x41b   :  { %v1923_v62 = vmax.f32 %v1919_v1, 0.0  ;;  %v1922_v32 = vmax.f32 %v1918_v55, 0.0 }
 0x41c   :  { %v1913_v49 = vpop.permute.xlu1 %1912  ;;  %v1911_v21 = vpop.permute.xlu0 %1910 }
 0x41d   :  { %v1921_v45 = vadd.f32 %v1913_v49, %v1895_v60  ;;  %v1920_v38 = vadd.f32 %v1911_v21, %v1894_v59  ;;  %1932 = vrot.lane.b32.xlu1 %v1923_v62, %s3650_s25  ;;  %1930 = vrot.lane.b32.xlu0 %v1922_v32, %s3650_s25  ;;  %v2093_v59 = vstv %s3487_s6  ;;  %s3509_s6 = sld [smem:[#allocation4 + $0x36]] }
 0x41f   :  { %v1925_v27 = vmax.f32 %v1921_v45, 0.0  ;;  %v1924_v23 = vmax.f32 %v1920_v38, 0.0 }
 0x421   :  { %1936 = vrot.lane.b32.xlu1 %v1925_v27, %s3650_s25  ;;  %1934 = vrot.lane.b32.xlu0 %v1924_v23, %s3650_s25  ;;  %v2119_v23 = vstv %s3488_s7  ;;  %s3508_s7 = sld [smem:[#allocation7 + $0x6]] }
 0x48f   :  { %v1933_v58 = vpop.permute.xlu1 %1932  ;;  %v1931_v13 = vpop.permute.xlu0 %1930 }
 0x490   :  { %1943 = vst.msk [vmem:[#allocation2 + $0x9] sm:$0xff] %vm301_vm5, %v1933_v58  ;;  %1942 = vst.msk [vmem:[#allocation2 + $0x1] sm:$0xff] %vm301_vm5, %v1931_v13 }
 0x493   :  { %v1937_v44 = vpop.permute.xlu1 %1936  ;;  %v1935_v39 = vpop.permute.xlu0 %1934 }
 0x494   :  { %1945 = vst.msk [vmem:[#allocation2 + $0x21] sm:$0xff] %vm301_vm5, %v1937_v44  ;;  %1944 = vst.msk [vmem:[#allocation2 + $0x19] sm:$0xff] %vm301_vm5, %v1935_v39  ;;  %v2157_v44 = vstv %s3491_s8  ;;  %s3512_s8 = sld [smem:[#allocation4 + $0x39]] }
 0x497   :  { %v4657_v11 = vld [vmem:[#allocation2 + $0x8] sm:$0xff]  ;;  %v4659_v56 = vld [vmem:[#allocation2] sm:$0xff] }
 0x498   :  { %5748 = vst [vmem:[#allocation142_spill] sm:$0xff] %v4657_v11  ;;  %5749 = vst [vmem:[#allocation143_spill] sm:$0xff] %v4659_v56  ;;  %v1963_v42 = vmul.f32 %v1961_v12, %v4657_v11  ;;  %v1962_v6 = vmul.f32 %v1961_v12, %v4659_v56  ;;  %v1989_v46 = vmul.f32 %v1987_v35, %v4657_v11  ;;  %v4679_v30 = vld [vmem:[#allocation2 + $0x9] sm:$0xff]  ;;  %v4681_v0 = vld [vmem:[#allocation2 + $0x1] sm:$0xff] }
 0x499   :  { %v1988_v19 = vmul.f32 %v1987_v35, %v4659_v56  ;;  %5752 = vst [vmem:[#allocation146_spill] sm:$0xff] %v4679_v30  ;;  %5753 = vst [vmem:[#allocation147_spill] sm:$0xff] %v4681_v0  ;;  %v2029_v8 = vmul.f32 %v2027_v28, %v4679_v30  ;;  %v2028_v5 = vmul.f32 %v2027_v28, %v4681_v0  ;;  %v4703_v60 = vld [vmem:[#allocation2 + $0xa] sm:$0xff]  ;;  %v4705_v62 = vld [vmem:[#allocation2 + $0x2] sm:$0xff] }
 0x49a   :  { %1972 = vrot.lane.b32.xlu1 %v1963_v42, %s3647_s15  ;;  %1970 = vrot.lane.b32.xlu0 %v1962_v6, %s3647_s15  ;;  %v2055_v63 = vmul.f32 %v2053_v34, %v4679_v30  ;;  %v2054_v29 = vmul.f32 %v2053_v34, %v4681_v0  ;;  %5756 = vst [vmem:[#allocation150_spill] sm:$0xff] %v4703_v60  ;;  %5757 = vst [vmem:[#allocation151_spill] sm:$0xff] %v4705_v62  ;;  %v4732_v42 = vld [vmem:[%s5552_s0 + $0x8] sm:$0xff] }
 0x49b   :  { %v4665_v18 = vld [vmem:[#allocation2 + $0x20] sm:$0xff]  ;;  %v4667_v7 = vld [vmem:[#allocation2 + $0x18] sm:$0xff]  ;;  %v2095_v32 = vmul.f32 %v2093_v59, %v4703_v60  ;;  %v2094_v49 = vmul.f32 %v2093_v59, %v4705_v62  ;;  %v2121_v58 = vmul.f32 %v2119_v23, %v4703_v60  ;;  %v2120_v13 = vmul.f32 %v2119_v23, %v4705_v62 }
 0x49c   :  { %5750 = vst [vmem:[#allocation144_spill] sm:$0xff] %v4665_v18  ;;  %5751 = vst [vmem:[#allocation145_spill] sm:$0xff] %v4667_v7  ;;  %v1965_v47 = vmul.f32 %v1961_v12, %v4665_v18  ;;  %v1964_v54 = vmul.f32 %v1961_v12, %v4667_v7  ;;  %v1991_v16 = vmul.f32 %v1987_v35, %v4665_v18  ;;  %v4687_v10 = vld [vmem:[#allocation2 + $0x21] sm:$0xff]  ;;  %v4689_v15 = vld [vmem:[#allocation2 + $0x19] sm:$0xff] }
 0x49d   :  { %v1990_v41 = vmul.f32 %v1987_v35, %v4667_v7  ;;  %5754 = vst [vmem:[#allocation148_spill] sm:$0xff] %v4687_v10  ;;  %5755 = vst [vmem:[#allocation149_spill] sm:$0xff] %v4689_v15  ;;  %v2031_v57 = vmul.f32 %v2027_v28, %v4687_v10  ;;  %v2030_v37 = vmul.f32 %v2027_v28, %v4689_v15  ;;  %v4711_v21 = vld [vmem:[#allocation2 + $0x22] sm:$0xff]  ;;  %v4713_v45 = vld [vmem:[#allocation2 + $0x1a] sm:$0xff] }
 0x49e   :  { %1976 = vrot.lane.b32.xlu1 %v1965_v47, %s3647_s15  ;;  %1974 = vrot.lane.b32.xlu0 %v1964_v54, %s3647_s15  ;;  %v2057_v1 = vmul.f32 %v2053_v34, %v4687_v10  ;;  %v2056_v55 = vmul.f32 %v2053_v34, %v4689_v15  ;;  %5758 = vst [vmem:[#allocation152_spill] sm:$0xff] %v4711_v21  ;;  %5759 = vst [vmem:[#allocation153_spill] sm:$0xff] %v4713_v45  ;;  %v4738_v47 = vld [vmem:[%s5552_s0] sm:$0xff]  ;;  %v4768_v34 = vld [vmem:[%s5552_s0 + $0x9] sm:$0xff] }
 0x49f   :  { %v2097_v38 = vmul.f32 %v2093_v59, %v4711_v21  ;;  %v2096_v27 = vmul.f32 %v2093_v59, %v4713_v45  ;;  %v2123_v39 = vmul.f32 %v2119_v23, %v4711_v21  ;;  %v2122_v12 = vmul.f32 %v2119_v23, %v4713_v45  ;;  %v4746_v35 = vld [vmem:[%s5552_s0 + $0x20] sm:$0xff] }
 0x4a0   :  { %v2159_v6 = vmul.f32 %v4732_v42, %v2157_v44  ;;  %v2158_v54 = vmul.f32 %v4738_v47, %v2157_v44 }
 0x4a2   :  { %1998 = vrot.lane.b32.xlu1 %v1989_v46, %s3648_s17  ;;  %1996 = vrot.lane.b32.xlu0 %v1988_v19, %s3648_s17  ;;  %v2161_v46 = vmul.f32 %v4746_v35, %v2157_v44  ;;  %v4752_v19 = vld [vmem:[%s5552_s0 + $0x18] sm:$0xff] }
 0x4a6   :  { %2002 = vrot.lane.b32.xlu1 %v1991_v16, %s3648_s17  ;;  %2000 = vrot.lane.b32.xlu0 %v1990_v41, %s3648_s17  ;;  %v2160_v16 = vmul.f32 %v4752_v19, %v2157_v44  ;;  %v2183_v41 = vstv %s3492_s9  ;;  %v2281_v44 = vstv %s3497_s28  ;;  %s3533_s28 = sld [smem:[#allocation4 + $0x44]] }
 0x4a7   :  { %v2185_v28 = vmul.f32 %v4732_v42, %v2183_v41  ;;  %s3515_s9 = sld [smem:[#allocation4 + $0x3c]] }
 0x4aa   :  { %2038 = vrot.lane.b32.xlu1 %v2029_v8, %s3647_s15  ;;  %2036 = vrot.lane.b32.xlu0 %v2028_v5, %s3647_s15  ;;  %v2184_v8 = vmul.f32 %v4738_v47, %v2183_v41  ;;  %v2187_v5 = vmul.f32 %v4746_v35, %v2183_v41 }
 0x4ae   :  { %2042 = vrot.lane.b32.xlu1 %v2031_v57, %s3647_s15  ;;  %2040 = vrot.lane.b32.xlu0 %v2030_v37, %s3647_s15  ;;  %v2186_v57 = vmul.f32 %v4752_v19, %v2183_v41  ;;  %v2219_v37 = vstv %s3494_s19  ;;  %v4824_v41 = vld [vmem:[%s5552_s0 + $0x1a] sm:$0xff]  ;;  %s3503_s19 = sld [smem:[#allocation9 + $0x31]] }
 0x4b2   :  { %2064 = vrot.lane.b32.xlu1 %v2055_v63, %s3648_s17  ;;  %2062 = vrot.lane.b32.xlu0 %v2054_v29, %s3648_s17  ;;  %v2221_v63 = vmul.f32 %v4768_v34, %v2219_v37  ;;  %v4774_v29 = vld [vmem:[%s5552_s0 + $0x1] sm:$0xff] }
 0x4b6   :  { %2068 = vrot.lane.b32.xlu1 %v2057_v1, %s3648_s17  ;;  %2066 = vrot.lane.b32.xlu0 %v2056_v55, %s3648_s17  ;;  %v2220_v1 = vmul.f32 %v4774_v29, %v2219_v37  ;;  %v4782_v55 = vld [vmem:[%s5552_s0 + $0x21] sm:$0xff] }
 0x4b7   :  { %v2223_v59 = vmul.f32 %v4782_v55, %v2219_v37 }
 0x4ba   :  { %2104 = vrot.lane.b32.xlu1 %v2095_v32, %s3647_s15  ;;  %2102 = vrot.lane.b32.xlu0 %v2094_v49, %s3647_s15  ;;  %v4788_v32 = vld [vmem:[%s5552_s0 + $0x19] sm:$0xff] }
 0x4bb   :  { %v2222_v49 = vmul.f32 %v4788_v32, %v2219_v37 }
 0x4be   :  { %2108 = vrot.lane.b32.xlu1 %v2097_v38, %s3647_s15  ;;  %2106 = vrot.lane.b32.xlu0 %v2096_v27, %s3647_s15  ;;  %v2245_v38 = vstv %s3495_s20  ;;  %s3510_s20 = sld [smem:[#allocation4 + $0x37]] }
 0x4bf   :  { %v2247_v27 = vmul.f32 %v4768_v34, %v2245_v38  ;;  %v2246_v23 = vmul.f32 %v4774_v29, %v2245_v38 }
 0x4c2   :  { %2130 = vrot.lane.b32.xlu1 %v2121_v58, %s3648_s17  ;;  %2128 = vrot.lane.b32.xlu0 %v2120_v13, %s3648_s17  ;;  %v2249_v58 = vmul.f32 %v4782_v55, %v2245_v38  ;;  %v2248_v13 = vmul.f32 %v4788_v32, %v2245_v38 }
 0x4c6   :  { %2134 = vrot.lane.b32.xlu1 %v2123_v39, %s3648_s17  ;;  %2132 = vrot.lane.b32.xlu0 %v2122_v12, %s3648_s17  ;;  %v4804_v39 = vld [vmem:[%s5552_s0 + $0xa] sm:$0xff] }
 0x4c7   :  { %v2283_v12 = vmul.f32 %v4804_v39, %v2281_v44 }
 0x4ca   :  { %2168 = vrot.lane.b32.xlu1 %v2159_v6, %s3647_s15  ;;  %2166 = vrot.lane.b32.xlu0 %v2158_v54, %s3647_s15  ;;  %v4810_v6 = vld [vmem:[%s5552_s0 + $0x2] sm:$0xff] }
 0x4cb   :  { %v2282_v54 = vmul.f32 %v4810_v6, %v2281_v44 }
 0x4ce   :  { %2172 = vrot.lane.b32.xlu1 %v2161_v46, %s3647_s15  ;;  %2170 = vrot.lane.b32.xlu0 %v2160_v16, %s3647_s15  ;;  %v4818_v46 = vld [vmem:[%s5552_s0 + $0x22] sm:$0xff]  ;;  %s3490_s0 = sld [smem:[#allocation4 + $0x2d]] }
 0x4cf   :  { %v2285_v16 = vmul.f32 %v4818_v46, %v2281_v44 }
 0x4d2   :  { %2194 = vrot.lane.b32.xlu1 %v2185_v28, %s3648_s17  ;;  %2192 = vrot.lane.b32.xlu0 %v2184_v8, %s3648_s17  ;;  %v2284_v28 = vmul.f32 %v4824_v41, %v2281_v44  ;;  %v2307_v8 = vstv %s3498_s29  ;;  %s3535_s29 = sld [smem:[#allocation4 + $0x46]] }
 0x4d3   :  { %v2311_v37 = vmul.f32 %v4818_v46, %v2307_v8 }
 0x4d6   :  { %2198 = vrot.lane.b32.xlu1 %v2187_v5, %s3648_s17  ;;  %2196 = vrot.lane.b32.xlu0 %v2186_v57, %s3648_s17  ;;  %v2309_v5 = vmul.f32 %v4804_v39, %v2307_v8  ;;  %v2308_v57 = vmul.f32 %v4810_v6, %v2307_v8 }
 0x4da   :  { %2230 = vrot.lane.b32.xlu1 %v2221_v63, %s3647_s15  ;;  %2228 = vrot.lane.b32.xlu0 %v2220_v1, %s3647_s15  ;;  %v2310_v63 = vmul.f32 %v4824_v41, %v2307_v8 }
 0x4de   :  { %2234 = vrot.lane.b32.xlu1 %v2223_v59, %s3647_s15  ;;  %2232 = vrot.lane.b32.xlu0 %v2222_v49, %s3647_s15 }
 0x4e2   :  { %2256 = vrot.lane.b32.xlu1 %v2247_v27, %s3648_s17  ;;  %2254 = vrot.lane.b32.xlu0 %v2246_v23, %s3648_s17 }
 0x4e6   :  { %2260 = vrot.lane.b32.xlu1 %v2249_v58, %s3648_s17  ;;  %2258 = vrot.lane.b32.xlu0 %v2248_v13, %s3648_s17 }
 0x4ea   :  { %2292 = vrot.lane.b32.xlu1 %v2283_v12, %s3647_s15  ;;  %2290 = vrot.lane.b32.xlu0 %v2282_v54, %s3647_s15 }
 0x4ee   :  { %2296 = vrot.lane.b32.xlu1 %v2285_v16, %s3647_s15  ;;  %2294 = vrot.lane.b32.xlu0 %v2284_v28, %s3647_s15 }
 0x4f2   :  { %2318 = vrot.lane.b32.xlu1 %v2309_v5, %s3648_s17  ;;  %2316 = vrot.lane.b32.xlu0 %v2308_v57, %s3648_s17 }
 0x4f6   :  { %2322 = vrot.lane.b32.xlu1 %v2311_v37, %s3648_s17  ;;  %2320 = vrot.lane.b32.xlu0 %v2310_v63, %s3648_s17 }
 0x50c   :  { %v4837_v1 = vpop.permute.xlu1 %1972  ;;  %v4839_v59 = vpop.permute.xlu0 %1970 }
 0x50d   :  { %5760 = vst [vmem:[#allocation154_spill] sm:$0xff] %v4837_v1  ;;  %5761 = vst [vmem:[#allocation155_spill] sm:$0xff] %v4839_v59 }
 0x510   :  { %v4841_v49 = vpop.permute.xlu1 %1976  ;;  %v4843_v38 = vpop.permute.xlu0 %1974 }
 0x511   :  { %5762 = vst [vmem:[#allocation156_spill] sm:$0xff] %v4841_v49  ;;  %5763 = vst [vmem:[#allocation157_spill] sm:$0xff] %v4843_v38 }
 0x514   :  { %v4845_v27 = vpop.permute.xlu1 %1998  ;;  %v4847_v23 = vpop.permute.xlu0 %1996 }
 0x515   :  { %5764 = vst [vmem:[#allocation158_spill] sm:$0xff] %v4845_v27  ;;  %5765 = vst [vmem:[#allocation159_spill] sm:$0xff] %v4847_v23 }
 0x518   :  { %v4849_v58 = vpop.permute.xlu1 %2002  ;;  %v4851_v13 = vpop.permute.xlu0 %2000 }
 0x519   :  { %5766 = vst [vmem:[#allocation160_spill] sm:$0xff] %v4849_v58  ;;  %5767 = vst [vmem:[#allocation161_spill] sm:$0xff] %v4851_v13  ;;  %v2209_v13 = vstv %s3493_s13  ;;  %s5085_s13 = sld [smem:[#allocation9 + $0x3]] }
 0x51a   :  { %v2211_v18 = vmul.f32 %v4768_v34, %v2209_v13  ;;  %v2212_v26 = vmul.f32 %v4788_v32, %v2209_v13 }
 0x51c   :  { %v4853_v44 = vpop.permute.xlu1 %2038  ;;  %v4855_v12 = vpop.permute.xlu0 %2036 }
 0x51d   :  { %5768 = vst [vmem:[#allocation162_spill] sm:$0xff] %v4853_v44  ;;  %5769 = vst [vmem:[#allocation163_spill] sm:$0xff] %v4855_v12 }
 0x520   :  { %v4857_v54 = vpop.permute.xlu1 %2042  ;;  %v4859_v16 = vpop.permute.xlu0 %2040 }
 0x521   :  { %5770 = vst [vmem:[#allocation164_spill] sm:$0xff] %v4857_v54  ;;  %5771 = vst [vmem:[#allocation165_spill] sm:$0xff] %v4859_v16  ;;  %v2147_v16 = vstv %s3490_s0  ;;  %s3534_s0 = sld [smem:[#allocation4 + $0x45]] }
 0x522   :  { %v2151_v15 = vmul.f32 %v4746_v35, %v2147_v16  ;;  %v2150_v10 = vmul.f32 %v4752_v19, %v2147_v16 }
 0x524   :  { %v4861_v28 = vpop.permute.xlu1 %2064  ;;  %v4863_v8 = vpop.permute.xlu0 %2062 }
 0x525   :  { %5772 = vst [vmem:[#allocation166_spill] sm:$0xff] %v4861_v28  ;;  %5773 = vst [vmem:[#allocation167_spill] sm:$0xff] %v4863_v8 }
 0x528   :  { %v4865_v5 = vpop.permute.xlu1 %2068  ;;  %v4867_v57 = vpop.permute.xlu0 %2066 }
 0x529   :  { %5774 = vst [vmem:[#allocation168_spill] sm:$0xff] %v4865_v5  ;;  %5775 = vst [vmem:[#allocation169_spill] sm:$0xff] %v4867_v57 }
 0x52c   :  { %v4869_v37 = vpop.permute.xlu1 %2104  ;;  %v4871_v63 = vpop.permute.xlu0 %2102 }
 0x52d   :  { %5776 = vst [vmem:[#allocation170_spill] sm:$0xff] %v4869_v37  ;;  %5777 = vst [vmem:[#allocation171_spill] sm:$0xff] %v4871_v63 }
 0x530   :  { %v4873_v62 = vpop.permute.xlu1 %2108  ;;  %v4875_v60 = vpop.permute.xlu0 %2106 }
 0x531   :  { %5778 = vst [vmem:[#allocation172_spill] sm:$0xff] %v4873_v62  ;;  %5779 = vst [vmem:[#allocation173_spill] sm:$0xff] %v4875_v60  ;;  %v2145_v60 = vstv %s3489_s12  ;;  %s310_s12 = sld [smem:[#allocation9]] }
 0x532   :  { %v2155_v1 = vadd.f32 %v2151_v15, %v2145_v60  ;;  %v2154_v38 = vadd.f32 %v2150_v10, %v2145_v60 }
 0x534   :  { %v4877_v45 = vpop.permute.xlu1 %2130  ;;  %v4879_v21 = vpop.permute.xlu0 %2128 }
 0x535   :  { %5780 = vst [vmem:[#allocation174_spill] sm:$0xff] %v4877_v45  ;;  %5781 = vst [vmem:[#allocation175_spill] sm:$0xff] %v4879_v21  ;;  %v2149_v45 = vmul.f32 %v4732_v42, %v2147_v16  ;;  %v2148_v21 = vmul.f32 %v4738_v47, %v2147_v16  ;;  %v2213_v16 = vmul.f32 %v4782_v55, %v2209_v13 }
 0x537   :  { %v2152_v30 = vadd.f32 %v2148_v21, %v2145_v60  ;;  %v2210_v21 = vmul.f32 %v4774_v29, %v2209_v13 }
 0x538   :  { %v4881_v12 = vpop.permute.xlu1 %2134  ;;  %v4883_v28 = vpop.permute.xlu0 %2132 }
 0x539   :  { %5782 = vst [vmem:[#allocation176_spill] sm:$0xff] %v4881_v12  ;;  %5783 = vst [vmem:[#allocation177_spill] sm:$0xff] %v4883_v28  ;;  %v2153_v28 = vadd.f32 %v2149_v45, %v2145_v60 }
 0x53c   :  { %v2169_v8 = vpop.permute.xlu1 %2168  ;;  %v2167_v5 = vpop.permute.xlu0 %2166 }
 0x53d   :  { %v2179_v58 = vadd.f32 %v2169_v8, %v2153_v28  ;;  %v2178_v59 = vadd.f32 %v2167_v5, %v2152_v30  ;;  %v2271_v28 = vstv %s3496_s14  ;;  %s3539_s14 = sld [smem:[#allocation9 + $0x41]] }
 0x53e   :  { %v2275_v36 = vmul.f32 %v4818_v46, %v2271_v28 }
 0x540   :  { %v2173_v57 = vpop.permute.xlu1 %2172  ;;  %v2171_v44 = vpop.permute.xlu0 %2170 }
 0x541   :  { %v2181_v45 = vadd.f32 %v2173_v57, %v2155_v1  ;;  %v2180_v22 = vadd.f32 %v2171_v44, %v2154_v38 }
 0x544   :  { %v2195_v37 = vpop.permute.xlu1 %2194  ;;  %v2193_v63 = vpop.permute.xlu0 %2192 }
 0x545   :  { %v2205_v11 = vadd.f32 %v2195_v37, %v2179_v58  ;;  %v2204_v7 = vadd.f32 %v2193_v63, %v2178_v59  ;;  %v2273_v59 = vmul.f32 %v4804_v39, %v2271_v28  ;;  %v2272_v37 = vmul.f32 %v4810_v6, %v2271_v28 }
 0x547   :  { %v2215_v10 = vadd.f32 %v2211_v18, %v2205_v11  ;;  %v2214_v60 = vadd.f32 %v2210_v21, %v2204_v7 }
 0x548   :  { %v2199_v62 = vpop.permute.xlu1 %2198  ;;  %v2197_v54 = vpop.permute.xlu0 %2196 }
 0x549   :  { %v2207_v30 = vadd.f32 %v2199_v62, %v2181_v45  ;;  %v2206_v15 = vadd.f32 %v2197_v54, %v2180_v22  ;;  %v2274_v22 = vmul.f32 %v4824_v41, %v2271_v28 }
 0x54b   :  { %v2217_v38 = vadd.f32 %v2213_v16, %v2207_v30  ;;  %v2216_v44 = vadd.f32 %v2212_v26, %v2206_v15 }
 0x54c   :  { %v2231_v12 = vpop.permute.xlu1 %2230  ;;  %v2229_v0 = vpop.permute.xlu0 %2228 }
 0x54d   :  { %v2241_v8 = vadd.f32 %v2231_v12, %v2215_v10  ;;  %v2240_v58 = vadd.f32 %v2229_v0, %v2214_v60 }
 0x550   :  { %v2235_v23 = vpop.permute.xlu1 %2234  ;;  %v2233_v27 = vpop.permute.xlu0 %2232 }
 0x551   :  { %v2243_v13 = vadd.f32 %v2235_v23, %v2217_v38  ;;  %v2242_v53 = vadd.f32 %v2233_v27, %v2216_v44 }
 0x554   :  { %v2257_v49 = vpop.permute.xlu1 %2256  ;;  %v2255_v56 = vpop.permute.xlu0 %2254 }
 0x555   :  { %v2267_v57 = vadd.f32 %v2257_v49, %v2241_v8  ;;  %v2266_v63 = vadd.f32 %v2255_v56, %v2240_v58 }
 0x557   :  { %v2277_v0 = vadd.f32 %v2273_v59, %v2267_v57  ;;  %v2276_v12 = vadd.f32 %v2272_v37, %v2266_v63  ;;  %v2371_v37 = vstv %s3500_s16  ;;  %s3541_s16 = sld [smem:[#allocation9 + $0x43]] }
 0x558   :  { %v2261_v61 = vpop.permute.xlu1 %2260  ;;  %v2259_v48 = vpop.permute.xlu0 %2258 }
 0x559   :  { %v2269_v18 = vadd.f32 %v2261_v61, %v2243_v13  ;;  %v2268_v7 = vadd.f32 %v2259_v48, %v2242_v53 }
 0x55b   :  { %v2279_v16 = vadd.f32 %v2275_v36, %v2269_v18  ;;  %v2278_v26 = vadd.f32 %v2274_v22, %v2268_v7 }
 0x55c   :  { %v2293_v5 = vpop.permute.xlu1 %2292  ;;  %v2291_v1 = vpop.permute.xlu0 %2290 }
 0x55d   :  { %v2303_v54 = vadd.f32 %v2293_v5, %v2277_v0  ;;  %v2302_v21 = vadd.f32 %v2291_v1, %v2276_v12 }
 0x560   :  { %v2297_v62 = vpop.permute.xlu1 %2296  ;;  %v2295_v11 = vpop.permute.xlu0 %2294 }
 0x561   :  { %v2305_v23 = vadd.f32 %v2297_v62, %v2279_v16  ;;  %v2304_v27 = vadd.f32 %v2295_v11, %v2278_v26  ;;  %v2397_v11 = vstv %s3501_s18  ;;  %s5100_s18 = sld [smem:[#allocation9 + $0x6]] }
 0x564   :  { %v2319_v45 = vpop.permute.xlu1 %2318  ;;  %v2317_v10 = vpop.permute.xlu0 %2316 }
 0x565   :  { %v2329_v49 = vadd.f32 %v2319_v45, %v2303_v54  ;;  %v2328_v56 = vadd.f32 %v2317_v10, %v2302_v21  ;;  %v4929_v21 = vstv %s3503_s19  ;;  %v2567_v10 = vstv %s3510_s20  ;;  %s3506_s19 = sld [smem:[#allocation9 + $0x34]]  ;;  %s3507_s20 = sld [smem:[#allocation9 + $0x35]] }
 0x566   :  { %5789 = vst [vmem:[#allocation183_spill] sm:$0xff] %v4929_v21 }
 0x567   :  { %v2333_v30 = vmax.f32 %v2329_v49, 0.0  ;;  %v2332_v15 = vmax.f32 %v2328_v56, 0.0  ;;  %v2569_v49 = vmul.f32 %v4732_v42, %v2567_v10  ;;  %v2568_v56 = vmul.f32 %v4738_v47, %v2567_v10 }
 0x568   :  { %v2323_v60 = vpop.permute.xlu1 %2322  ;;  %v2321_v8 = vpop.permute.xlu0 %2320 }
 0x569   :  { %v2331_v28 = vadd.f32 %v2323_v60, %v2305_v23  ;;  %v2330_v58 = vadd.f32 %v2321_v8, %v2304_v27  ;;  %2342 = vrot.lane.b32.xlu1 %v2333_v30, %s3650_s25  ;;  %2340 = vrot.lane.b32.xlu0 %v2332_v15, %s3650_s25  ;;  %v2571_v23 = vmul.f32 %v4746_v35, %v2567_v10  ;;  %v2593_v30 = vstv %s3511_s21  ;;  %s3426_s21 = sld [smem:[#allocation9 + $0xc]] }
 0x56a   :  { %v2570_v27 = vmul.f32 %v4752_v19, %v2567_v10  ;;  %v2595_v15 = vmul.f32 %v4732_v42, %v2593_v30  ;;  %v2594_v60 = vmul.f32 %v4738_v47, %v2593_v30  ;;  %v2597_v8 = vmul.f32 %v4746_v35, %v2593_v30 }
 0x56b   :  { %v2335_v53 = vmax.f32 %v2331_v28, 0.0  ;;  %v2334_v48 = vmax.f32 %v2330_v58, 0.0  ;;  %v2596_v28 = vmul.f32 %v4752_v19, %v2593_v30  ;;  %v2629_v58 = vstv %s3513_s22  ;;  %s3429_s22 = sld [smem:[#allocation9 + $0xf]] }
 0x56d   :  { %2346 = vrot.lane.b32.xlu1 %v2335_v53, %s3650_s25  ;;  %2344 = vrot.lane.b32.xlu0 %v2334_v48, %s3650_s25  ;;  %v2631_v53 = vmul.f32 %v4768_v34, %v2629_v58  ;;  %v2630_v48 = vmul.f32 %v4774_v29, %v2629_v58 }
 0x5db   :  { %v2343_v36 = vpop.permute.xlu1 %2342  ;;  %v2341_v61 = vpop.permute.xlu0 %2340 }
 0x5dc   :  { %2353 = vst.msk [vmem:[#allocation2 + $0x9] sm:$0xff] %vm301_vm5, %v2343_v36  ;;  %2352 = vst.msk [vmem:[#allocation2 + $0x1] sm:$0xff] %vm301_vm5, %v2341_v61  ;;  %v2633_v36 = vmul.f32 %v4782_v55, %v2629_v58  ;;  %v2632_v61 = vmul.f32 %v4788_v32, %v2629_v58 }
 0x5df   :  { %v2347_v59 = vpop.permute.xlu1 %2346  ;;  %v2345_v5 = vpop.permute.xlu0 %2344 }
 0x5e0   :  { %2355 = vst.msk [vmem:[#allocation2 + $0x21] sm:$0xff] %vm301_vm5, %v2347_v59  ;;  %2354 = vst.msk [vmem:[#allocation2 + $0x19] sm:$0xff] %vm301_vm5, %v2345_v5  ;;  %v2655_v59 = vstv %s3514_s23  ;;  %s3442_s23 = sld [smem:[#allocation9 + $0x12]] }
 0x5e1   :  { %v2657_v5 = vmul.f32 %v4768_v34, %v2655_v59 }
 0x5e3   :  { %v4905_v1 = vld [vmem:[#allocation2 + $0x8] sm:$0xff]  ;;  %v4907_v38 = vld [vmem:[#allocation2] sm:$0xff] }
 0x5e4   :  { %5784 = vst [vmem:[#allocation178_spill] sm:$0xff] %v4905_v1  ;;  %5785 = vst [vmem:[#allocation179_spill] sm:$0xff] %v4907_v38  ;;  %v2373_v44 = vmul.f32 %v2371_v37, %v4905_v1  ;;  %v2372_v57 = vmul.f32 %v2371_v37, %v4907_v38  ;;  %v2399_v18 = vmul.f32 %v2397_v11, %v4905_v1  ;;  %v4927_v54 = vld [vmem:[#allocation2 + $0x9] sm:$0xff]  ;;  %v4931_v45 = vld [vmem:[#allocation2 + $0x1] sm:$0xff] }
 0x5e5   :  { %v2398_v7 = vmul.f32 %v2397_v11, %v4907_v38  ;;  %5788 = vst [vmem:[#allocation182_spill] sm:$0xff] %v4927_v54  ;;  %5790 = vst [vmem:[#allocation184_spill] sm:$0xff] %v4931_v45  ;;  %v2439_v16 = vmul.f32 %v4929_v21, %v4927_v54  ;;  %v2438_v26 = vmul.f32 %v4929_v21, %v4931_v45 }
 0x5e6   :  { %2382 = vrot.lane.b32.xlu1 %v2373_v44, %s3647_s15  ;;  %2380 = vrot.lane.b32.xlu0 %v2372_v57, %s3647_s15  ;;  %v2659_v44 = vmul.f32 %v4782_v55, %v2655_v59  ;;  %v2658_v57 = vmul.f32 %v4788_v32, %v2655_v59 }
 0x5e7   :  { %v4913_v63 = vld [vmem:[#allocation2 + $0x20] sm:$0xff]  ;;  %v4915_v13 = vld [vmem:[#allocation2 + $0x18] sm:$0xff] }
 0x5e8   :  { %5786 = vst [vmem:[#allocation180_spill] sm:$0xff] %v4913_v63  ;;  %5787 = vst [vmem:[#allocation181_spill] sm:$0xff] %v4915_v13  ;;  %v2375_v62 = vmul.f32 %v2371_v37, %v4913_v63  ;;  %v2374_v22 = vmul.f32 %v2371_v37, %v4915_v13  ;;  %v2401_v0 = vmul.f32 %v2397_v11, %v4913_v63 }
 0x5e9   :  { %v2400_v12 = vmul.f32 %v2397_v11, %v4915_v13  ;;  %v2656_v37 = vmul.f32 %v4774_v29, %v2655_v59 }
 0x5ea   :  { %2386 = vrot.lane.b32.xlu1 %v2375_v62, %s3647_s15  ;;  %2384 = vrot.lane.b32.xlu0 %v2374_v22, %s3647_s15  ;;  %v2691_v62 = vstv %s3516_s24  ;;  %s3445_s24 = sld [smem:[#allocation9 + $0x15]] }
 0x5eb   :  { %v2693_v22 = vmul.f32 %v4804_v39, %v2691_v62  ;;  %v2692_v11 = vmul.f32 %v4810_v6, %v2691_v62 }
 0x5ee   :  { %2408 = vrot.lane.b32.xlu1 %v2399_v18, %s3648_s17  ;;  %2406 = vrot.lane.b32.xlu0 %v2398_v7, %s3648_s17  ;;  %v2695_v18 = vmul.f32 %v4818_v46, %v2691_v62  ;;  %v2694_v7 = vmul.f32 %v4824_v41, %v2691_v62 }
 0x5f2   :  { %2412 = vrot.lane.b32.xlu1 %v2401_v0, %s3648_s17  ;;  %2410 = vrot.lane.b32.xlu0 %v2400_v12, %s3648_s17  ;;  %v2717_v0 = vstv %s3517_s26  ;;  %s3448_s26 = sld [smem:[#allocation9 + $0x18]] }
 0x5f3   :  { %v2719_v12 = vmul.f32 %v4804_v39, %v2717_v0  ;;  %v2718_v10 = vmul.f32 %v4810_v6, %v2717_v0 }
 0x5f6   :  { %2448 = vrot.lane.b32.xlu1 %v2439_v16, %s3647_s15  ;;  %2446 = vrot.lane.b32.xlu0 %v2438_v26, %s3647_s15  ;;  %v2721_v16 = vmul.f32 %v4818_v46, %v2717_v0  ;;  %v2720_v26 = vmul.f32 %v4824_v41, %v2717_v0 }
 0x5fa   :  { %2578 = vrot.lane.b32.xlu1 %v2569_v49, %s3647_s15  ;;  %2576 = vrot.lane.b32.xlu0 %v2568_v56, %s3647_s15  ;;  %v2977_v49 = vstv %s3529_s2  ;;  %s3461_s2 = sld [smem:[#allocation9 + $0x1b]] }
 0x5fb   :  { %v2979_v56 = vmul.f32 %v4732_v42, %v2977_v49  ;;  %v2980_v30 = vmul.f32 %v4752_v19, %v2977_v49 }
 0x5fe   :  { %2582 = vrot.lane.b32.xlu1 %v2571_v23, %s3647_s15  ;;  %2580 = vrot.lane.b32.xlu0 %v2570_v27, %s3647_s15  ;;  %v2978_v23 = vmul.f32 %v4738_v47, %v2977_v49  ;;  %v2981_v27 = vmul.f32 %v4746_v35, %v2977_v49 }
 0x602   :  { %2604 = vrot.lane.b32.xlu1 %v2595_v15, %s3648_s17  ;;  %2602 = vrot.lane.b32.xlu0 %v2594_v60, %s3648_s17  ;;  %v3003_v15 = vstv %s3530_s1  ;;  %s3464_s1 = sld [smem:[#allocation9 + $0x1e]] }
 0x603   :  { %v3005_v60 = vmul.f32 %v4732_v42, %v3003_v15  ;;  %v3006_v58 = vmul.f32 %v4752_v19, %v3003_v15 }
 0x606   :  { %2608 = vrot.lane.b32.xlu1 %v2597_v8, %s3648_s17  ;;  %2606 = vrot.lane.b32.xlu0 %v2596_v28, %s3648_s17  ;;  %v3004_v8 = vmul.f32 %v4738_v47, %v3003_v15  ;;  %v3007_v28 = vmul.f32 %v4746_v35, %v3003_v15 }
 0x60a   :  { %2640 = vrot.lane.b32.xlu1 %v2631_v53, %s3647_s15  ;;  %2638 = vrot.lane.b32.xlu0 %v2630_v48, %s3647_s15  ;;  %v3039_v53 = vstv %s3532_s27  ;;  %s3519_s27 = sld [smem:[#allocation9 + $0x37]] }
 0x60b   :  { %v3041_v48 = vmul.f32 %v4768_v34, %v3039_v53  ;;  %v3042_v59 = vmul.f32 %v4788_v32, %v3039_v53 }
 0x60e   :  { %2644 = vrot.lane.b32.xlu1 %v2633_v36, %s3647_s15  ;;  %2642 = vrot.lane.b32.xlu0 %v2632_v61, %s3647_s15  ;;  %v3040_v36 = vmul.f32 %v4774_v29, %v3039_v53  ;;  %v3043_v61 = vmul.f32 %v4782_v55, %v3039_v53 }
 0x612   :  { %2666 = vrot.lane.b32.xlu1 %v2657_v5, %s3648_s17  ;;  %2664 = vrot.lane.b32.xlu0 %v2656_v37, %s3648_s17  ;;  %v3065_v5 = vstv %s3533_s28  ;;  %s3467_s28 = sld [smem:[#allocation9 + $0x21]] }
 0x613   :  { %v3067_v37 = vmul.f32 %v4768_v34, %v3065_v5  ;;  %v3068_v62 = vmul.f32 %v4788_v32, %v3065_v5 }
 0x616   :  { %2670 = vrot.lane.b32.xlu1 %v2659_v44, %s3648_s17  ;;  %2668 = vrot.lane.b32.xlu0 %v2658_v57, %s3648_s17  ;;  %v3066_v44 = vmul.f32 %v4774_v29, %v3065_v5  ;;  %v3069_v57 = vmul.f32 %v4782_v55, %v3065_v5 }
 0x61a   :  { %2702 = vrot.lane.b32.xlu1 %v2693_v22, %s3647_s15  ;;  %2700 = vrot.lane.b32.xlu0 %v2692_v11, %s3647_s15  ;;  %v3101_v22 = vstv %s3535_s29  ;;  %s3520_s29 = sld [smem:[#allocation9 + $0x38]] }
 0x61b   :  { %v3103_v11 = vmul.f32 %v4804_v39, %v3101_v22  ;;  %v3104_v0 = vmul.f32 %v4824_v41, %v3101_v22 }
 0x61e   :  { %2706 = vrot.lane.b32.xlu1 %v2695_v18, %s3647_s15  ;;  %2704 = vrot.lane.b32.xlu0 %v2694_v7, %s3647_s15  ;;  %v3102_v18 = vmul.f32 %v4810_v6, %v3101_v22  ;;  %v3105_v7 = vmul.f32 %v4818_v46, %v3101_v22 }
 0x622   :  { %2728 = vrot.lane.b32.xlu1 %v2719_v12, %s3648_s17  ;;  %2726 = vrot.lane.b32.xlu0 %v2718_v10, %s3648_s17  ;;  %v3127_v12 = vstv %s3536_s30  ;;  %s3480_s30 = sld [smem:[#allocation9 + $0x24]] }
 0x623   :  { %v3129_v10 = vmul.f32 %v4804_v39, %v3127_v12  ;;  %v3130_v49 = vmul.f32 %v4824_v41, %v3127_v12 }
 0x626   :  { %2732 = vrot.lane.b32.xlu1 %v2721_v16, %s3648_s17  ;;  %2730 = vrot.lane.b32.xlu0 %v2720_v26, %s3648_s17  ;;  %v3128_v16 = vmul.f32 %v4810_v6, %v3127_v12  ;;  %v3131_v26 = vmul.f32 %v4818_v46, %v3127_v12 }
 0x62a   :  { %2988 = vrot.lane.b32.xlu1 %v2979_v56, %s3647_s15  ;;  %2986 = vrot.lane.b32.xlu0 %v2978_v23, %s3647_s15 }
 0x62e   :  { %2992 = vrot.lane.b32.xlu1 %v2981_v27, %s3647_s15  ;;  %2990 = vrot.lane.b32.xlu0 %v2980_v30, %s3647_s15 }
 0x632   :  { %3014 = vrot.lane.b32.xlu1 %v3005_v60, %s3648_s17  ;;  %3012 = vrot.lane.b32.xlu0 %v3004_v8, %s3648_s17 }
 0x636   :  { %3018 = vrot.lane.b32.xlu1 %v3007_v28, %s3648_s17  ;;  %3016 = vrot.lane.b32.xlu0 %v3006_v58, %s3648_s17 }
 0x63a   :  { %3050 = vrot.lane.b32.xlu1 %v3041_v48, %s3647_s15  ;;  %3048 = vrot.lane.b32.xlu0 %v3040_v36, %s3647_s15 }
 0x63e   :  { %3054 = vrot.lane.b32.xlu1 %v3043_v61, %s3647_s15  ;;  %3052 = vrot.lane.b32.xlu0 %v3042_v59, %s3647_s15 }
 0x642   :  { %3076 = vrot.lane.b32.xlu1 %v3067_v37, %s3648_s17  ;;  %3074 = vrot.lane.b32.xlu0 %v3066_v44, %s3648_s17  ;;  %v2557_v44 = vstv %s3509_s6  ;;  %s3522_s6 = sld [smem:[#allocation9 + $0x3a]] }
 0x643   :  { %v2559_v22 = vmul.f32 %v4732_v42, %v2557_v44 }
 0x646   :  { %3080 = vrot.lane.b32.xlu1 %v3069_v57, %s3648_s17  ;;  %3078 = vrot.lane.b32.xlu0 %v3068_v62, %s3648_s17 }
 0x64a   :  { %3112 = vrot.lane.b32.xlu1 %v3103_v11, %s3647_s15  ;;  %3110 = vrot.lane.b32.xlu0 %v3102_v18, %s3647_s15  ;;  %v2558_v11 = vmul.f32 %v4738_v47, %v2557_v44  ;;  %v2555_v18 = vstv %s3508_s7  ;;  %s5309_s7 = sld [smem:[#allocation9 + $0x27]] }
 0x64b   :  { %v2563_v12 = vadd.f32 %v2559_v22, %v2555_v18 }
 0x64e   :  { %3116 = vrot.lane.b32.xlu1 %v3105_v7, %s3647_s15  ;;  %3114 = vrot.lane.b32.xlu0 %v3104_v0, %s3647_s15 }
 0x652   :  { %3138 = vrot.lane.b32.xlu1 %v3129_v10, %s3648_s17  ;;  %3136 = vrot.lane.b32.xlu0 %v3128_v16, %s3648_s17  ;;  %v2562_v10 = vadd.f32 %v2558_v11, %v2555_v18  ;;  %v2561_v16 = vmul.f32 %v4746_v35, %v2557_v44 }
 0x656   :  { %3142 = vrot.lane.b32.xlu1 %v3131_v26, %s3648_s17  ;;  %3140 = vrot.lane.b32.xlu0 %v3130_v49, %s3648_s17  ;;  %v2560_v26 = vmul.f32 %v4752_v19, %v2557_v44 }
 0x658   :  { %v5037_v56 = vpop.permute.xlu1 %2382  ;;  %v5039_v23 = vpop.permute.xlu0 %2380 }
 0x659   :  { %5791 = vst [vmem:[#allocation185_spill] sm:$0xff] %v5037_v56  ;;  %5792 = vst [vmem:[#allocation186_spill] sm:$0xff] %v5039_v23 }
 0x65c   :  { %v5041_v27 = vpop.permute.xlu1 %2386  ;;  %v5043_v30 = vpop.permute.xlu0 %2384 }
 0x65d   :  { %5793 = vst [vmem:[#allocation187_spill] sm:$0xff] %v5041_v27  ;;  %5794 = vst [vmem:[#allocation188_spill] sm:$0xff] %v5043_v30 }
 0x660   :  { %v5045_v15 = vpop.permute.xlu1 %2408  ;;  %v5047_v60 = vpop.permute.xlu0 %2406 }
 0x661   :  { %5795 = vst [vmem:[#allocation189_spill] sm:$0xff] %v5045_v15  ;;  %5796 = vst [vmem:[#allocation190_spill] sm:$0xff] %v5047_v60 }
 0x664   :  { %v5049_v8 = vpop.permute.xlu1 %2412  ;;  %v5051_v28 = vpop.permute.xlu0 %2410 }
 0x665   :  { %5797 = vst [vmem:[#allocation191_spill] sm:$0xff] %v5049_v8  ;;  %5798 = vst [vmem:[#allocation192_spill] sm:$0xff] %v5051_v28  ;;  %v2565_v28 = vadd.f32 %v2561_v16, %v2555_v18  ;;  %v2564_v8 = vadd.f32 %v2560_v26, %v2555_v18 }
 0x668   :  { %v5053_v58 = vpop.permute.xlu1 %2448  ;;  %v5055_v53 = vpop.permute.xlu0 %2446 }
 0x669   :  { %5799 = vst [vmem:[#allocation193_spill] sm:$0xff] %v5053_v58  ;;  %5800 = vst [vmem:[#allocation194_spill] sm:$0xff] %v5055_v53  ;;  %v2619_v58 = vstv %s3512_s8  ;;  %s3523_s8 = sld [smem:[#allocation9 + $0x3b]] }
 0x66a   :  { %v2621_v38 = vmul.f32 %v4768_v34, %v2619_v58  ;;  %v2620_v22 = vmul.f32 %v4774_v29, %v2619_v58  ;;  %v2623_v44 = vmul.f32 %v4782_v55, %v2619_v58  ;;  %v2622_v13 = vmul.f32 %v4788_v32, %v2619_v58 }
 0x66c   :  { %v2579_v48 = vpop.permute.xlu1 %2578  ;;  %v2577_v36 = vpop.permute.xlu0 %2576 }
 0x66d   :  { %v2589_v60 = vadd.f32 %v2579_v48, %v2563_v12  ;;  %v2588_v15 = vadd.f32 %v2577_v36, %v2562_v10  ;;  %v2681_v48 = vstv %s3515_s9  ;;  %s3486_s9 = sld [smem:[#allocation9 + $0x2a]] }
 0x66e   :  { %v2685_v21 = vmul.f32 %v4818_v46, %v2681_v48 }
 0x670   :  { %v2583_v61 = vpop.permute.xlu1 %2582  ;;  %v2581_v59 = vpop.permute.xlu0 %2580 }
 0x671   :  { %v2591_v11 = vadd.f32 %v2583_v61, %v2565_v28  ;;  %v2590_v1 = vadd.f32 %v2581_v59, %v2564_v8 }
 0x674   :  { %v2605_v5 = vpop.permute.xlu1 %2604  ;;  %v2603_v37 = vpop.permute.xlu0 %2602 }
 0x675   :  { %v2615_v30 = vadd.f32 %v2605_v5, %v2589_v60  ;;  %v2614_v27 = vadd.f32 %v2603_v37, %v2588_v15  ;;  %v2683_v15 = vmul.f32 %v4804_v39, %v2681_v48  ;;  %v2682_v37 = vmul.f32 %v4810_v6, %v2681_v48 }
 0x677   :  { %v2625_v18 = vadd.f32 %v2621_v38, %v2615_v30  ;;  %v2624_v10 = vadd.f32 %v2620_v22, %v2614_v27 }
 0x678   :  { %v2609_v57 = vpop.permute.xlu1 %2608  ;;  %v2607_v62 = vpop.permute.xlu0 %2606 }
 0x679   :  { %v2617_v36 = vadd.f32 %v2609_v57, %v2591_v11  ;;  %v2616_v12 = vadd.f32 %v2607_v62, %v2590_v1  ;;  %v2684_v1 = vmul.f32 %v4824_v41, %v2681_v48 }
 0x67b   :  { %v2627_v8 = vadd.f32 %v2623_v44, %v2617_v36  ;;  %v2626_v61 = vadd.f32 %v2622_v13, %v2616_v12 }
 0x67c   :  { %v2641_v7 = vpop.permute.xlu1 %2640  ;;  %v2639_v0 = vpop.permute.xlu0 %2638 }
 0x67d   :  { %v2651_v16 = vadd.f32 %v2641_v7, %v2625_v18  ;;  %v2650_v60 = vadd.f32 %v2639_v0, %v2624_v10 }
 0x680   :  { %v2645_v49 = vpop.permute.xlu1 %2644  ;;  %v2643_v53 = vpop.permute.xlu0 %2642 }
 0x681   :  { %v2653_v58 = vadd.f32 %v2645_v49, %v2627_v8  ;;  %v2652_v54 = vadd.f32 %v2643_v53, %v2626_v61  ;;  %v2967_v8 = vstv %s3528_s3  ;;  %s3525_s3 = sld [smem:[#allocation9 + $0x3d]] }
 0x684   :  { %v2667_v23 = vpop.permute.xlu1 %2666  ;;  %v2665_v56 = vpop.permute.xlu0 %2664 }
 0x685   :  { %v2677_v59 = vadd.f32 %v2667_v23, %v2651_v16  ;;  %v2676_v26 = vadd.f32 %v2665_v56, %v2650_v60 }
 0x687   :  { %v2687_v62 = vadd.f32 %v2683_v15, %v2677_v59  ;;  %v2686_v7 = vadd.f32 %v2682_v37, %v2676_v26  ;;  %v2969_v26 = vmul.f32 %v4732_v42, %v2967_v8 }
 0x688   :  { %v2671_v63 = vpop.permute.xlu1 %2670  ;;  %v2669_v45 = vpop.permute.xlu0 %2668 }
 0x689   :  { %v2679_v27 = vadd.f32 %v2671_v63, %v2653_v58  ;;  %v2678_v30 = vadd.f32 %v2669_v45, %v2652_v54  ;;  %v2968_v58 = vmul.f32 %v4738_v47, %v2967_v8 }
 0x68b   :  { %v2689_v44 = vadd.f32 %v2685_v21, %v2679_v27  ;;  %v2688_v13 = vadd.f32 %v2684_v1, %v2678_v30 }
 0x68c   :  { %v2703_v5 = vpop.permute.xlu1 %2702  ;;  %v2701_v28 = vpop.permute.xlu0 %2700 }
 0x68d   :  { %v2713_v0 = vadd.f32 %v2703_v5, %v2687_v62  ;;  %v2712_v22 = vadd.f32 %v2701_v28, %v2686_v7  ;;  %v2971_v62 = vmul.f32 %v4746_v35, %v2967_v8  ;;  %v2970_v7 = vmul.f32 %v4752_v19, %v2967_v8 }
 0x690   :  { %v2707_v57 = vpop.permute.xlu1 %2706  ;;  %v2705_v38 = vpop.permute.xlu0 %2704 }
 0x691   :  { %v2715_v49 = vadd.f32 %v2707_v57, %v2689_v44  ;;  %v2714_v53 = vadd.f32 %v2705_v38, %v2688_v13  ;;  %v2965_v57 = vstv %s3527_s10  ;;  %s3499_s10 = sld [smem:[#allocation9 + $0x2d]] }
 0x692   :  { %v2973_v27 = vadd.f32 %v2969_v26, %v2965_v57  ;;  %v2972_v30 = vadd.f32 %v2968_v58, %v2965_v57  ;;  %v2975_v13 = vadd.f32 %v2971_v62, %v2965_v57 }
 0x694   :  { %v2729_v11 = vpop.permute.xlu1 %2728  ;;  %v2727_v18 = vpop.permute.xlu0 %2726 }
 0x695   :  { %v2739_v23 = vadd.f32 %v2729_v11, %v2713_v0  ;;  %v2738_v56 = vadd.f32 %v2727_v18, %v2712_v22  ;;  %v3029_v11 = vstv %s3531_s11  ;;  %s5369_s11 = sld [smem:[#allocation9 + $0x3e]] }
 0x696   :  { %v3033_v19 = vmul.f32 %v4782_v55, %v3029_v11 }
 0x697   :  { %v2743_v36 = vmax.f32 %v2739_v23, 0.0  ;;  %v2742_v12 = vmax.f32 %v2738_v56, 0.0  ;;  %v2974_v23 = vadd.f32 %v2970_v7, %v2965_v57 }
 0x698   :  { %v2733_v10 = vpop.permute.xlu1 %2732  ;;  %v2731_v16 = vpop.permute.xlu0 %2730 }
 0x699   :  { %v2741_v48 = vadd.f32 %v2733_v10, %v2715_v49  ;;  %v2740_v60 = vadd.f32 %v2731_v16, %v2714_v53  ;;  %2752 = vrot.lane.b32.xlu1 %v2743_v36, %s3650_s25  ;;  %2750 = vrot.lane.b32.xlu0 %v2742_v12, %s3650_s25  ;;  %v3031_v53 = vmul.f32 %v4768_v34, %v3029_v11 }
 0x69a   :  { %v3030_v36 = vmul.f32 %v4774_v29, %v3029_v11  ;;  %v3032_v10 = vmul.f32 %v4788_v32, %v3029_v11  ;;  %v311_v32 = vstv %s310_s12  ;;  %s5401_s12 = sld [smem:[#allocation9 + $0x40]] }
 0x69b   :  { %v2745_v63 = vmax.f32 %v2741_v48, 0.0  ;;  %v2744_v54 = vmax.f32 %v2740_v60, 0.0  ;;  %v3091_v60 = vstv %s3534_s0  ;;  %v312_v7 = vmul.f32 %v311_v32, %v3959_v3  ;;  %s5386_s0 = sld [smem:[#allocation9 + $0x30]] }
 0x69c   :  { %v2989_v45 = vpop.permute.xlu1 %2988  ;;  %v2987_v15 = vpop.permute.xlu0 %2986  ;;  %v3093_v34 = vmul.f32 %v4804_v39, %v3091_v60  ;;  %v3092_v29 = vmul.f32 %v4810_v6, %v3091_v60  ;;  %v313_v11 = vmul.f32 %v311_v32, %v3963_v43 }
 0x69d   :  { %2756 = vrot.lane.b32.xlu1 %v2745_v63, %s3650_s25  ;;  %2754 = vrot.lane.b32.xlu0 %v2744_v54, %s3650_s25  ;;  %v2999_v18 = vadd.f32 %v2989_v45, %v2973_v27  ;;  %v2998_v44 = vadd.f32 %v2987_v15, %v2972_v30  ;;  %v3094_v30 = vmul.f32 %v4824_v41, %v3091_v60 }
 0x69e   :  { %v314_v41 = vmul.f32 %v311_v32, %v3975_v20 }
 0x6a0   :  { %v2993_v21 = vpop.permute.xlu1 %2992  ;;  %v2991_v5 = vpop.permute.xlu0 %2990 }
 0x6a1   :  { %v3001_v35 = vadd.f32 %v2993_v21, %v2975_v13  ;;  %v3000_v12 = vadd.f32 %v2991_v5, %v2974_v23 }
 0x6a4   :  { %v3015_v37 = vpop.permute.xlu1 %3014  ;;  %v3013_v28 = vpop.permute.xlu0 %3012 }
 0x6a5   :  { %v3025_v47 = vadd.f32 %v3015_v37, %v2999_v18  ;;  %v3024_v49 = vadd.f32 %v3013_v28, %v2998_v44  ;;  %v315_v18 = vmul.f32 %v311_v32, %v3977_v51  ;;  %v5803_v32 = vld [vmem:[#allocation37_spill] sm:$0xff] }
 0x6a7   :  { %v3035_v45 = vadd.f32 %v3031_v53, %v3025_v47  ;;  %v3034_v15 = vadd.f32 %v3030_v36, %v3024_v49 }
 0x6a8   :  { %v3019_v61 = vpop.permute.xlu1 %3018  ;;  %v3017_v59 = vpop.permute.xlu0 %3016 }
 0x6a9   :  { %v3027_v63 = vadd.f32 %v3019_v61, %v3001_v35  ;;  %v3026_v54 = vadd.f32 %v3017_v59, %v3000_v12  ;;  %v3095_v61 = vmul.f32 %v4818_v46, %v3091_v60  ;;  %v92_v46 = vstv %s5556_s4  ;;  %s5096_s4 = sld [smem:[#allocation9 + $0x32]] }
 0x6aa   :  { %v317_v3 = vadd.f32 %v313_v11, %v92_v46  ;;  %v316_v49 = vadd.f32 %v312_v7, %v92_v46  ;;  %v319_v43 = vadd.f32 %v315_v18, %v92_v46  ;;  %v5809_v11 = vld [vmem:[#allocation182_spill] sm:$0xff] }
 0x6ab   :  { %v3037_v5 = vadd.f32 %v3033_v19, %v3027_v63  ;;  %v3036_v26 = vadd.f32 %v3032_v10, %v3026_v54  ;;  %v318_v10 = vadd.f32 %v314_v41, %v92_v46  ;;  %v5810_v46 = vld [vmem:[#allocation184_spill] sm:$0xff] }
 0x6ac   :  { %v3051_v1 = vpop.permute.xlu1 %3050  ;;  %v3049_v38 = vpop.permute.xlu0 %3048  ;;  %v343_v12 = vadd.f32 %v4125_v2, %v317_v3  ;;  %v342_v19 = vadd.f32 %v4127_v17, %v316_v49  ;;  %v345_v60 = vadd.f32 %v4137_v24, %v319_v43  ;;  %v5815_v43 = vld [vmem:[#allocation17_spill] sm:$0xff] }
 0x6ad   :  { %v3061_v37 = vadd.f32 %v3051_v1, %v3035_v45  ;;  %v3060_v28 = vadd.f32 %v3049_v38, %v3034_v15  ;;  %v344_v2 = vadd.f32 %v4139_v25, %v318_v10 }
 0x6ae   :  { %v369_v17 = vadd.f32 %v4149_v33, %v343_v12  ;;  %v368_v45 = vadd.f32 %v4151_v31, %v342_v19  ;;  %v371_v15 = vadd.f32 %v4157_v9, %v345_v60  ;;  %v5816_v19 = vld [vmem:[#allocation48_spill] sm:$0xff]  ;;  %v2503_v60 = vstv %s3506_s19  ;;  %s3544_s19 = sld [smem:[#allocation9 + $0x46]] }
 0x6b0   :  { %v3055_v0 = vpop.permute.xlu1 %3054  ;;  %v3053_v22 = vpop.permute.xlu0 %3052 }
 0x6b1   :  { %v3063_v57 = vadd.f32 %v3055_v0, %v3037_v5  ;;  %v3062_v27 = vadd.f32 %v3053_v22, %v3036_v26 }
 0x6b4   :  { %v3077_v42 = vpop.permute.xlu1 %3076  ;;  %v3075_v56 = vpop.permute.xlu0 %3074 }
 0x6b5   :  { %v3087_v55 = vadd.f32 %v3077_v42, %v3061_v37  ;;  %v3086_v58 = vadd.f32 %v3075_v56, %v3060_v28 }
 0x6b7   :  { %v3097_v62 = vadd.f32 %v3093_v34, %v3087_v55  ;;  %v3096_v6 = vadd.f32 %v3092_v29, %v3086_v58  ;;  %v5111_v29 = vld [vmem:[#allocation2 + $0x21] sm:$0xff] }
 0x6b8   :  { %v3081_v16 = vpop.permute.xlu1 %3080  ;;  %v3079_v48 = vpop.permute.xlu0 %3078  ;;  %v5802_v55 = vld [vmem:[#allocation36_spill] sm:$0xff] }
 0x6b9   :  { %v3089_v39 = vadd.f32 %v3081_v16, %v3063_v57  ;;  %v3088_v38 = vadd.f32 %v3079_v48, %v3062_v27  ;;  %v377_v48 = vstv %s5085_s13  ;;  %v2463_v57 = vstv %s5096_s4  ;;  %v5804_v27 = vld [vmem:[#allocation40_spill] sm:$0xff]  ;;  %s5420_s13 = sld [smem:[#allocation9 + $0x33]]  ;;  %s3518_s4 = sld [smem:[#allocation9 + $0x36]] }
 0x6ba   :  { %v379_v24 = vmul.f32 %v377_v48, %v3955_v40  ;;  %v378_v34 = vmul.f32 %v377_v48, %v3965_v14  ;;  %v381_v25 = vmul.f32 %v377_v48, %v3971_v50  ;;  %v380_v33 = vmul.f32 %v377_v48, %v3979_v52  ;;  %v5801_v14 = vld [vmem:[#allocation183_spill] sm:$0xff]  ;;  %v5805_v52 = vld [vmem:[#allocation41_spill] sm:$0xff] }
 0x6bb   :  { %v3099_v23 = vadd.f32 %v3095_v61, %v3089_v39  ;;  %v3098_v42 = vadd.f32 %v3094_v30, %v3088_v38  ;;  %v2441_v5 = vmul.f32 %v5801_v14, %v5111_v29  ;;  %v5807_v38 = vld [vmem:[#allocation43_spill] sm:$0xff]  ;;  %v2465_v18 = vmul.f32 %v2463_v57, %v5809_v11  ;;  %v5147_v48 = vld [vmem:[#allocation2 + $0xa] sm:$0xff] }
 0x6bc   :  { %v3113_v8 = vpop.permute.xlu1 %3112  ;;  %v3111_v21 = vpop.permute.xlu0 %3110  ;;  %v383_v31 = vadd.f32 %v379_v24, %v369_v17  ;;  %v382_v40 = vadd.f32 %v378_v34, %v368_v45  ;;  %v385_v9 = vadd.f32 %v381_v25, %v371_v15  ;;  %v5819_v45 = vld [vmem:[#allocation53_spill] sm:$0xff]  ;;  %v5821_v24 = vld [vmem:[#allocation55_spill] sm:$0xff] }
 0x6bd   :  { %v3123_v0 = vadd.f32 %v3113_v8, %v3097_v62  ;;  %v3122_v22 = vadd.f32 %v3111_v21, %v3096_v6  ;;  %v370_v8 = vadd.f32 %v4159_v4, %v344_v2  ;;  %v5113_v21 = vld [vmem:[#allocation2 + $0x19] sm:$0xff] }
 0x6be   :  { %v2440_v4 = vmul.f32 %v5801_v14, %v5113_v21  ;;  %v409_v58 = vadd.f32 %v5802_v55, %v383_v31  ;;  %v408_v50 = vadd.f32 %v5803_v32, %v382_v40  ;;  %v411_v61 = vadd.f32 %v5804_v27, %v385_v9  ;;  %v5808_v6 = vld [vmem:[#allocation44_spill] sm:$0xff]  ;;  %v5823_v40 = vld [vmem:[#allocation18_spill] sm:$0xff]  ;;  %v5824_v14 = vld [vmem:[#allocation19_spill] sm:$0xff] }
 0x6bf   :  { %v384_v26 = vadd.f32 %v380_v33, %v370_v8  ;;  %v5822_v8 = vld [vmem:[#allocation56_spill] sm:$0xff]  ;;  %v2505_v33 = vmul.f32 %v2503_v60, %v5147_v48 }
 0x6c0   :  { %v3117_v59 = vpop.permute.xlu1 %3116  ;;  %v3115_v1 = vpop.permute.xlu0 %3114  ;;  %v434_v62 = vadd.f32 %v5807_v38, %v408_v50  ;;  %v437_v7 = vadd.f32 %v5808_v6, %v411_v61  ;;  %v5163_v55 = vld [vmem:[#allocation2 + $0x22] sm:$0xff]  ;;  %v5828_v38 = vld [vmem:[#allocation58_spill] sm:$0xff]  ;;  %v5829_v6 = vld [vmem:[#allocation59_spill] sm:$0xff] }
 0x6c1   :  { %v3125_v53 = vadd.f32 %v3117_v59, %v3099_v23  ;;  %v3124_v51 = vadd.f32 %v3115_v1, %v3098_v42  ;;  %v443_v59 = vstv %s5100_s18  ;;  %v410_v30 = vadd.f32 %v5805_v52, %v384_v26  ;;  %v5806_v1 = vld [vmem:[#allocation42_spill] sm:$0xff]  ;;  %v5813_v23 = vld [vmem:[#allocation45_spill] sm:$0xff]  ;;  %v5826_v32 = vld [vmem:[#allocation20_spill] sm:$0xff]  ;;  %s3542_s18 = sld [smem:[#allocation9 + $0x44]] }
 0x6c2   :  { %v435_v39 = vadd.f32 %v5806_v1, %v409_v58  ;;  %v5165_v58 = vld [vmem:[#allocation2 + $0x1a] sm:$0xff]  ;;  %v5827_v61 = vld [vmem:[#allocation21_spill] sm:$0xff] }
 0x6c3   :  { %v436_v42 = vadd.f32 %v5813_v23, %v410_v30  ;;  %v2507_v30 = vmul.f32 %v2503_v60, %v5163_v55  ;;  %v2506_v1 = vmul.f32 %v2503_v60, %v5165_v58  ;;  %v5832_v23 = vld [vmem:[#allocation62_spill] sm:$0xff] }
 0x6c4   :  { %v3139_v44 = vpop.permute.xlu1 %3138  ;;  %v3137_v13 = vpop.permute.xlu0 %3136 }
 0x6c5   :  { %v3149_v56 = vadd.f32 %v3139_v44, %v3123_v0  ;;  %v3148_v47 = vadd.f32 %v3137_v13, %v3122_v22  ;;  %v2464_v0 = vmul.f32 %v2463_v57, %v5810_v46  ;;  %v5811_v22 = vld [vmem:[#allocation14_spill] sm:$0xff]  ;;  %v5812_v44 = vld [vmem:[#allocation15_spill] sm:$0xff] }
 0x6c6   :  { %v445_v41 = vmul.f32 %v443_v59, %v5811_v22  ;;  %v444_v13 = vmul.f32 %v443_v59, %v5812_v44  ;;  %v5831_v44 = vld [vmem:[#allocation61_spill] sm:$0xff] }
 0x6c7   :  { %v3153_v36 = vmax.f32 %v3149_v56, 0.0  ;;  %v3152_v35 = vmax.f32 %v3148_v47, 0.0  ;;  %v5814_v56 = vld [vmem:[#allocation16_spill] sm:$0xff] }
 0x6c8   :  { %v3143_v20 = vpop.permute.xlu1 %3142  ;;  %v3141_v16 = vpop.permute.xlu0 %3140  ;;  %v447_v47 = vmul.f32 %v443_v59, %v5814_v56  ;;  %v449_v3 = vadd.f32 %v445_v41, %v435_v39  ;;  %v448_v49 = vadd.f32 %v444_v13, %v434_v62  ;;  %v787_v41 = vstv %s3426_s21  ;;  %v5833_v56 = vld [vmem:[#allocation63_spill] sm:$0xff]  ;;  %s3540_s21 = sld [smem:[#allocation9 + $0x42]] }
 0x6c9   :  { %v3151_v63 = vadd.f32 %v3143_v20, %v3125_v53  ;;  %v3150_v54 = vadd.f32 %v3141_v16, %v3124_v51  ;;  %3162 = vrot.lane.b32.xlu1 %v3153_v36, %s3650_s25  ;;  %3160 = vrot.lane.b32.xlu0 %v3152_v35, %s3650_s25  ;;  %v446_v53 = vmul.f32 %v443_v59, %v5815_v43  ;;  %v5817_v20 = vld [vmem:[#allocation49_spill] sm:$0xff] }
 0x6ca   :  { %v451_v51 = vadd.f32 %v447_v47, %v437_v7  ;;  %v2467_v36 = vmul.f32 %v2463_v57, %v5111_v29  ;;  %v2466_v35 = vmul.f32 %v2463_v57, %v5113_v21  ;;  %v475_v10 = vadd.f32 %v5816_v19, %v449_v3  ;;  %v5834_v3 = vld [vmem:[#allocation64_spill] sm:$0xff]  ;;  %v5837_v19 = vld [vmem:[#allocation65_spill] sm:$0xff] }
 0x6cb   :  { %v3155_v37 = vmax.f32 %v3151_v63, 0.0  ;;  %v3154_v28 = vmax.f32 %v3150_v54, 0.0  ;;  %v450_v12 = vadd.f32 %v446_v53, %v436_v42  ;;  %v474_v16 = vadd.f32 %v5817_v20, %v448_v49  ;;  %v5149_v63 = vld [vmem:[#allocation2 + $0x2] sm:$0xff] }
 0x6cc   :  { %v5818_v54 = vld [vmem:[#allocation52_spill] sm:$0xff]  ;;  %v2504_v31 = vmul.f32 %v2503_v60, %v5149_v63 }
 0x6cd   :  { %3166 = vrot.lane.b32.xlu1 %v3155_v37, %s3650_s25  ;;  %3164 = vrot.lane.b32.xlu0 %v3154_v28, %s3650_s25  ;;  %s3423_s25 = sld [smem:[#allocation9 + $0x9]]  ;;  %v477_v2 = vadd.f32 %v5818_v54, %v451_v51  ;;  %v476_v15 = vadd.f32 %v5819_v45, %v450_v12  ;;  %v5820_v37 = vld [vmem:[#allocation54_spill] sm:$0xff]  ;;  %v500_v34 = vadd.f32 %v5821_v24, %v474_v16  ;;  %v5838_v20 = vld [vmem:[#allocation24_spill] sm:$0xff] }
 0x6ce   :  { %v501_v28 = vadd.f32 %v5820_v37, %v475_v10  ;;  %v5835_v51 = vld [vmem:[#allocation22_spill] sm:$0xff]  ;;  %v791_v16 = vmul.f32 %v787_v41, %v5838_v20  ;;  %v5860_v20 = vld [vmem:[#allocation31_spill] sm:$0xff] }
 0x6cf   :  { %v503_v25 = vadd.f32 %v5822_v8, %v477_v2  ;;  %v5839_v2 = vld [vmem:[#allocation25_spill] sm:$0xff]  ;;  %v5840_v24 = vld [vmem:[#allocation66_spill] sm:$0xff]  ;;  %v5841_v8 = vld [vmem:[#allocation67_spill] sm:$0xff] }
 0x6d1   :  { %2452 = vrot.lane.b32.xlu1 %v2441_v5, %s3647_s15  ;;  %2450 = vrot.lane.b32.xlu0 %v2440_v4, %s3647_s15  ;;  %v5825_v4 = vld [vmem:[#allocation57_spill] sm:$0xff] }
 0x6d2   :  { %v502_v26 = vadd.f32 %v5825_v4, %v476_v15 }
 0x6d3   :  { %v721_v17 = vstv %s3423_s25  ;;  %s3545_s25 = sld [smem:[#allocation9 + $0x47]] }
 0x6d4   :  { %v723_v9 = vmul.f32 %v721_v17, %v5823_v40  ;;  %v722_v5 = vmul.f32 %v721_v17, %v5824_v14  ;;  %v725_v50 = vmul.f32 %v721_v17, %v5826_v32  ;;  %v724_v59 = vmul.f32 %v721_v17, %v5827_v61 }
 0x6d5   :  { %2474 = vrot.lane.b32.xlu1 %v2465_v18, %s3648_s17  ;;  %2472 = vrot.lane.b32.xlu0 %v2464_v0, %s3648_s17  ;;  %v2529_v18 = vstv %s3507_s20  ;;  %v5830_v0 = vld [vmem:[#allocation60_spill] sm:$0xff]  ;;  %v790_v17 = vmul.f32 %v787_v41, %v5839_v2  ;;  %v853_v40 = vstv %s3429_s22  ;;  %s3521_s20 = sld [smem:[#allocation9 + $0x39]]  ;;  %s3543_s22 = sld [smem:[#allocation9 + $0x45]] }
 0x6d6   :  { %v727_v57 = vadd.f32 %v723_v9, %v501_v28  ;;  %v726_v27 = vadd.f32 %v722_v5, %v500_v34  ;;  %v729_v52 = vadd.f32 %v725_v50, %v503_v25  ;;  %v728_v39 = vadd.f32 %v724_v59, %v502_v26  ;;  %v5843_v9 = vld [vmem:[#allocation69_spill] sm:$0xff]  ;;  %v5844_v5 = vld [vmem:[#allocation70_spill] sm:$0xff]  ;;  %v5845_v26 = vld [vmem:[#allocation71_spill] sm:$0xff] }
 0x6d7   :  { %v2531_v43 = vmul.f32 %v2529_v18, %v5147_v48  ;;  %v2530_v53 = vmul.f32 %v2529_v18, %v5149_v63  ;;  %v2533_v15 = vmul.f32 %v2529_v18, %v5163_v55  ;;  %v2532_v37 = vmul.f32 %v2529_v18, %v5165_v58  ;;  %v5846_v50 = vld [vmem:[#allocation72_spill] sm:$0xff]  ;;  %v5848_v59 = vld [vmem:[#allocation26_spill] sm:$0xff] }
 0x6d8   :  { %v753_v62 = vadd.f32 %v5828_v38, %v727_v57  ;;  %v752_v7 = vadd.f32 %v5829_v6, %v726_v27  ;;  %v755_v22 = vadd.f32 %v5830_v0, %v729_v52  ;;  %v754_v13 = vadd.f32 %v5831_v44, %v728_v39  ;;  %v5847_v27 = vld [vmem:[#allocation27_spill] sm:$0xff]  ;;  %v5850_v39 = vld [vmem:[#allocation29_spill] sm:$0xff]  ;;  %v5862_v2 = vld [vmem:[#allocation32_spill] sm:$0xff] }
 0x6d9   :  { %2478 = vrot.lane.b32.xlu1 %v2467_v36, %s3648_s17  ;;  %2476 = vrot.lane.b32.xlu0 %v2466_v35, %s3648_s17  ;;  %v789_v36 = vmul.f32 %v787_v41, %v5835_v51  ;;  %v5836_v35 = vld [vmem:[#allocation23_spill] sm:$0xff]  ;;  %v855_v61 = vmul.f32 %v853_v40, %v5847_v27  ;;  %v854_v52 = vmul.f32 %v853_v40, %v5848_v59  ;;  %v5870_v27 = vld [vmem:[#allocation88_spill] sm:$0xff]  ;;  %v5871_v59 = vld [vmem:[#allocation34_spill] sm:$0xff] }
 0x6da   :  { %v779_v42 = vadd.f32 %v5832_v23, %v753_v62  ;;  %v778_v47 = vadd.f32 %v5833_v56, %v752_v7  ;;  %v781_v49 = vadd.f32 %v5834_v3, %v755_v22  ;;  %v788_v12 = vmul.f32 %v787_v41, %v5836_v35  ;;  %v5851_v7 = vld [vmem:[#allocation28_spill] sm:$0xff]  ;;  %v5852_v41 = vld [vmem:[#allocation74_spill] sm:$0xff]  ;;  %v5855_v3 = vld [vmem:[#allocation77_spill] sm:$0xff] }
 0x6db   :  { %v780_v10 = vadd.f32 %v5837_v19, %v754_v13  ;;  %v857_v38 = vmul.f32 %v853_v40, %v5850_v39  ;;  %v856_v18 = vmul.f32 %v853_v40, %v5851_v7  ;;  %v5853_v13 = vld [vmem:[#allocation75_spill] sm:$0xff]  ;;  %v5858_v35 = vld [vmem:[#allocation80_spill] sm:$0xff]  ;;  %v5859_v19 = vld [vmem:[#allocation30_spill] sm:$0xff] }
 0x6dc   :  { %v793_v60 = vadd.f32 %v789_v36, %v779_v42  ;;  %v792_v54 = vadd.f32 %v788_v12, %v778_v47  ;;  %v795_v45 = vadd.f32 %v791_v16, %v781_v49  ;;  %v5854_v42 = vld [vmem:[#allocation76_spill] sm:$0xff]  ;;  %v1131_v47 = vstv %s3442_s23  ;;  %v5857_v51 = vld [vmem:[#allocation79_spill] sm:$0xff]  ;;  %v5873_v39 = vld [vmem:[#allocation89_spill] sm:$0xff]  ;;  %s3651_s23 = smov [#allocation10]  }
 0x6dd   :  { %2514 = vrot.lane.b32.xlu1 %v2505_v33, %s3647_s15  ;;  %2512 = vrot.lane.b32.xlu0 %v2504_v31, %s3647_s15  ;;  %v794_v28 = vadd.f32 %v790_v17, %v780_v10  ;;  %v5842_v33 = vld [vmem:[#allocation68_spill] sm:$0xff]  ;;  %v1133_v10 = vmul.f32 %v1131_v47, %v5859_v19  ;;  %v1132_v16 = vmul.f32 %v1131_v47, %v5860_v20  ;;  %v5883_v20 = vld [vmem:[#allocation46_spill] sm:$0xff] }
 0x6de   :  { %v819_v34 = vadd.f32 %v5840_v24, %v793_v60  ;;  %v818_v25 = vadd.f32 %v5841_v8, %v792_v54  ;;  %v821_v31 = vadd.f32 %v5842_v33, %v795_v45  ;;  %v5861_v60 = vld [vmem:[#allocation81_spill] sm:$0xff]  ;;  %v1135_v17 = vmul.f32 %v1131_v47, %v5862_v2  ;;  %v5864_v8 = vld [vmem:[#allocation82_spill] sm:$0xff]  ;;  %v5865_v33 = vld [vmem:[#allocation83_spill] sm:$0xff] }
 0x6df   :  { %v820_v14 = vadd.f32 %v5843_v9, %v794_v28  ;;  %v5866_v40 = vld [vmem:[#allocation84_spill] sm:$0xff]  ;;  %v5885_v2 = vld [vmem:[#allocation97_spill] sm:$0xff] }
 0x6e0   :  { %v845_v4 = vadd.f32 %v5844_v5, %v819_v34  ;;  %v844_v32 = vadd.f32 %v5845_v26, %v818_v25  ;;  %v847_v57 = vadd.f32 %v5846_v50, %v821_v31  ;;  %v5867_v5 = vld [vmem:[#allocation85_spill] sm:$0xff]  ;;  %v5868_v26 = vld [vmem:[#allocation86_spill] sm:$0xff]  ;;  %v5869_v50 = vld [vmem:[#allocation87_spill] sm:$0xff] }
 0x6e1   :  { %2518 = vrot.lane.b32.xlu1 %v2507_v30, %s3647_s15  ;;  %2516 = vrot.lane.b32.xlu0 %v2506_v1, %s3647_s15  ;;  %v5849_v30 = vld [vmem:[#allocation73_spill] sm:$0xff]  ;;  %v5882_v19 = vld [vmem:[#allocation96_spill] sm:$0xff] }
 0x6e2   :  { %v846_v1 = vadd.f32 %v5849_v30, %v820_v14  ;;  %v859_v62 = vadd.f32 %v855_v61, %v845_v4  ;;  %v858_v6 = vadd.f32 %v854_v52, %v844_v32  ;;  %v861_v0 = vadd.f32 %v857_v38, %v847_v57  ;;  %v5872_v30 = vld [vmem:[#allocation35_spill] sm:$0xff] }
 0x6e3   :  { %v1197_v14 = vstv %s3445_s24  ;;  %s3384_s24 = sshll.u32 %s3651_s23, 4  ;;  %s3385_s24 = int_to_ptr.vmem [resolvable:$true] %s3384_s24 }
 0x6e4   :  { %v860_v22 = vadd.f32 %v856_v18, %v846_v1  ;;  %v885_v44 = vadd.f32 %v5852_v41, %v859_v62  ;;  %v884_v23 = vadd.f32 %v5853_v13, %v858_v6  ;;  %v887_v56 = vadd.f32 %v5854_v42, %v861_v0  ;;  %v5874_v62 = vld [vmem:[#allocation38_spill] sm:$0xff]  ;;  %v5875_v0 = vld [vmem:[#allocation39_spill] sm:$0xff]  ;;  %p3621_p2 = scmp.lt.s32.totalorder %s3385_s24, %s3385_s24 }
 0x6e5   :  { %2540 = vrot.lane.b32.xlu1 %v2531_v43, %s3648_s17  ;;  %2538 = vrot.lane.b32.xlu0 %v2530_v53, %s3648_s17  ;;  %v5856_v43 = vld [vmem:[#allocation78_spill] sm:$0xff]  ;;  %v1199_v52 = vmul.f32 %v1197_v14, %v5871_v59  ;;  %v1198_v1 = vmul.f32 %v1197_v14, %v5872_v30  ;;  %v1201_v6 = vmul.f32 %v1197_v14, %v5874_v62  ;;  %v5877_v42 = vld [vmem:[#allocation91_spill] sm:$0xff]  ;;  %v5894_v59 = vld [vmem:[#allocation101_spill] sm:$0xff] }
 0x6e6   :  { %v886_v49 = vadd.f32 %v5855_v3, %v860_v22  ;;  %v911_v53 = vadd.f32 %v5856_v43, %v885_v44  ;;  %v910_v36 = vadd.f32 %v5857_v51, %v884_v23  ;;  %v913_v12 = vadd.f32 %v5858_v35, %v887_v56  ;;  %v5876_v13 = vld [vmem:[#allocation90_spill] sm:$0xff]  ;;  %v5879_v43 = vld [vmem:[#allocation93_spill] sm:$0xff]  ;;  %v5881_v35 = vld [vmem:[#allocation95_spill] sm:$0xff] }
 0x6e7   :  { %v1200_v22 = vmul.f32 %v1197_v14, %v5875_v0  ;;  %v5880_v51 = vld [vmem:[#allocation94_spill] sm:$0xff]  ;;  %v5895_v30 = vld [vmem:[#allocation109_spill] sm:$0xff]  ;;  %v5897_v62 = vld [vmem:[#allocation103_spill] sm:$0xff] }
 0x6e8   :  { %v912_v54 = vadd.f32 %v5861_v60, %v886_v49  ;;  %v1137_v45 = vadd.f32 %v1133_v10, %v911_v53  ;;  %v1139_v24 = vadd.f32 %v1135_v17, %v913_v12  ;;  %v1263_v49 = vstv %s3448_s26  ;;  %v5884_v60 = vld [vmem:[#allocation47_spill] sm:$0xff]  ;;  %s3616_s26 = scalar_lea.vmem %s3385_s24, 512 }
 0x6e9   :  { %2544 = vrot.lane.b32.xlu1 %v2533_v15, %s3648_s17  ;;  %2542 = vrot.lane.b32.xlu0 %v2532_v37, %s3648_s17  ;;  %v1136_v15 = vadd.f32 %v1132_v16, %v910_v36  ;;  %v5863_v37 = vld [vmem:[#allocation33_spill] sm:$0xff]  ;;  %v1265_v16 = vmul.f32 %v1263_v49, %v5883_v20  ;;  %v5904_v20 = vld [vmem:[#allocation122_spill] sm:$0xff]  ;;  %p3617_p1 = scmp.ne.s32.totalorder %s3385_s24, %s3616_s26  ;;  %p3622_p3 = scmp.lt.s32.totalorder %s3616_s26, %s3616_s26 }
 0x6ea   :  { %v1134_v28 = vmul.f32 %v1131_v47, %v5863_v37  ;;  %v1163_v25 = vadd.f32 %v5864_v8, %v1137_v45  ;;  %v1165_v9 = vadd.f32 %v5866_v40, %v1139_v24  ;;  %v5878_v47 = vld [vmem:[#allocation92_spill] sm:$0xff]  ;;  %v5886_v45 = vld [vmem:[#allocation50_spill] sm:$0xff]  ;;  %v5887_v24 = vld [vmem:[#allocation51_spill] sm:$0xff]  ;;  %v1541_v8 = vstv %s3461_s2 }
 0x6eb   :  { %v1162_v31 = vadd.f32 %v5865_v33, %v1136_v15  ;;  %v1267_v15 = vmul.f32 %v1263_v49, %v5886_v45  ;;  %v2781_v45 = vstv %s3519_s27  ;;  %p3623_p4 = por %p3622_p3, %p3621_p2 }
 0x6ec   :  { %v1138_v34 = vadd.f32 %v1134_v28, %v912_v54  ;;  %v1189_v32 = vadd.f32 %v5868_v26, %v1163_v25  ;;  %v1191_v61 = vadd.f32 %v5870_v27, %v1165_v9  ;;  %v1264_v54 = vmul.f32 %v1263_v49, %v5884_v60  ;;  %v5889_v9 = vld [vmem:[#allocation99_spill] sm:$0xff]  ;;  %v5891_v26 = vld [vmem:[#allocation106_spill] sm:$0xff]  ;;  %v5893_v27 = vld [vmem:[#allocation108_spill] sm:$0xff] }
 0x6ed   :  { %v1188_v57 = vadd.f32 %v5869_v50, %v1162_v31  ;;  %v5888_v31 = vld [vmem:[#allocation98_spill] sm:$0xff]  ;;  %v5892_v50 = vld [vmem:[#allocation107_spill] sm:$0xff]  ;;  %p3624_p5 = pnand %p3623_p4, %p3617_p1 }
 0x6ee   :  { %v1164_v4 = vadd.f32 %v5867_v5, %v1138_v34  ;;  %v1203_v7 = vadd.f32 %v1199_v52, %v1189_v32  ;;  %v1205_v41 = vadd.f32 %v1201_v6, %v1191_v61  ;;  %v1266_v34 = vmul.f32 %v1263_v49, %v5887_v24  ;;  %v5890_v5 = vld [vmem:[#allocation100_spill] sm:$0xff]  ;;  %v5901_v49 = vld [vmem:[#allocation119_spill] sm:$0xff] }
 0x6ef   :  { %v1202_v18 = vadd.f32 %v1198_v1, %v1188_v57  ;;  %v1543_v32 = vmul.f32 %v1541_v8, %v5891_v26  ;;  %v1542_v57 = vmul.f32 %v1541_v8, %v5892_v50  ;;  %v1545_v61 = vmul.f32 %v1541_v8, %v5893_v27  ;;  %v5905_v60 = vld [vmem:[#allocation123_spill] sm:$0xff]  ;;  %v5912_v27 = vld [vmem:[#allocation126_spill] sm:$0xff] }
 0x6f0   :  { %v1190_v38 = vadd.f32 %v5873_v39, %v1164_v4  ;;  %v1229_v23 = vadd.f32 %v5876_v13, %v1203_v7  ;;  %v1231_v3 = vadd.f32 %v5878_v47, %v1205_v41  ;;  %v1544_v1 = vmul.f32 %v1541_v8, %v5895_v30  ;;  %v5896_v39 = vld [vmem:[#allocation102_spill] sm:$0xff]  ;;  %v5898_v7 = vld [vmem:[#allocation104_spill] sm:$0xff]  ;;  %v5899_v41 = vld [vmem:[#allocation105_spill] sm:$0xff] }
 0x6f1   :  { %v1228_v56 = vadd.f32 %v5877_v42, %v1202_v18  ;;  %v5900_v47 = vld [vmem:[#allocation118_spill] sm:$0xff]  ;;  %v5914_v30 = vld [vmem:[#allocation128_spill] sm:$0xff] }
 0x6f2   :  { %v1204_v44 = vadd.f32 %v1200_v22, %v1190_v38  ;;  %v1255_v36 = vadd.f32 %v5880_v51, %v1229_v23  ;;  %v1257_v10 = vadd.f32 %v5882_v19, %v1231_v3 }
 0x6f3   :  { %v1254_v12 = vadd.f32 %v5881_v35, %v1228_v56 }
 0x6f4   :  { %v1230_v53 = vadd.f32 %v5879_v43, %v1204_v44  ;;  %v1269_v37 = vadd.f32 %v1265_v16, %v1255_v36  ;;  %v1271_v25 = vadd.f32 %v1267_v15, %v1257_v10  ;;  %v1607_v10 = vstv %s3464_s1  ;;  %v5907_v15 = vld [vmem:[#allocation125_spill] sm:$0xff] }
 0x6f5   :  { %v1268_v28 = vadd.f32 %v1264_v54, %v1254_v12  ;;  %v5903_v12 = vld [vmem:[#allocation121_spill] sm:$0xff] }
 0x6f6   :  { %v1256_v17 = vadd.f32 %v5885_v2, %v1230_v53  ;;  %v1295_v40 = vadd.f32 %v5888_v31, %v1269_v37  ;;  %v1297_v4 = vadd.f32 %v5890_v5, %v1271_v25  ;;  %v5902_v53 = vld [vmem:[#allocation120_spill] sm:$0xff] }
 0x6f7   :  { %v1294_v14 = vadd.f32 %v5889_v9, %v1268_v28  ;;  %v5906_v2 = vld [vmem:[#allocation124_spill] sm:$0xff]  ;;  %v5908_v28 = vld [vmem:[#allocation110_spill] sm:$0xff]  ;;  %v5911_v9 = vld [vmem:[#allocation113_spill] sm:$0xff] }
 0x6f8   :  { %v1270_v33 = vadd.f32 %v1266_v34, %v1256_v17  ;;  %v1321_v38 = vadd.f32 %v5896_v39, %v1295_v40  ;;  %v1323_v18 = vadd.f32 %v5898_v7, %v1297_v4  ;;  %v1609_v24 = vmul.f32 %v1607_v10, %v5908_v28  ;;  %v5909_v34 = vld [vmem:[#allocation111_spill] sm:$0xff]  ;;  %v5910_v25 = vld [vmem:[#allocation112_spill] sm:$0xff] }
 0x6f9   :  { %v1320_v6 = vadd.f32 %v5897_v62, %v1294_v14  ;;  %v1608_v8 = vmul.f32 %v1607_v10, %v5909_v34  ;;  %v1610_v14 = vmul.f32 %v1607_v10, %v5911_v9  ;;  %v5915_v62 = vld [vmem:[#allocation129_spill] sm:$0xff]  ;;  %v1673_v7 = vstv %s3467_s28 }
 0x6fa   :  { %v1296_v52 = vadd.f32 %v5894_v59, %v1270_v33  ;;  %v1547_v13 = vadd.f32 %v1543_v32, %v1321_v38  ;;  %v1549_v42 = vadd.f32 %v1545_v61, %v1323_v18  ;;  %v1611_v33 = vmul.f32 %v1607_v10, %v5910_v25  ;;  %v5913_v59 = vld [vmem:[#allocation127_spill] sm:$0xff] }
 0x6fb   :  { %v1546_v23 = vadd.f32 %v1542_v57, %v1320_v6 }
 0x6fc   :  { %v1322_v44 = vadd.f32 %v5899_v41, %v1296_v52  ;;  %v1573_v3 = vadd.f32 %v5900_v47, %v1547_v13  ;;  %v1575_v51 = vadd.f32 %v5902_v53, %v1549_v42  ;;  %v5919_v47 = vld [vmem:[#allocation133_spill] sm:$0xff]  ;;  %v5921_v53 = vld [vmem:[#allocation115_spill] sm:$0xff] }
 0x6fd   :  { %v1572_v43 = vadd.f32 %v5901_v49, %v1546_v23  ;;  %v5918_v23 = vld [vmem:[#allocation132_spill] sm:$0xff]  ;;  %v5920_v49 = vld [vmem:[#allocation114_spill] sm:$0xff] }
 0x6fe   :  { %v1548_v56 = vadd.f32 %v1544_v1, %v1322_v44  ;;  %v1599_v16 = vadd.f32 %v5904_v20, %v1573_v3  ;;  %v1601_v17 = vadd.f32 %v5906_v2, %v1575_v51  ;;  %v5917_v44 = vld [vmem:[#allocation131_spill] sm:$0xff]  ;;  %v1674_v51 = vmul.f32 %v1673_v7, %v5921_v53  ;;  %v5937_v53 = vld [vmem:[#allocation157_spill] sm:$0xff] }
 0x6ff   :  { %v1598_v54 = vadd.f32 %v5905_v60, %v1572_v43  ;;  %v1675_v43 = vmul.f32 %v1673_v7, %v5920_v49 }
 0x700   :  { %v1574_v19 = vadd.f32 %v5903_v12, %v1548_v56  ;;  %v1613_v26 = vadd.f32 %v1609_v24, %v1599_v16  ;;  %v1615_v50 = vadd.f32 %v1611_v33, %v1601_v17  ;;  %v2807_v56 = vstv %s3520_s29  ;;  %v5923_v12 = vld [vmem:[#allocation117_spill] sm:$0xff]  ;;  %v5926_v24 = vld [vmem:[#allocation136_spill] sm:$0xff] }
 0x701   :  { %v1612_v32 = vadd.f32 %v1608_v8, %v1598_v54  ;;  %v1951_v17 = vstv %s3480_s30  ;;  %v5927_v8 = vld [vmem:[#allocation144_spill] sm:$0xff]  ;;  %v5928_v33 = vld [vmem:[#allocation137_spill] sm:$0xff] }
 0x702   :  { %v1600_v37 = vadd.f32 %v5907_v15, %v1574_v19  ;;  %v1639_v61 = vadd.f32 %v5912_v27, %v1613_v26  ;;  %v1641_v1 = vadd.f32 %v5914_v30, %v1615_v50  ;;  %v1676_v19 = vmul.f32 %v1673_v7, %v5923_v12  ;;  %v5939_v12 = vld [vmem:[#allocation155_spill] sm:$0xff] }
 0x703   :  { %v1638_v52 = vadd.f32 %v5913_v59, %v1612_v32  ;;  %v1955_v25 = vmul.f32 %v1951_v17, %v5927_v8  ;;  %v5930_v32 = vld [vmem:[#allocation140_spill] sm:$0xff]  ;;  %v2847_v30 = vstv %s3522_s6  ;;  %v2873_v8 = vstv %s3523_s8 }
 0x704   :  { %v1614_v57 = vadd.f32 %v1610_v14, %v1600_v37  ;;  %v1667_v42 = vadd.f32 %v5918_v23, %v1641_v1  ;;  %v5925_v37 = vld [vmem:[#allocation135_spill] sm:$0xff]  ;;  %v5929_v14 = vld [vmem:[#allocation145_spill] sm:$0xff] }
 0x705   :  { %v1664_v13 = vadd.f32 %v5917_v44, %v1638_v52 }
 0x706   :  { %v1640_v6 = vadd.f32 %v5915_v62, %v1614_v57  ;;  %v5931_v57 = vld [vmem:[#allocation142_spill] sm:$0xff]  ;;  %v5933_v62 = vld [vmem:[#allocation141_spill] sm:$0xff] }
 0x707   :  { %v1678_v60 = vadd.f32 %v1674_v51, %v1664_v13  ;;  %v1953_v27 = vmul.f32 %v1951_v17, %v5931_v57 }
 0x708   :  { %v1666_v3 = vadd.f32 %v5919_v47, %v1640_v6  ;;  %v5936_v47 = vld [vmem:[#allocation156_spill] sm:$0xff] }
 0x709   :  { %v1704_v28 = vadd.f32 %v5925_v37, %v1678_v60  ;;  %v5943_v37 = vld [vmem:[#allocation159_spill] sm:$0xff] }
 0x70a   :  { %v1680_v2 = vadd.f32 %v1676_v19, %v1666_v3 }
 0x70b   :  { %v2753_v0 = vpop.permute.xlu1 %2752  ;;  %v2751_v22 = vpop.permute.xlu0 %2750 }
 0x70c   :  { %2763 = vst.msk [vmem:[#allocation2 + $0x9] sm:$0xff] %vm301_vm5, %v2753_v0  ;;  %2762 = vst.msk [vmem:[#allocation2 + $0x1] sm:$0xff] %vm301_vm5, %v2751_v22  ;;  %v5916_v22 = vld [vmem:[#allocation130_spill] sm:$0xff]  ;;  %v1706_v9 = vadd.f32 %v5928_v33, %v1680_v2 }
 0x70d   :  { %v1665_v41 = vadd.f32 %v5916_v22, %v1639_v61  ;;  %v5932_v61 = vld [vmem:[#allocation143_spill] sm:$0xff] }
 0x70e   :  { %v1952_v59 = vmul.f32 %v1951_v17, %v5932_v61  ;;  %v1732_v6 = vadd.f32 %v5933_v62, %v1706_v9  ;;  %v5946_v9 = vld [vmem:[#allocation146_spill] sm:$0xff]  ;;  %v5949_v62 = vld [vmem:[#allocation165_spill] sm:$0xff] }
 0x70f   :  { %v2757_v36 = vpop.permute.xlu1 %2756  ;;  %v2755_v35 = vpop.permute.xlu0 %2754  ;;  %v1679_v16 = vadd.f32 %v1675_v43, %v1665_v41 }
 0x710   :  { %2765 = vst.msk [vmem:[#allocation2 + $0x21] sm:$0xff] %vm301_vm5, %v2757_v36  ;;  %2764 = vst.msk [vmem:[#allocation2 + $0x19] sm:$0xff] %vm301_vm5, %v2755_v35  ;;  %v5922_v36 = vld [vmem:[#allocation116_spill] sm:$0xff] }
 0x711   :  { %v1677_v35 = vmul.f32 %v1673_v7, %v5922_v36  ;;  %v5934_v7 = vld [vmem:[#allocation138_spill] sm:$0xff] }
 0x712   :  { %v5938_v36 = vld [vmem:[#allocation154_spill] sm:$0xff] }
 0x713   :  { %v5270_v31 = vld [vmem:[#allocation2 + $0x8] sm:$0xff]  ;;  %v5272_v40 = vld [vmem:[#allocation2] sm:$0xff]  ;;  %v1681_v54 = vadd.f32 %v1677_v35, %v1667_v42 }
 0x714   :  { %v2783_v5 = vmul.f32 %v2781_v45, %v5270_v31  ;;  %v2782_v4 = vmul.f32 %v2781_v45, %v5272_v40  ;;  %v2809_v10 = vmul.f32 %v2807_v56, %v5270_v31  ;;  %v2808_v20 = vmul.f32 %v2807_v56, %v5272_v40  ;;  %v5316_v52 = vld [vmem:[#allocation2 + $0x9] sm:$0xff]  ;;  %v5318_v1 = vld [vmem:[#allocation2 + $0x1] sm:$0xff] }
 0x715   :  { %v1707_v34 = vadd.f32 %v5926_v24, %v1681_v54  ;;  %v2849_v13 = vmul.f32 %v2847_v30, %v5316_v52  ;;  %v2848_v23 = vmul.f32 %v2847_v30, %v5318_v1  ;;  %v2017_v54 = vstv %s5309_s7  ;;  %v5944_v24 = vld [vmem:[#allocation148_spill] sm:$0xff] }
 0x716   :  { %2792 = vrot.lane.b32.xlu1 %v2783_v5, %s3647_s15  ;;  %2790 = vrot.lane.b32.xlu0 %v2782_v4, %s3647_s15  ;;  %v1954_v5 = vmul.f32 %v1951_v17, %v5929_v14  ;;  %v2019_v14 = vmul.f32 %v2017_v54, %v5946_v9  ;;  %v2874_v57 = vmul.f32 %v2873_v8, %v5318_v1 }
 0x717   :  { %v5282_v39 = vld [vmem:[#allocation2 + $0x20] sm:$0xff]  ;;  %v5284_v38 = vld [vmem:[#allocation2 + $0x18] sm:$0xff]  ;;  %v1733_v50 = vadd.f32 %v5930_v32, %v1707_v34  ;;  %v2021_v34 = vmul.f32 %v2017_v54, %v5944_v24 }
 0x718   :  { %v2785_v18 = vmul.f32 %v2781_v45, %v5282_v39  ;;  %v2784_v0 = vmul.f32 %v2781_v45, %v5284_v38  ;;  %v5924_v45 = vld [vmem:[#allocation134_spill] sm:$0xff]  ;;  %v2811_v4 = vmul.f32 %v2807_v56, %v5282_v39  ;;  %v2810_v26 = vmul.f32 %v2807_v56, %v5284_v38  ;;  %v5328_v49 = vld [vmem:[#allocation2 + $0x21] sm:$0xff]  ;;  %v5330_v43 = vld [vmem:[#allocation2 + $0x19] sm:$0xff] }
 0x719   :  { %v1705_v15 = vadd.f32 %v5924_v45, %v1679_v16  ;;  %v1959_v41 = vadd.f32 %v1955_v25, %v1733_v50  ;;  %v1958_v44 = vadd.f32 %v1954_v5, %v1732_v6  ;;  %v5941_v16 = vld [vmem:[#allocation161_spill] sm:$0xff]  ;;  %v2851_v2 = vmul.f32 %v2847_v30, %v5328_v49  ;;  %v5942_v45 = vld [vmem:[#allocation158_spill] sm:$0xff]  ;;  %v5947_v5 = vld [vmem:[#allocation147_spill] sm:$0xff] }
 0x71a   :  { %2796 = vrot.lane.b32.xlu1 %v2785_v18, %s3647_s15  ;;  %2794 = vrot.lane.b32.xlu0 %v2784_v0, %s3647_s15  ;;  %v5935_v0 = vld [vmem:[#allocation139_spill] sm:$0xff]  ;;  %v2850_v17 = vmul.f32 %v2847_v30, %v5330_v43  ;;  %v5945_v25 = vld [vmem:[#allocation149_spill] sm:$0xff]  ;;  %v2875_v50 = vmul.f32 %v2873_v8, %v5316_v52 }
 0x71b   :  { %v1731_v18 = vadd.f32 %v5934_v7, %v1705_v15  ;;  %v1730_v22 = vadd.f32 %v5935_v0, %v1704_v28  ;;  %v1985_v3 = vadd.f32 %v5936_v47, %v1959_v41  ;;  %v1984_v51 = vadd.f32 %v5937_v53, %v1958_v44  ;;  %v5950_v7 = vld [vmem:[#allocation162_spill] sm:$0xff]  ;;  %v5951_v0 = vld [vmem:[#allocation163_spill] sm:$0xff]  ;;  %v5952_v41 = vld [vmem:[#allocation168_spill] sm:$0xff] }
 0x71c   :  { %v2020_v33 = vmul.f32 %v2017_v54, %v5945_v25  ;;  %v2876_v47 = vmul.f32 %v2873_v8, %v5330_v43 }
 0x71d   :  { %v1957_v42 = vadd.f32 %v1953_v27, %v1731_v18  ;;  %v1956_v56 = vadd.f32 %v1952_v59, %v1730_v22  ;;  %v2010_v60 = vadd.f32 %v5941_v16, %v1984_v51  ;;  %v5948_v59 = vld [vmem:[#allocation164_spill] sm:$0xff]  ;;  %v5955_v51 = vld [vmem:[#allocation167_spill] sm:$0xff]  ;;  %v5957_v16 = vld [vmem:[#allocation153_spill] sm:$0xff] }
 0x71e   :  { %2818 = vrot.lane.b32.xlu1 %v2809_v10, %s3648_s17  ;;  %2816 = vrot.lane.b32.xlu0 %v2808_v20, %s3648_s17  ;;  %v5940_v10 = vld [vmem:[#allocation160_spill] sm:$0xff] }
 0x71f   :  { %v1983_v35 = vadd.f32 %v5938_v36, %v1957_v42  ;;  %v1982_v19 = vadd.f32 %v5939_v12, %v1956_v56  ;;  %v2011_v20 = vadd.f32 %v5940_v10, %v1985_v3  ;;  %v2024_v32 = vadd.f32 %v2020_v33, %v2010_v60  ;;  %v5954_v3 = vld [vmem:[#allocation166_spill] sm:$0xff]  ;;  %v5960_v33 = vld [vmem:[#allocation172_spill] sm:$0xff] }
 0x720   :  { %v2083_v42 = vstv %s3486_s9  ;;  %v2877_v56 = vmul.f32 %v2873_v8, %v5328_v49  ;;  %v2913_v10 = vstv %s3525_s3 }
 0x721   :  { %v2009_v15 = vadd.f32 %v5942_v45, %v1983_v35  ;;  %v2008_v28 = vadd.f32 %v5943_v37, %v1982_v19  ;;  %v2050_v6 = vadd.f32 %v5949_v62, %v2024_v32  ;;  %v5956_v35 = vld [vmem:[#allocation152_spill] sm:$0xff]  ;;  %v5365_v19 = vld [vmem:[#allocation2 + $0xa] sm:$0xff]  ;;  %v2086_v60 = vmul.f32 %v2083_v42, %v5957_v16 }
 0x722   :  { %2822 = vrot.lane.b32.xlu1 %v2811_v4, %s3648_s17  ;;  %2820 = vrot.lane.b32.xlu0 %v2810_v26, %s3648_s17  ;;  %v2018_v4 = vmul.f32 %v2017_v54, %v5947_v5  ;;  %v2025_v26 = vadd.f32 %v2021_v34, %v2011_v20  ;;  %v2087_v12 = vmul.f32 %v2083_v42, %v5956_v35  ;;  %v5367_v20 = vld [vmem:[#allocation2 + $0x2] sm:$0xff]  ;;  %v5958_v54 = vld [vmem:[#allocation150_spill] sm:$0xff]  ;;  %v5381_v5 = vld [vmem:[#allocation2 + $0x1a] sm:$0xff] }
 0x723   :  { %v2023_v27 = vadd.f32 %v2019_v14, %v2009_v15  ;;  %v2915_v24 = vmul.f32 %v2913_v10, %v5365_v19  ;;  %v2914_v34 = vmul.f32 %v2913_v10, %v5367_v20  ;;  %v5379_v14 = vld [vmem:[#allocation2 + $0x22] sm:$0xff] }
 0x724   :  { %v2022_v61 = vadd.f32 %v2018_v4, %v2008_v28  ;;  %v2051_v30 = vadd.f32 %v5948_v59, %v2025_v26  ;;  %v2361_v28 = vstv %s3499_s10  ;;  %v5961_v4 = vld [vmem:[#allocation173_spill] sm:$0xff]  ;;  %v5962_v32 = vld [vmem:[#allocation180_spill] sm:$0xff] }
 0x725   :  { %v2049_v18 = vadd.f32 %v5950_v7, %v2023_v27 }
 0x726   :  { %2858 = vrot.lane.b32.xlu1 %v2849_v13, %s3647_s15  ;;  %2856 = vrot.lane.b32.xlu0 %v2848_v23, %s3647_s15  ;;  %v2048_v22 = vadd.f32 %v5951_v0, %v2022_v61  ;;  %v2077_v44 = vadd.f32 %v5952_v41, %v2051_v30  ;;  %v5953_v13 = vld [vmem:[#allocation169_spill] sm:$0xff]  ;;  %v5964_v61 = vld [vmem:[#allocation170_spill] sm:$0xff]  ;;  %v5965_v30 = vld [vmem:[#allocation171_spill] sm:$0xff] }
 0x727   :  { %v2076_v23 = vadd.f32 %v5953_v13, %v2050_v6  ;;  %v2075_v53 = vadd.f32 %v5954_v3, %v2049_v18  ;;  %v5966_v6 = vld [vmem:[#allocation178_spill] sm:$0xff]  ;;  %v5967_v18 = vld [vmem:[#allocation179_spill] sm:$0xff] }
 0x728   :  { %v2074_v36 = vadd.f32 %v5955_v51, %v2048_v22  ;;  %v2091_v15 = vadd.f32 %v2087_v12, %v2077_v44  ;;  %v2363_v7 = vmul.f32 %v2361_v28, %v5966_v6  ;;  %v2362_v0 = vmul.f32 %v2361_v28, %v5967_v18  ;;  %v5968_v22 = vld [vmem:[#allocation176_spill] sm:$0xff]  ;;  %v5969_v44 = vld [vmem:[#allocation177_spill] sm:$0xff]  ;;  %v5971_v3 = vld [vmem:[#allocation175_spill] sm:$0xff] }
 0x729   :  { %v2090_v37 = vadd.f32 %v2086_v60, %v2076_v23  ;;  %v2917_v23 = vmul.f32 %v2913_v10, %v5379_v14  ;;  %v2939_v51 = vstv %s5369_s11 }
 0x72a   :  { %2862 = vrot.lane.b32.xlu1 %v2851_v2, %s3647_s15  ;;  %2860 = vrot.lane.b32.xlu0 %v2850_v17, %s3647_s15  ;;  %v2085_v2 = vmul.f32 %v2083_v42, %v5958_v54  ;;  %v5959_v17 = vld [vmem:[#allocation151_spill] sm:$0xff]  ;;  %v2117_v9 = vadd.f32 %v5960_v33, %v2091_v15  ;;  %v2941_v15 = vmul.f32 %v2939_v51, %v5365_v19 }
 0x72b   :  { %v2084_v45 = vmul.f32 %v2083_v42, %v5959_v17  ;;  %v2116_v26 = vadd.f32 %v5961_v4, %v2090_v37  ;;  %v2916_v42 = vmul.f32 %v2913_v10, %v5381_v5  ;;  %v5973_v17 = vld [vmem:[#allocation188_spill] sm:$0xff]  ;;  %v2940_v37 = vmul.f32 %v2939_v51, %v5367_v20 }
 0x72c   :  { %v2089_v8 = vadd.f32 %v2085_v2, %v2075_v53  ;;  %v2143_v41 = vadd.f32 %v5968_v22, %v2117_v9  ;;  %v5972_v2 = vld [vmem:[#allocation187_spill] sm:$0xff]  ;;  %v5977_v9 = vld [vmem:[#allocation192_spill] sm:$0xff]  ;;  %v3191_v22 = vstv %s5401_s12 }
 0x72d   :  { %v2088_v25 = vadd.f32 %v2084_v45, %v2074_v36  ;;  %v2142_v13 = vadd.f32 %v5969_v44, %v2116_v26  ;;  %v2427_v26 = vstv %s5386_s0 }
 0x72e   :  { %2884 = vrot.lane.b32.xlu1 %v2875_v50, %s3648_s17  ;;  %2882 = vrot.lane.b32.xlu0 %v2874_v57, %s3648_s17  ;;  %v2365_v50 = vmul.f32 %v2361_v28, %v5962_v32  ;;  %v5963_v57 = vld [vmem:[#allocation181_spill] sm:$0xff]  ;;  %v2115_v59 = vadd.f32 %v5964_v61, %v2089_v8  ;;  %v2431_v6 = vmul.f32 %v2427_v26, %v5111_v29 }
 0x72f   :  { %v2364_v27 = vmul.f32 %v2361_v28, %v5963_v57  ;;  %v2114_v62 = vadd.f32 %v5965_v30, %v2088_v25  ;;  %v5974_v28 = vld [vmem:[#allocation185_spill] sm:$0xff]  ;;  %v5976_v25 = vld [vmem:[#allocation191_spill] sm:$0xff]  ;;  %v5979_v57 = vld [vmem:[#allocation190_spill] sm:$0xff]  ;;  %v2943_v30 = vmul.f32 %v2939_v51, %v5379_v14  ;;  %v2429_v18 = vmul.f32 %v2427_v26, %v5809_v11 }
 0x730   :  { %v2369_v36 = vadd.f32 %v2365_v50, %v2143_v41  ;;  %v5978_v32 = vld [vmem:[#allocation189_spill] sm:$0xff] }
 0x731   :  { %v2140_v53 = vadd.f32 %v5971_v3, %v2114_v62  ;;  %v2368_v35 = vadd.f32 %v2364_v27, %v2142_v13  ;;  %v2942_v62 = vmul.f32 %v2939_v51, %v5381_v5 }
 0x732   :  { %2888 = vrot.lane.b32.xlu1 %v2877_v56, %s3648_s17  ;;  %2886 = vrot.lane.b32.xlu0 %v2876_v47, %s3648_s17  ;;  %v5970_v56 = vld [vmem:[#allocation174_spill] sm:$0xff]  ;;  %v2395_v10 = vadd.f32 %v5972_v2, %v2369_v36  ;;  %v2493_v2 = vstv %s5420_s13 }
 0x733   :  { %v2141_v47 = vadd.f32 %v5970_v56, %v2115_v59  ;;  %v2366_v16 = vadd.f32 %v2362_v0, %v2140_v53  ;;  %v2394_v45 = vadd.f32 %v5973_v17, %v2368_v35  ;;  %v2428_v0 = vmul.f32 %v2427_v26, %v5810_v46  ;;  %v5980_v53 = vld [vmem:[#allocation193_spill] sm:$0xff]  ;;  %v5981_v36 = vld [vmem:[#allocation194_spill] sm:$0xff] }
 0x734   :  { %v2421_v33 = vadd.f32 %v5976_v25, %v2395_v10 }
 0x735   :  { %v2367_v12 = vadd.f32 %v2363_v7, %v2141_v47  ;;  %v2420_v4 = vadd.f32 %v5977_v9, %v2394_v45  ;;  %v2430_v7 = vmul.f32 %v2427_v26, %v5113_v21 }
 0x736   :  { %2924 = vrot.lane.b32.xlu1 %v2915_v24, %s3647_s15  ;;  %2922 = vrot.lane.b32.xlu0 %v2914_v34, %s3647_s15  ;;  %v5975_v34 = vld [vmem:[#allocation186_spill] sm:$0xff]  ;;  %v2435_v41 = vadd.f32 %v2431_v6, %v2421_v33  ;;  %v3257_v6 = vstv %s3541_s16 }
 0x737   :  { %v2393_v24 = vadd.f32 %v5974_v28, %v2367_v12  ;;  %v2392_v8 = vadd.f32 %v5975_v34, %v2366_v16  ;;  %v2434_v44 = vadd.f32 %v2430_v7, %v2420_v4  ;;  %v2495_v34 = vmul.f32 %v2493_v2, %v5147_v48 }
 0x738   :  { %v2496_v48 = vmul.f32 %v2493_v2, %v5165_v58 }
 0x739   :  { %v2419_v50 = vadd.f32 %v5978_v32, %v2393_v24  ;;  %v2418_v27 = vadd.f32 %v5979_v57, %v2392_v8  ;;  %v2494_v8 = vmul.f32 %v2493_v2, %v5149_v63 }
 0x73a   :  { %2928 = vrot.lane.b32.xlu1 %v2917_v23, %s3647_s15  ;;  %2926 = vrot.lane.b32.xlu0 %v2916_v42, %s3647_s15 }
 0x73b   :  { %v3163_v60 = vpop.permute.xlu1 %3162  ;;  %v3161_v54 = vpop.permute.xlu0 %3160  ;;  %v2433_v13 = vadd.f32 %v2429_v18, %v2419_v50  ;;  %v2432_v23 = vadd.f32 %v2428_v0, %v2418_v27  ;;  %v2497_v27 = vmul.f32 %v2493_v2, %v5163_v55 }
 0x73c   :  { %3173 = vst.msk [vmem:[#allocation2 + $0x9] sm:$0xff] %vm301_vm5, %v3163_v60  ;;  %3172 = vst.msk [vmem:[#allocation2 + $0x1] sm:$0xff] %vm301_vm5, %v3161_v54 }
 0x73d   :  { %v2459_v51 = vadd.f32 %v5980_v53, %v2433_v13  ;;  %v2458_v35 = vadd.f32 %v5981_v36, %v2432_v23 }
 0x73e   :  { %2950 = vrot.lane.b32.xlu1 %v2941_v15, %s3648_s17  ;;  %2948 = vrot.lane.b32.xlu0 %v2940_v37, %s3648_s17  ;;  %v3217_v37 = vstv %s3539_s14 }
 0x73f   :  { %v3167_v61 = vpop.permute.xlu1 %3166  ;;  %v3165_v59 = vpop.permute.xlu0 %3164 }
 0x740   :  { %3175 = vst.msk [vmem:[#allocation2 + $0x21] sm:$0xff] %vm301_vm5, %v3167_v61  ;;  %3174 = vst.msk [vmem:[#allocation2 + $0x19] sm:$0xff] %vm301_vm5, %v3165_v59 }
 0x742   :  { %2954 = vrot.lane.b32.xlu1 %v2943_v30, %s3648_s17  ;;  %2952 = vrot.lane.b32.xlu0 %v2942_v62, %s3648_s17 }
 0x743   :  { %v2453_v42 = vpop.permute.xlu1 %2452  ;;  %v2451_v56 = vpop.permute.xlu0 %2450  ;;  %v5433_v29 = vld [vmem:[#allocation2 + $0x8] sm:$0xff]  ;;  %v5435_v21 = vld [vmem:[#allocation2] sm:$0xff] }
 0x744   :  { %v2461_v11 = vadd.f32 %v2453_v42, %v2435_v41  ;;  %v2460_v47 = vadd.f32 %v2451_v56, %v2434_v44  ;;  %v3193_v46 = vmul.f32 %v3191_v22, %v5433_v29  ;;  %v3192_v3 = vmul.f32 %v3191_v22, %v5435_v21  ;;  %v5462_v62 = vld [vmem:[#allocation2 + $0x9] sm:$0xff]  ;;  %v5464_v7 = vld [vmem:[#allocation2 + $0x1] sm:$0xff] }
 0x745   :  { %v3219_v9 = vmul.f32 %v3217_v37, %v5433_v29  ;;  %v3218_v4 = vmul.f32 %v3217_v37, %v5435_v21  ;;  %v3259_v13 = vmul.f32 %v3257_v6, %v5462_v62  ;;  %v3258_v23 = vmul.f32 %v3257_v6, %v5464_v7 }
 0x746   :  { %3202 = vrot.lane.b32.xlu1 %v3193_v46, %s3647_s15  ;;  %3200 = vrot.lane.b32.xlu0 %v3192_v3, %s3647_s15 }
 0x747   :  { %v2475_v12 = vpop.permute.xlu1 %2474  ;;  %v2473_v16 = vpop.permute.xlu0 %2472  ;;  %v5443_v60 = vld [vmem:[#allocation2 + $0x20] sm:$0xff]  ;;  %v5445_v54 = vld [vmem:[#allocation2 + $0x18] sm:$0xff] }
 0x748   :  { %v2485_v10 = vadd.f32 %v2475_v12, %v2459_v51  ;;  %v2484_v17 = vadd.f32 %v2473_v16, %v2458_v35  ;;  %v3195_v45 = vmul.f32 %v3191_v22, %v5443_v60  ;;  %v3194_v15 = vmul.f32 %v3191_v22, %v5445_v54  ;;  %v5470_v42 = vld [vmem:[#allocation2 + $0x21] sm:$0xff]  ;;  %v5472_v56 = vld [vmem:[#allocation2 + $0x19] sm:$0xff] }
 0x749   :  { %v3221_v59 = vmul.f32 %v3217_v37, %v5443_v60  ;;  %v3220_v30 = vmul.f32 %v3217_v37, %v5445_v54  ;;  %v2771_v22 = vstv %s3518_s4  ;;  %v3261_v36 = vmul.f32 %v3257_v6, %v5470_v42 }
 0x74a   :  { %3206 = vrot.lane.b32.xlu1 %v3195_v45, %s3647_s15  ;;  %3204 = vrot.lane.b32.xlu0 %v3194_v15, %s3647_s15  ;;  %v2499_v26 = vadd.f32 %v2495_v34, %v2485_v10  ;;  %v2498_v32 = vadd.f32 %v2494_v8, %v2484_v17  ;;  %v2773_v46 = vmul.f32 %v2771_v22, %v5270_v31  ;;  %v3283_v12 = vstv %s3542_s18 }
 0x74b   :  { %v2479_v28 = vpop.permute.xlu1 %2478  ;;  %v2477_v24 = vpop.permute.xlu0 %2476  ;;  %v2772_v3 = vmul.f32 %v2771_v22, %v5272_v40  ;;  %v3260_v35 = vmul.f32 %v3257_v6, %v5472_v56  ;;  %v2775_v31 = vmul.f32 %v2771_v22, %v5282_v39  ;;  %v2774_v40 = vmul.f32 %v2771_v22, %v5284_v38  ;;  %v5492_v38 = vld [vmem:[#allocation2 + $0x2] sm:$0xff] }
 0x74c   :  { %v2487_v25 = vadd.f32 %v2479_v28, %v2461_v11  ;;  %v2486_v33 = vadd.f32 %v2477_v24, %v2460_v47  ;;  %v3285_v37 = vmul.f32 %v3283_v12, %v5462_v62  ;;  %v3284_v28 = vmul.f32 %v3283_v12, %v5464_v7 }
 0x74d   :  { %v3287_v8 = vmul.f32 %v3283_v12, %v5470_v42  ;;  %v3323_v39 = vstv %s3544_s19 }
 0x74e   :  { %3228 = vrot.lane.b32.xlu1 %v3219_v9, %s3648_s17  ;;  %3226 = vrot.lane.b32.xlu0 %v3218_v4, %s3648_s17  ;;  %v2501_v18 = vadd.f32 %v2497_v27, %v2487_v25  ;;  %v2500_v55 = vadd.f32 %v2496_v48, %v2486_v33  ;;  %v3286_v25 = vmul.f32 %v3283_v12, %v5472_v56  ;;  %v5490_v33 = vld [vmem:[#allocation2 + $0xa] sm:$0xff]  ;;  %v3349_v27 = vstv %s3545_s25 }
 0x74f   :  { %v2515_v50 = vpop.permute.xlu1 %2514  ;;  %v2513_v57 = vpop.permute.xlu0 %2512  ;;  %v3325_v9 = vmul.f32 %v3323_v39, %v5490_v33  ;;  %v3324_v4 = vmul.f32 %v3323_v39, %v5492_v38  ;;  %v3351_v48 = vmul.f32 %v3349_v27, %v5490_v33 }
 0x750   :  { %v2525_v63 = vadd.f32 %v2515_v50, %v2499_v26  ;;  %v2524_v61 = vadd.f32 %v2513_v57, %v2498_v32  ;;  %v5498_v26 = vld [vmem:[#allocation2 + $0x22] sm:$0xff]  ;;  %v5500_v32 = vld [vmem:[#allocation2 + $0x1a] sm:$0xff] }
 0x751   :  { %v3327_v50 = vmul.f32 %v3323_v39, %v5498_v26  ;;  %v3326_v57 = vmul.f32 %v3323_v39, %v5500_v32 }
 0x752   :  { %3232 = vrot.lane.b32.xlu1 %v3221_v59, %s3648_s17  ;;  %3230 = vrot.lane.b32.xlu0 %v3220_v30, %s3648_s17  ;;  %v3352_v59 = vmul.f32 %v3349_v27, %v5500_v32 }
 0x753   :  { %v2519_v0 = vpop.permute.xlu1 %2518  ;;  %v2517_v58 = vpop.permute.xlu0 %2516 }
 0x754   :  { %v2527_v41 = vadd.f32 %v2519_v0, %v2501_v18  ;;  %v2526_v44 = vadd.f32 %v2517_v58, %v2500_v55  ;;  %v2837_v0 = vstv %s3521_s20 }
 0x756   :  { %3268 = vrot.lane.b32.xlu1 %v3259_v13, %s3647_s15  ;;  %3266 = vrot.lane.b32.xlu0 %v3258_v23, %s3647_s15 }
 0x757   :  { %v2541_v11 = vpop.permute.xlu1 %2540  ;;  %v2539_v47 = vpop.permute.xlu0 %2538 }
 0x758   :  { %v2551_v53 = vadd.f32 %v2541_v11, %v2525_v63  ;;  %v2550_v51 = vadd.f32 %v2539_v47, %v2524_v61  ;;  %v3350_v63 = vmul.f32 %v3349_v27, %v5492_v38  ;;  %v3353_v61 = vmul.f32 %v3349_v27, %v5498_v26 }
 0x759   :  { %v2839_v11 = vmul.f32 %v2837_v0, %v5316_v52  ;;  %v2838_v47 = vmul.f32 %v2837_v0, %v5318_v1 }
 0x75a   :  { %3272 = vrot.lane.b32.xlu1 %v3261_v36, %s3647_s15  ;;  %3270 = vrot.lane.b32.xlu0 %v3260_v35, %s3647_s15  ;;  %v2777_v16 = vadd.f32 %v2773_v46, %v2551_v53  ;;  %v2776_v2 = vadd.f32 %v2772_v3, %v2550_v51 }
 0x75b   :  { %v2545_v10 = vpop.permute.xlu1 %2544  ;;  %v2543_v17 = vpop.permute.xlu0 %2542 }
 0x75c   :  { %v2553_v45 = vadd.f32 %v2545_v10, %v2527_v41  ;;  %v2552_v15 = vadd.f32 %v2543_v17, %v2526_v44  ;;  %v2841_v17 = vmul.f32 %v2837_v0, %v5328_v49 }
 0x75e   :  { %3294 = vrot.lane.b32.xlu1 %v3285_v37, %s3648_s17  ;;  %3292 = vrot.lane.b32.xlu0 %v3284_v28, %s3648_s17  ;;  %v2779_v24 = vadd.f32 %v2775_v31, %v2553_v45  ;;  %v2778_v34 = vadd.f32 %v2774_v40, %v2552_v15 }
 0x762   :  { %3298 = vrot.lane.b32.xlu1 %v3287_v8, %s3648_s17  ;;  %3296 = vrot.lane.b32.xlu0 %v3286_v25, %s3648_s17 }
 0x766   :  { %3334 = vrot.lane.b32.xlu1 %v3325_v9, %s3647_s15  ;;  %3332 = vrot.lane.b32.xlu0 %v3324_v4, %s3647_s15 }
 0x76a   :  { %3338 = vrot.lane.b32.xlu1 %v3327_v50, %s3647_s15  ;;  %3336 = vrot.lane.b32.xlu0 %v3326_v57, %s3647_s15  ;;  %s3524_s15 = sld [smem:[#allocation9 + $0x3c]] }
 0x76e   :  { %3360 = vrot.lane.b32.xlu1 %v3351_v48, %s3648_s17  ;;  %3358 = vrot.lane.b32.xlu0 %v3350_v63, %s3648_s17 }
 0x770   :  { %v2903_v1 = vstv %s3524_s15 }
 0x771   :  { %v2905_v39 = vmul.f32 %v2903_v1, %v5365_v19  ;;  %v2904_v49 = vmul.f32 %v2903_v1, %v5367_v20 }
 0x772   :  { %3364 = vrot.lane.b32.xlu1 %v3353_v61, %s3648_s17  ;;  %3362 = vrot.lane.b32.xlu0 %v3352_v59, %s3648_s17  ;;  %v2907_v61 = vmul.f32 %v2903_v1, %v5379_v14  ;;  %v2906_v59 = vmul.f32 %v2903_v1, %v5381_v5  ;;  %s3537_s17 = sld [smem:[#allocation9 + $0x3f]] }
 0x778   :  { %v3181_v20 = vstv %s3537_s17 }
 0x779   :  { %v3182_v14 = vmul.f32 %v3181_v20, %v5435_v21  ;;  %v3247_v21 = vstv %s3540_s21 }
 0x788   :  { %v2793_v30 = vpop.permute.xlu1 %2792  ;;  %v2791_v6 = vpop.permute.xlu0 %2790 }
 0x789   :  { %v2803_v58 = vadd.f32 %v2793_v30, %v2777_v16  ;;  %v2802_v22 = vadd.f32 %v2791_v6, %v2776_v2  ;;  %v2840_v16 = vmul.f32 %v2837_v0, %v5330_v43 }
 0x78c   :  { %v2797_v18 = vpop.permute.xlu1 %2796  ;;  %v2795_v55 = vpop.permute.xlu0 %2794 }
 0x78d   :  { %v2805_v46 = vadd.f32 %v2797_v18, %v2779_v24  ;;  %v2804_v3 = vadd.f32 %v2795_v55, %v2778_v34 }
 0x790   :  { %v2819_v41 = vpop.permute.xlu1 %2818  ;;  %v2817_v44 = vpop.permute.xlu0 %2816 }
 0x791   :  { %v2829_v13 = vadd.f32 %v2819_v41, %v2803_v58  ;;  %v2828_v23 = vadd.f32 %v2817_v44, %v2802_v22 }
 0x793   :  { %v2843_v53 = vadd.f32 %v2839_v11, %v2829_v13  ;;  %v2842_v51 = vadd.f32 %v2838_v47, %v2828_v23  ;;  %v3183_v11 = vmul.f32 %v3181_v20, %v5433_v29 }
 0x794   :  { %v2823_v36 = vpop.permute.xlu1 %2822  ;;  %v2821_v35 = vpop.permute.xlu0 %2820 }
 0x795   :  { %v2831_v12 = vadd.f32 %v2823_v36, %v2805_v46  ;;  %v2830_v10 = vadd.f32 %v2821_v35, %v2804_v3 }
 0x797   :  { %v2845_v2 = vadd.f32 %v2841_v17, %v2831_v12  ;;  %v2844_v31 = vadd.f32 %v2840_v16, %v2830_v10  ;;  %v3185_v12 = vmul.f32 %v3181_v20, %v5443_v60  ;;  %v3184_v10 = vmul.f32 %v3181_v20, %v5445_v54 }
 0x798   :  { %v2859_v40 = vpop.permute.xlu1 %2858  ;;  %v2857_v45 = vpop.permute.xlu0 %2856  ;;  %v3248_v60 = vmul.f32 %v3247_v21, %v5464_v7  ;;  %v3313_v7 = vstv %s3543_s22 }
 0x799   :  { %v2869_v37 = vadd.f32 %v2859_v40, %v2843_v53  ;;  %v2868_v28 = vadd.f32 %v2857_v45, %v2842_v51 }
 0x79c   :  { %v2863_v52 = vpop.permute.xlu1 %2862  ;;  %v2861_v15 = vpop.permute.xlu0 %2860 }
 0x79d   :  { %v2871_v9 = vadd.f32 %v2863_v52, %v2845_v2  ;;  %v2870_v43 = vadd.f32 %v2861_v15, %v2844_v31 }
 0x7a0   :  { %v2885_v24 = vpop.permute.xlu1 %2884  ;;  %v2883_v34 = vpop.permute.xlu0 %2882 }
 0x7a1   :  { %v2895_v8 = vadd.f32 %v2885_v24, %v2869_v37  ;;  %v2894_v25 = vadd.f32 %v2883_v34, %v2868_v28  ;;  %v3249_v24 = vmul.f32 %v3247_v21, %v5462_v62 }
 0x7a3   :  { %v2909_v4 = vadd.f32 %v2905_v39, %v2895_v8  ;;  %v2908_v50 = vadd.f32 %v2904_v49, %v2894_v25 }
 0x7a4   :  { %v2889_v57 = vpop.permute.xlu1 %2888  ;;  %v2887_v27 = vpop.permute.xlu0 %2886 }
 0x7a5   :  { %v2897_v48 = vadd.f32 %v2889_v57, %v2871_v9  ;;  %v2896_v63 = vadd.f32 %v2887_v27, %v2870_v43 }
 0x7a7   :  { %v2911_v30 = vadd.f32 %v2907_v61, %v2897_v48  ;;  %v2910_v6 = vadd.f32 %v2906_v59, %v2896_v63 }
 0x7a8   :  { %v2925_v18 = vpop.permute.xlu1 %2924  ;;  %v2923_v55 = vpop.permute.xlu0 %2922 }
 0x7a9   :  { %v2935_v58 = vadd.f32 %v2925_v18, %v2909_v4  ;;  %v2934_v22 = vadd.f32 %v2923_v55, %v2908_v50  ;;  %v3251_v4 = vmul.f32 %v3247_v21, %v5470_v42  ;;  %v3250_v50 = vmul.f32 %v3247_v21, %v5472_v56 }
 0x7aa   :  { %v3314_v42 = vmul.f32 %v3313_v7, %v5492_v38 }
 0x7ac   :  { %v2929_v19 = vpop.permute.xlu1 %2928  ;;  %v2927_v0 = vpop.permute.xlu0 %2926 }
 0x7ad   :  { %v2937_v47 = vadd.f32 %v2929_v19, %v2911_v30  ;;  %v2936_v5 = vadd.f32 %v2927_v0, %v2910_v6  ;;  %v3315_v0 = vmul.f32 %v3313_v7, %v5490_v33 }
 0x7b0   :  { %v2951_v41 = vpop.permute.xlu1 %2950  ;;  %v2949_v44 = vpop.permute.xlu0 %2948 }
 0x7b1   :  { %v2961_v13 = vadd.f32 %v2951_v41, %v2935_v58  ;;  %v2960_v23 = vadd.f32 %v2949_v44, %v2934_v22 }
 0x7b3   :  { %v3187_v46 = vadd.f32 %v3183_v11, %v2961_v13  ;;  %v3186_v3 = vadd.f32 %v3182_v14, %v2960_v23  ;;  %v3317_v11 = vmul.f32 %v3313_v7, %v5498_v26  ;;  %v3316_v14 = vmul.f32 %v3313_v7, %v5500_v32 }
 0x7b4   :  { %v2955_v53 = vpop.permute.xlu1 %2954  ;;  %v2953_v51 = vpop.permute.xlu0 %2952 }
 0x7b5   :  { %v2963_v36 = vadd.f32 %v2955_v53, %v2937_v47  ;;  %v2962_v35 = vadd.f32 %v2953_v51, %v2936_v5 }
 0x7b7   :  { %v3189_v17 = vadd.f32 %v3185_v12, %v2963_v36  ;;  %v3188_v16 = vadd.f32 %v3184_v10, %v2962_v35 }
 0x7b8   :  { %v3203_v2 = vpop.permute.xlu1 %3202  ;;  %v3201_v31 = vpop.permute.xlu0 %3200 }
 0x7b9   :  { %v3213_v45 = vadd.f32 %v3203_v2, %v3187_v46  ;;  %v3212_v52 = vadd.f32 %v3201_v31, %v3186_v3 }
 0x7bc   :  { %v3207_v29 = vpop.permute.xlu1 %3206  ;;  %v3205_v40 = vpop.permute.xlu0 %3204 }
 0x7bd   :  { %v3215_v34 = vadd.f32 %v3207_v29, %v3189_v17  ;;  %v3214_v54 = vadd.f32 %v3205_v40, %v3188_v16 }
 0x7c0   :  { %v3229_v15 = vpop.permute.xlu1 %3228  ;;  %v3227_v1 = vpop.permute.xlu0 %3226 }
 0x7c1   :  { %v3239_v37 = vadd.f32 %v3229_v15, %v3213_v45  ;;  %v3238_v28 = vadd.f32 %v3227_v1, %v3212_v52 }
 0x7c3   :  { %v3253_v8 = vadd.f32 %v3249_v24, %v3239_v37  ;;  %v3252_v25 = vadd.f32 %v3248_v60, %v3238_v28 }
 0x7c4   :  { %v3233_v39 = vpop.permute.xlu1 %3232  ;;  %v3231_v49 = vpop.permute.xlu0 %3230 }
 0x7c5   :  { %v3241_v9 = vadd.f32 %v3233_v39, %v3215_v34  ;;  %v3240_v43 = vadd.f32 %v3231_v49, %v3214_v54 }
 0x7c7   :  { %v3255_v57 = vadd.f32 %v3251_v4, %v3241_v9  ;;  %v3254_v27 = vadd.f32 %v3250_v50, %v3240_v43 }
 0x7c8   :  { %v3269_v48 = vpop.permute.xlu1 %3268  ;;  %v3267_v63 = vpop.permute.xlu0 %3266 }
 0x7c9   :  { %v3279_v59 = vadd.f32 %v3269_v48, %v3253_v8  ;;  %v3278_v30 = vadd.f32 %v3267_v63, %v3252_v25 }
 0x7cc   :  { %v3273_v62 = vpop.permute.xlu1 %3272  ;;  %v3271_v61 = vpop.permute.xlu0 %3270 }
 0x7cd   :  { %v3281_v20 = vadd.f32 %v3273_v62, %v3255_v57  ;;  %v3280_v56 = vadd.f32 %v3271_v61, %v3254_v27 }
 0x7d0   :  { %v3295_v6 = vpop.permute.xlu1 %3294  ;;  %v3293_v18 = vpop.permute.xlu0 %3292 }
 0x7d1   :  { %v3305_v55 = vadd.f32 %v3295_v6, %v3279_v59  ;;  %v3304_v19 = vadd.f32 %v3293_v18, %v3278_v30 }
 0x7d3   :  { %v3319_v58 = vadd.f32 %v3315_v0, %v3305_v55  ;;  %v3318_v22 = vadd.f32 %v3314_v42, %v3304_v19 }
 0x7d4   :  { %v3299_v41 = vpop.permute.xlu1 %3298  ;;  %v3297_v44 = vpop.permute.xlu0 %3296 }
 0x7d5   :  { %v3307_v13 = vadd.f32 %v3299_v41, %v3281_v20  ;;  %v3306_v23 = vadd.f32 %v3297_v44, %v3280_v56 }
 0x7d7   :  { %v3321_v47 = vadd.f32 %v3317_v11, %v3307_v13  ;;  %v3320_v5 = vadd.f32 %v3316_v14, %v3306_v23 }
 0x7d8   :  { %v3335_v46 = vpop.permute.xlu1 %3334  ;;  %v3333_v3 = vpop.permute.xlu0 %3332 }
 0x7d9   :  { %v3345_v51 = vadd.f32 %v3335_v46, %v3319_v58  ;;  %v3344_v38 = vadd.f32 %v3333_v3, %v3318_v22 }
 0x7dc   :  { %v3339_v53 = vpop.permute.xlu1 %3338  ;;  %v3337_v33 = vpop.permute.xlu0 %3336 }
 0x7dd   :  { %v3347_v17 = vadd.f32 %v3339_v53, %v3321_v47  ;;  %v3346_v16 = vadd.f32 %v3337_v33, %v3320_v5 }
 0x7e0   :  { %v3361_v36 = vpop.permute.xlu1 %3360  ;;  %v3359_v35 = vpop.permute.xlu0 %3358 }
 0x7e1   :  { %v3371_v12 = vadd.f32 %v3361_v36, %v3345_v51  ;;  %v3370_v10 = vadd.f32 %v3359_v35, %v3344_v38 }
 0x7e3   :  { %3376 = vst.msk [vmem:[#allocation10 + $0x8] sm:$0xff] %vm3374_vm6, %v3371_v12  ;;  %3375 = vst.msk [vmem:[#allocation10] sm:$0xff] %vm3374_vm6, %v3370_v10 }
 0x7e4   :  { %v3365_v26 = vpop.permute.xlu1 %3364  ;;  %v3363_v32 = vpop.permute.xlu0 %3362 }
 0x7e5   :  { %v3373_v2 = vadd.f32 %v3365_v26, %v3347_v17  ;;  %v3372_v31 = vadd.f32 %v3363_v32, %v3346_v16 }
 0x7e7   :  { %3378 = vst.msk [vmem:[#allocation10 + $0x18] sm:$0xff] %vm3374_vm6, %v3373_v2  ;;  %3377 = vst.msk [vmem:[#allocation10 + $0x10] sm:$0xff] %vm3374_vm6, %v3372_v31 }
 0x7e8   :  { %3627 = shalt.err (!%p3624_p5)
}
 0x7e9   :  { %s3628_s27 = scalar_lea.hbm %s5557_s5, 512 }
 0x7ea   :  { %p3629_p6 = scmp.ne.s32.totalorder %s5557_s5, %s3628_s27  ;;  %p3632_p7 = scmp.lt.u32.totalorder %s3628_s27, %s5557_s5 }
 0x7ec   :  { %p3634_p8 = pnand %p3632_p7, %p3629_p6 }
 0x7ee   :  { %3637 = shalt.err (!%p3634_p8)
}
 0x7ef   :  { %s3652_s7 = smov 128   ;;  %s3653_s8 = smov 8  }
 0x7f0   :  { %3390 = dma.vmem_to_hbm [thread:$0]  %s3385_s24, 512, %s5557_s5, [#allocation5], %s3652_s7, %s3652_s7, %s3653_s8  }
 0x7f1   :  { %3642 = dma.done.wait [#allocation5], 512  }
 0x7f2   :  { %3643 = vsyncadd [#allocation5], 4294966784 }
 0x7f3   :  { %3394 = vsyncpa [#allocation5], 1 }
 0x7f4   :  { %3395 = vsyncpa [#allocation6], 1 }
 0x7f5   :  { %3396 = vsyncpa [#allocation8], 1 }

</bundles_post_ra>
